<compile_context>
chip_gen: v7x
topology: tpu7x:2x2x1
jax: 0.10.0
libtpu: 0.0.40
codegen_flags: <defaults>
</compile_context>

<pallas_src>
import jax
import jax.numpy as jnp
from jax import lax
from jax.experimental import pallas as pl
from jax.experimental.pallas import tpu as pltpu


def _round_up(x, m):
    return ((x + m - 1) // m) * m


def _vmem_capacity_bytes():
    """Physical VMEM per TensorCore; conservative (v7x) fallback if the query fails."""
    try:
        return int(pltpu.get_tpu_info().vmem_capacity_bytes)
    except Exception:
        return 64 * 1024 * 1024


def _make_neck_kernel(P, block_n, Cp, cdtype):
    PP = P * P

    def kernel(x_ref, cw_ref, cb_ref, w1_ref, b1_ref, w2_ref, b2_ref, o_ref):
        # Resident conv weights: load each 3x3 tap matrix once; the same SSA value is
        # reused for every output position (best case for MXU weight-staging reuse).
        w_taps = [cw_ref[t] for t in range(9)]
        # Hoisted bias broadcast (JAX does not CSE broadcast_in_dim inside the unroll).
        bias = jnp.broadcast_to(cb_ref[...], (block_n, Cp))          # f32

        pooled = jnp.zeros((block_n, Cp), jnp.float32)

        # Static unroll over the P*P output positions of each patch (pos-major layout:
        # row r of the tile = position (r // block_n), patch-in-block (r % block_n)).
        for pos in range(PP):
            pi, pj = pos // P, pos % P
            acc = bias                                               # conv bias as init
            for dh in (-1, 0, 1):
                qi = pi + dh
                if qi < 0 or qi >= P:
                    continue                                         # zero-pad row: skip tap
                for dw in (-1, 0, 1):
                    qj = pj + dw
                    if qj < 0 or qj >= P:
                        continue                                     # zero-pad col: skip tap
                    src = (qi * P + qj) * block_n                    # 8-aligned static offset
                    lhs = x_ref[src:src + block_n, :]                # (block_n, Cp) slab
                    acc = acc + jnp.dot(lhs, w_taps[3 * (dh + 1) + (dw + 1)],
                                        preferred_element_type=jnp.float32)
            # ConvModule default ReLU, then the running avg-pool sum (copy-free pooling).
            pooled = pooled + jnp.maximum(acc, 0.0)

        pooled = pooled * jnp.float32(1.0 / PP)                      # AvgPool2d(P, P), f32

        # mlp: Linear -> ReLU -> Linear (matmuls in compute dtype, f32 accumulate).
        h = jnp.dot(pooled.astype(cdtype), w1_ref[...],
                    preferred_element_type=jnp.float32) + b1_ref[...]
        h = jnp.maximum(h, 0.0)
        out = jnp.dot(h.astype(cdtype), w2_ref[...],
                      preferred_element_type=jnp.float32) + b2_ref[...]
        o_ref[...] = out.astype(o_ref.dtype)

    return kernel


def _extract_patches(x, P):
    """(B, C, H, W) -> ((B*n_h*n_w, P*P, C), (B, n_h, n_w)); torch patch ordering."""
    B, C, H, W = x.shape
    n_h, n_w = H // P, W // P
    pat = (x.reshape(B, C, n_h, P, n_w, P)
            .transpose(0, 2, 4, 3, 5, 1)                 # (B, n_h, n_w, P, P, C)
            .reshape(B * n_h * n_w, P * P, C))
    return pat, (B, n_h, n_w)


def det_conv_gp_nonlinear_head_forward(x_levels, params, avg_size, *, block_n=None,
                                       compute_dtype=jnp.bfloat16):
    """Mirrors DetConvGpNonLinearHead.forward (default config): list in -> list out.

    All FPN levels are batched into a single pallas_call (shared weights).
    """
    conv_w, conv_b, w1, b1, w2, b2 = params
    P = avg_size
    PP = P * P
    C = x_levels[0].shape[1]
    hid = w1.shape[1]
    out_c = w2.shape[1]
    cd = jnp.dtype(compute_dtype)

    # Lane-aligned (multiple-of-128) channel counts: lane-dense K and lane-dense stores.
    Cp = _round_up(C, 128)
    Hp = _round_up(hid, 128)
    Op = _round_up(out_c, 128)

    # ---- patches from every level, concatenated along the patch axis ------------------
    pats, metas = [], []
    for x in x_levels:
        p, meta = _extract_patches(x, P)
        pats.append(p)
        metas.append(meta)
    patches = jnp.concatenate(pats, axis=0) if len(pats) > 1 else pats[0]
    N_total = patches.shape[0]

    # ---- tile sizing -------------------------------------------------------------------
    if block_n is None:
        bn_rows = max(8, (4096 // PP) // 8 * 8)        # ~4k spatial rows / grid step
        bn_vreg = max(8, (16384 // Cp) // 8 * 8)       # keep acc + pooled ~vreg resident
        block_n = min(bn_rows, bn_vreg)
    block_n = max(8, (block_n // 8) * 8)

    vmem_cap = _vmem_capacity_bytes()                  # 64 MiB v7x, 128 MiB v5e/v6e
    tile_budget = (2 * vmem_cap) // 5                  # ~40% of physical VMEM
    weight_bytes = (2 * (9 * Cp * Cp + Cp * Hp + Hp * Op) * cd.itemsize
                    + 2 * (Cp + Hp + Op) * 4)
    per_bn = 2 * PP * Cp * cd.itemsize + 2 * Op * 4 + 8 * Cp * 4
    cap_bn = max(8, ((max(tile_budget - weight_bytes, per_bn * 8)) // per_bn) // 8 * 8)
    block_n = min(block_n, cap_bn)

    if N_total >= 32:                                  # >=4 grid steps (2 per TC on v7x)
        block_n = min(block_n, max(8, (N_total // 4) // 8 * 8))
    block_n = min(block_n, _round_up(N_total, 8))

    N_pad = _round_up(N_total, block_n)
    G = N_pad // block_n
    R = block_n * PP

    vmem_limit = max(32 * 1024 * 1024,
                     min((3 * vmem_cap) // 4, 96 * 1024 * 1024))

    # ---- data prep: 1x HBM traffic, pos-major / patch-minor per block ------------------
    rows = jnp.pad(patches, ((0, N_pad - N_total), (0, 0), (0, Cp - C))).astype(compute_dtype)
    rows = (rows.reshape(G, block_n, PP, Cp)
                .transpose(0, 2, 1, 3)                 # (G, PP, block_n, Cp)
                .reshape(G * PP * block_n, Cp))

    # Conv weight (Co, Ci, 3, 3) -> per-tap (Ci, Co) matrices, zero-padded to (Cp, Cp).
    cw = jnp.transpose(conv_w, (2, 3, 1, 0)).reshape(9, C, C)
    cw = jnp.pad(cw, ((0, 0), (0, Cp - C), (0, Cp - C))).astype(compute_dtype)
    cb = jnp.pad(conv_b.reshape(1, C), ((0, 0), (0, Cp - C))).astype(jnp.float32)

    w1p = jnp.pad(w1, ((0, Cp - C), (0, Hp - hid))).astype(compute_dtype)
    b1p = jnp.pad(b1.reshape(1, hid), ((0, 0), (0, Hp - hid))).astype(jnp.float32)
    w2p = jnp.pad(w2, ((0, Hp - hid), (0, Op - out_c))).astype(compute_dtype)
    b2p = jnp.pad(b2.reshape(1, out_c), ((0, 0), (0, Op - out_c))).astype(jnp.float32)

    kernel = _make_neck_kernel(P, block_n, Cp, cd)

    out = pl.pallas_call(
        kernel,
        out_shape=jax.ShapeDtypeStruct((N_pad, Op), jnp.float32),
        grid_spec=pltpu.PrefetchScalarGridSpec(
            num_scalar_prefetch=0,
            grid=(G,),
            in_specs=[
                pl.BlockSpec((R, Cp), lambda i: (i, 0)),            # streamed activations
                pl.BlockSpec((9, Cp, Cp), lambda i: (0, 0, 0)),     # resident conv weights
                pl.BlockSpec((1, Cp), lambda i: (0, 0)),
                pl.BlockSpec((Cp, Hp), lambda i: (0, 0)),
                pl.BlockSpec((1, Hp), lambda i: (0, 0)),
                pl.BlockSpec((Hp, Op), lambda i: (0, 0)),
                pl.BlockSpec((1, Op), lambda i: (0, 0)),
            ],
            out_specs=pl.BlockSpec((block_n, Op), lambda i: (i, 0)),
        ),
        compiler_params=pltpu.CompilerParams(
            dimension_semantics=("parallel",),
            vmem_limit_bytes=int(vmem_limit)),
    )(rows, cw, cb, w1p, b1p, w2p, b2p)

    out = out[:N_total, :out_c]

    # Split the single batched output back into per-level feature lists.
    feats, start = [], 0
    for (B, n_h, n_w) in metas:
        n = B * n_h * n_w
        feats.append(out[start:start + n].reshape(B, n_h * n_w, out_c))
        start += n
    return feats


def det_conv_gp_nonlinear_head_level(x, params, avg_size, **kwargs):
    """Single FPN level convenience wrapper."""
    return det_conv_gp_nonlinear_head_forward([x], params, avg_size, **kwargs)[0]


def _reference_level(x, params, avg_size):
    """Pure-JAX reference matching the PyTorch forward semantics."""
    conv_w, conv_b, w1, b1, w2, b2 = params
    B, C, H, W = x.shape
    P = avg_size
    n_h, n_w = H // P, W // P
    patches = (x.reshape(B, C, n_h, P, n_w, P)
                .transpose(0, 2, 4, 1, 3, 5)
                .reshape(-1, C, P, P))
    y = lax.conv_general_dilated(patches, conv_w, (1, 1), ((1, 1), (1, 1)),
                                 dimension_numbers=('NCHW', 'OIHW', 'NCHW'),
                                 precision=lax.Precision.HIGHEST)
    y = jnp.maximum(y + conv_b[None, :, None, None], 0.0)
    pooled = jnp.mean(y, axis=(2, 3))                  # AvgPool2d(P, P) on each PxP patch
    h = jnp.maximum(jnp.dot(pooled, w1, precision=lax.Precision.HIGHEST) + b1, 0.0)
    out = jnp.dot(h, w2, precision=lax.Precision.HIGHEST) + b2
    return out.reshape(B, n_h * n_w, -1)


if __name__ == "__main__":
    B, C, H, W = 2, 8, 16, 16
    avg_size = 4
    hid_channels, out_channels = 16, 8

    key = jax.random.PRNGKey(0)
    ks = jax.random.split(key, 8)
    x1 = jax.random.normal(ks[0], (B, C, H, W), jnp.float32)            # FPN level 0
    x2 = jax.random.normal(ks[5], (2, C, 12, 12), jnp.float32)          # FPN level 1 (ragged N)

    conv_w = jax.random.normal(ks[1], (C, C, 3, 3), jnp.float32) * 0.1  # Conv2d(C, C, 3, pad=1)
    conv_b = jax.random.normal(ks[4], (C,), jnp.float32) * 0.05
    w1 = jax.random.normal(ks[2], (C, hid_channels), jnp.float32) * 0.2  # Linear(C, hid) (x @ W)
    b1 = jax.random.normal(ks[6], (hid_channels,), jnp.float32) * 0.05
    w2 = jax.random.normal(ks[3], (hid_channels, out_channels), jnp.float32) * 0.2
    b2 = jax.random.normal(ks[7], (out_channels,), jnp.float32) * 0.05
    params = (conv_w, conv_b, w1, b1, w2, b2)

    refs = [_reference_level(x1, params, avg_size), _reference_level(x2, params, avg_size)]

    # f32 compute path (tight tolerance): both FPN levels batched in one pallas_call.
    feats32 = det_conv_gp_nonlinear_head_forward([x1, x2], params, avg_size,
                                                 compute_dtype=jnp.float32)
    jax.block_until_ready(feats32)
    assert feats32[0].shape == (B, 16, out_channels), feats32[0].shape
    assert feats32[1].shape == (2, 9, out_channels), feats32[1].shape
    assert jnp.allclose(feats32[0], refs[0], atol=1e-4, rtol=1e-4), "f32 level0 mismatch"
    assert jnp.allclose(feats32[1], refs[1], atol=1e-4, rtol=1e-4), "f32 level1 mismatch"

    # Default bf16 compute path (bf16 matmuls, f32 accumulation): loose tolerance.
    feats_bf16 = det_conv_gp_nonlinear_head_forward([x1, x2], params, avg_size)
    jax.block_until_ready(feats_bf16)
    for f, r in zip(feats_bf16, refs):
        assert f.shape == r.shape
        assert jnp.allclose(f, r, atol=5e-2, rtol=5e-2), "bf16 mismatch vs reference"

    # Single-level helper path.
    lvl = det_conv_gp_nonlinear_head_level(x1, params, avg_size, compute_dtype=jnp.float32)
    jax.block_until_ready(lvl)
    assert jnp.allclose(lvl, refs[0], atol=1e-4, rtol=1e-4), "single-level mismatch"

    print("KERNEL_OK")
</pallas_src>

<mosaic_0001>
module attributes {stable_mosaic.version = 11 : i64} {
  func.func @kernel(%arg0: i32, %arg1: memref<128x128xf32, #tpu.memory_space<vmem>>, %arg2: memref<9x128x128xf32, #tpu.memory_space<vmem>>, %arg3: memref<1x128xf32, #tpu.memory_space<vmem>>, %arg4: memref<128x128xf32, #tpu.memory_space<vmem>>, %arg5: memref<1x128xf32, #tpu.memory_space<vmem>>, %arg6: memref<128x128xf32, #tpu.memory_space<vmem>>, %arg7: memref<1x128xf32, #tpu.memory_space<vmem>>, %arg8: memref<8x128xf32, #tpu.memory_space<vmem>>) attributes {dimension_semantics = [#tpu.dimension_semantics<parallel>], iteration_bounds = array<i64: 7>, scalar_prefetch = 0 : i64, scratch_operands = 0 : i64, tpu.core_type = #tpu.core_type<tc>, window_params = [{transform_indices = @transform_0, window_bounds = array<i64: 128, 128>}, {pipeline_mode = #tpu.pipeline_mode<synchronous>, transform_indices = @transform_1, window_bounds = array<i64: 9, 128, 128>}, {pipeline_mode = #tpu.pipeline_mode<synchronous>, transform_indices = @transform_2, window_bounds = array<i64: 1, 128>}, {pipeline_mode = #tpu.pipeline_mode<synchronous>, transform_indices = @transform_3, window_bounds = array<i64: 128, 128>}, {pipeline_mode = #tpu.pipeline_mode<synchronous>, transform_indices = @transform_4, window_bounds = array<i64: 1, 128>}, {pipeline_mode = #tpu.pipeline_mode<synchronous>, transform_indices = @transform_5, window_bounds = array<i64: 128, 128>}, {pipeline_mode = #tpu.pipeline_mode<synchronous>, transform_indices = @transform_6, window_bounds = array<i64: 1, 128>}, {transform_indices = @transform_7, window_bounds = array<i64: 8, 128>}]} {
    %c0 = arith.constant 0 : index
    %c0_0 = arith.constant 0 : index
    %c0_1 = arith.constant 0 : index
    %0 = vector.load %arg2[%c0, %c0_0, %c0_1] : memref<9x128x128xf32, #tpu.memory_space<vmem>>, vector<1x128x128xf32>
    %1 = vector.shape_cast %0 : vector<1x128x128xf32> to vector<128x128xf32>
    %c1 = arith.constant 1 : index
    %c0_2 = arith.constant 0 : index
    %c0_3 = arith.constant 0 : index
    %2 = vector.load %arg2[%c1, %c0_2, %c0_3] : memref<9x128x128xf32, #tpu.memory_space<vmem>>, vector<1x128x128xf32>
    %3 = vector.shape_cast %2 : vector<1x128x128xf32> to vector<128x128xf32>
    %c2 = arith.constant 2 : index
    %c0_4 = arith.constant 0 : index
    %c0_5 = arith.constant 0 : index
    %4 = vector.load %arg2[%c2, %c0_4, %c0_5] : memref<9x128x128xf32, #tpu.memory_space<vmem>>, vector<1x128x128xf32>
    %5 = vector.shape_cast %4 : vector<1x128x128xf32> to vector<128x128xf32>
    %c3 = arith.constant 3 : index
    %c0_6 = arith.constant 0 : index
    %c0_7 = arith.constant 0 : index
    %6 = vector.load %arg2[%c3, %c0_6, %c0_7] : memref<9x128x128xf32, #tpu.memory_space<vmem>>, vector<1x128x128xf32>
    %7 = vector.shape_cast %6 : vector<1x128x128xf32> to vector<128x128xf32>
    %c4 = arith.constant 4 : index
    %c0_8 = arith.constant 0 : index
    %c0_9 = arith.constant 0 : index
    %8 = vector.load %arg2[%c4, %c0_8, %c0_9] : memref<9x128x128xf32, #tpu.memory_space<vmem>>, vector<1x128x128xf32>
    %9 = vector.shape_cast %8 : vector<1x128x128xf32> to vector<128x128xf32>
    %c5 = arith.constant 5 : index
    %c0_10 = arith.constant 0 : index
    %c0_11 = arith.constant 0 : index
    %10 = vector.load %arg2[%c5, %c0_10, %c0_11] : memref<9x128x128xf32, #tpu.memory_space<vmem>>, vector<1x128x128xf32>
    %11 = vector.shape_cast %10 : vector<1x128x128xf32> to vector<128x128xf32>
    %c6 = arith.constant 6 : index
    %c0_12 = arith.constant 0 : index
    %c0_13 = arith.constant 0 : index
    %12 = vector.load %arg2[%c6, %c0_12, %c0_13] : memref<9x128x128xf32, #tpu.memory_space<vmem>>, vector<1x128x128xf32>
    %13 = vector.shape_cast %12 : vector<1x128x128xf32> to vector<128x128xf32>
    %c7 = arith.constant 7 : index
    %c0_14 = arith.constant 0 : index
    %c0_15 = arith.constant 0 : index
    %14 = vector.load %arg2[%c7, %c0_14, %c0_15] : memref<9x128x128xf32, #tpu.memory_space<vmem>>, vector<1x128x128xf32>
    %15 = vector.shape_cast %14 : vector<1x128x128xf32> to vector<128x128xf32>
    %c8 = arith.constant 8 : index
    %c0_16 = arith.constant 0 : index
    %c0_17 = arith.constant 0 : index
    %16 = vector.load %arg2[%c8, %c0_16, %c0_17] : memref<9x128x128xf32, #tpu.memory_space<vmem>>, vector<1x128x128xf32>
    %17 = vector.shape_cast %16 : vector<1x128x128xf32> to vector<128x128xf32>
    %c0_18 = arith.constant 0 : index
    %c0_19 = arith.constant 0 : index
    %18 = vector.load %arg3[%c0_18, %c0_19] : memref<1x128xf32, #tpu.memory_space<vmem>>, vector<1x128xf32>
    %19 = vector.shape_cast %18 : vector<1x128xf32> to vector<1x128xf32>
    %20 = vector.broadcast %19 : vector<1x128xf32> to vector<8x128xf32>
    %cst = arith.constant 0.000000e+00 : f32
    %21 = vector.broadcast %cst : f32 to vector<8x128xf32>
    %c0_20 = arith.constant 0 : index
    %c0_21 = arith.constant 0 : index
    %22 = vector.load %arg1[%c0_20, %c0_21] : memref<128x128xf32, #tpu.memory_space<vmem>>, vector<8x128xf32>
    %cst_22 = arith.constant dense<0.000000e+00> : vector<8x128xf32>
    %23 = tpu.matmul %22, %9, %cst_22 {dimension_numbers = #tpu.dot_dimension_numbers<[1], [0], [0], [1], [0, 0, 1, 1], [], []>} : vector<8x128xf32>, vector<128x128xf32>, vector<8x128xf32> -> vector<8x128xf32>
    %24 = arith.addf %20, %23 : vector<8x128xf32>
    %c8_23 = arith.constant 8 : index
    %c0_24 = arith.constant 0 : index
    %25 = vector.load %arg1[%c8_23, %c0_24] : memref<128x128xf32, #tpu.memory_space<vmem>>, vector<8x128xf32>
    %cst_25 = arith.constant dense<0.000000e+00> : vector<8x128xf32>
    %26 = tpu.matmul %25, %11, %cst_25 {dimension_numbers = #tpu.dot_dimension_numbers<[1], [0], [0], [1], [0, 0, 1, 1], [], []>} : vector<8x128xf32>, vector<128x128xf32>, vector<8x128xf32> -> vector<8x128xf32>
    %27 = arith.addf %24, %26 : vector<8x128xf32>
    %c32 = arith.constant 32 : index
    %c0_26 = arith.constant 0 : index
    %28 = vector.load %arg1[%c32, %c0_26] : memref<128x128xf32, #tpu.memory_space<vmem>>, vector<8x128xf32>
    %cst_27 = arith.constant dense<0.000000e+00> : vector<8x128xf32>
    %29 = tpu.matmul %28, %15, %cst_27 {dimension_numbers = #tpu.dot_dimension_numbers<[1], [0], [0], [1], [0, 0, 1, 1], [], []>} : vector<8x128xf32>, vector<128x128xf32>, vector<8x128xf32> -> vector<8x128xf32>
    %30 = arith.addf %27, %29 : vector<8x128xf32>
    %c40 = arith.constant 40 : index
    %c0_28 = arith.constant 0 : index
    %31 = vector.load %arg1[%c40, %c0_28] : memref<128x128xf32, #tpu.memory_space<vmem>>, vector<8x128xf32>
    %cst_29 = arith.constant dense<0.000000e+00> : vector<8x128xf32>
    %32 = tpu.matmul %31, %17, %cst_29 {dimension_numbers = #tpu.dot_dimension_numbers<[1], [0], [0], [1], [0, 0, 1, 1], [], []>} : vector<8x128xf32>, vector<128x128xf32>, vector<8x128xf32> -> vector<8x128xf32>
    %33 = arith.addf %30, %32 : vector<8x128xf32>
    %cst_30 = arith.constant 0.000000e+00 : f32
    %34 = vector.broadcast %cst_30 : f32 to vector<8x128xf32>
    %35 = arith.maximumf %33, %34 : vector<8x128xf32>
    %36 = arith.addf %21, %35 : vector<8x128xf32>
    %c0_31 = arith.constant 0 : index
    %c0_32 = arith.constant 0 : index
    %37 = vector.load %arg1[%c0_31, %c0_32] : memref<128x128xf32, #tpu.memory_space<vmem>>, vector<8x128xf32>
    %cst_33 = arith.constant dense<0.000000e+00> : vector<8x128xf32>
    %38 = tpu.matmul %37, %7, %cst_33 {dimension_numbers = #tpu.dot_dimension_numbers<[1], [0], [0], [1], [0, 0, 1, 1], [], []>} : vector<8x128xf32>, vector<128x128xf32>, vector<8x128xf32> -> vector<8x128xf32>
    %39 = arith.addf %20, %38 : vector<8x128xf32>
    %c8_34 = arith.constant 8 : index
    %c0_35 = arith.constant 0 : index
    %40 = vector.load %arg1[%c8_34, %c0_35] : memref<128x128xf32, #tpu.memory_space<vmem>>, vector<8x128xf32>
    %cst_36 = arith.constant dense<0.000000e+00> : vector<8x128xf32>
    %41 = tpu.matmul %40, %9, %cst_36 {dimension_numbers = #tpu.dot_dimension_numbers<[1], [0], [0], [1], [0, 0, 1, 1], [], []>} : vector<8x128xf32>, vector<128x128xf32>, vector<8x128xf32> -> vector<8x128xf32>
    %42 = arith.addf %39, %41 : vector<8x128xf32>
    %c16 = arith.constant 16 : index
    %c0_37 = arith.constant 0 : index
    %43 = vector.load %arg1[%c16, %c0_37] : memref<128x128xf32, #tpu.memory_space<vmem>>, vector<8x128xf32>
    %cst_38 = arith.constant dense<0.000000e+00> : vector<8x128xf32>
    %44 = tpu.matmul %43, %11, %cst_38 {dimension_numbers = #tpu.dot_dimension_numbers<[1], [0], [0], [1], [0, 0, 1, 1], [], []>} : vector<8x128xf32>, vector<128x128xf32>, vector<8x128xf32> -> vector<8x128xf32>
    %45 = arith.addf %42, %44 : vector<8x128xf32>
    %c32_39 = arith.constant 32 : index
    %c0_40 = arith.constant 0 : index
    %46 = vector.load %arg1[%c32_39, %c0_40] : memref<128x128xf32, #tpu.memory_space<vmem>>, vector<8x128xf32>
    %cst_41 = arith.constant dense<0.000000e+00> : vector<8x128xf32>
    %47 = tpu.matmul %46, %13, %cst_41 {dimension_numbers = #tpu.dot_dimension_numbers<[1], [0], [0], [1], [0, 0, 1, 1], [], []>} : vector<8x128xf32>, vector<128x128xf32>, vector<8x128xf32> -> vector<8x128xf32>
    %48 = arith.addf %45, %47 : vector<8x128xf32>
    %c40_42 = arith.constant 40 : index
    %c0_43 = arith.constant 0 : index
    %49 = vector.load %arg1[%c40_42, %c0_43] : memref<128x128xf32, #tpu.memory_space<vmem>>, vector<8x128xf32>
    %cst_44 = arith.constant dense<0.000000e+00> : vector<8x128xf32>
    %50 = tpu.matmul %49, %15, %cst_44 {dimension_numbers = #tpu.dot_dimension_numbers<[1], [0], [0], [1], [0, 0, 1, 1], [], []>} : vector<8x128xf32>, vector<128x128xf32>, vector<8x128xf32> -> vector<8x128xf32>
    %51 = arith.addf %48, %50 : vector<8x128xf32>
    %c48 = arith.constant 48 : index
    %c0_45 = arith.constant 0 : index
    %52 = vector.load %arg1[%c48, %c0_45] : memref<128x128xf32, #tpu.memory_space<vmem>>, vector<8x128xf32>
    %cst_46 = arith.constant dense<0.000000e+00> : vector<8x128xf32>
    %53 = tpu.matmul %52, %17, %cst_46 {dimension_numbers = #tpu.dot_dimension_numbers<[1], [0], [0], [1], [0, 0, 1, 1], [], []>} : vector<8x128xf32>, vector<128x128xf32>, vector<8x128xf32> -> vector<8x128xf32>
    %54 = arith.addf %51, %53 : vector<8x128xf32>
    %cst_47 = arith.constant 0.000000e+00 : f32
    %55 = vector.broadcast %cst_47 : f32 to vector<8x128xf32>
    %56 = arith.maximumf %54, %55 : vector<8x128xf32>
    %57 = arith.addf %36, %56 : vector<8x128xf32>
    %c8_48 = arith.constant 8 : index
    %c0_49 = arith.constant 0 : index
    %58 = vector.load %arg1[%c8_48, %c0_49] : memref<128x128xf32, #tpu.memory_space<vmem>>, vector<8x128xf32>
    %cst_50 = arith.constant dense<0.000000e+00> : vector<8x128xf32>
    %59 = tpu.matmul %58, %7, %cst_50 {dimension_numbers = #tpu.dot_dimension_numbers<[1], [0], [0], [1], [0, 0, 1, 1], [], []>} : vector<8x128xf32>, vector<128x128xf32>, vector<8x128xf32> -> vector<8x128xf32>
    %60 = arith.addf %20, %59 : vector<8x128xf32>
    %c16_51 = arith.constant 16 : index
    %c0_52 = arith.constant 0 : index
    %61 = vector.load %arg1[%c16_51, %c0_52] : memref<128x128xf32, #tpu.memory_space<vmem>>, vector<8x128xf32>
    %cst_53 = arith.constant dense<0.000000e+00> : vector<8x128xf32>
    %62 = tpu.matmul %61, %9, %cst_53 {dimension_numbers = #tpu.dot_dimension_numbers<[1], [0], [0], [1], [0, 0, 1, 1], [], []>} : vector<8x128xf32>, vector<128x128xf32>, vector<8x128xf32> -> vector<8x128xf32>
    %63 = arith.addf %60, %62 : vector<8x128xf32>
    %c24 = arith.constant 24 : index
    %c0_54 = arith.constant 0 : index
    %64 = vector.load %arg1[%c24, %c0_54] : memref<128x128xf32, #tpu.memory_space<vmem>>, vector<8x128xf32>
    %cst_55 = arith.constant dense<0.000000e+00> : vector<8x128xf32>
    %65 = tpu.matmul %64, %11, %cst_55 {dimension_numbers = #tpu.dot_dimension_numbers<[1], [0], [0], [1], [0, 0, 1, 1], [], []>} : vector<8x128xf32>, vector<128x128xf32>, vector<8x128xf32> -> vector<8x128xf32>
    %66 = arith.addf %63, %65 : vector<8x128xf32>
    %c40_56 = arith.constant 40 : index
    %c0_57 = arith.constant 0 : index
    %67 = vector.load %arg1[%c40_56, %c0_57] : memref<128x128xf32, #tpu.memory_space<vmem>>, vector<8x128xf32>
    %cst_58 = arith.constant dense<0.000000e+00> : vector<8x128xf32>
    %68 = tpu.matmul %67, %13, %cst_58 {dimension_numbers = #tpu.dot_dimension_numbers<[1], [0], [0], [1], [0, 0, 1, 1], [], []>} : vector<8x128xf32>, vector<128x128xf32>, vector<8x128xf32> -> vector<8x128xf32>
    %69 = arith.addf %66, %68 : vector<8x128xf32>
    %c48_59 = arith.constant 48 : index
    %c0_60 = arith.constant 0 : index
    %70 = vector.load %arg1[%c48_59, %c0_60] : memref<128x128xf32, #tpu.memory_space<vmem>>, vector<8x128xf32>
    %cst_61 = arith.constant dense<0.000000e+00> : vector<8x128xf32>
    %71 = tpu.matmul %70, %15, %cst_61 {dimension_numbers = #tpu.dot_dimension_numbers<[1], [0], [0], [1], [0, 0, 1, 1], [], []>} : vector<8x128xf32>, vector<128x128xf32>, vector<8x128xf32> -> vector<8x128xf32>
    %72 = arith.addf %69, %71 : vector<8x128xf32>
    %c56 = arith.constant 56 : index
    %c0_62 = arith.constant 0 : index
    %73 = vector.load %arg1[%c56, %c0_62] : memref<128x128xf32, #tpu.memory_space<vmem>>, vector<8x128xf32>
    %cst_63 = arith.constant dense<0.000000e+00> : vector<8x128xf32>
    %74 = tpu.matmul %73, %17, %cst_63 {dimension_numbers = #tpu.dot_dimension_numbers<[1], [0], [0], [1], [0, 0, 1, 1], [], []>} : vector<8x128xf32>, vector<128x128xf32>, vector<8x128xf32> -> vector<8x128xf32>
    %75 = arith.addf %72, %74 : vector<8x128xf32>
    %cst_64 = arith.constant 0.000000e+00 : f32
    %76 = vector.broadcast %cst_64 : f32 to vector<8x128xf32>
    %77 = arith.maximumf %75, %76 : vector<8x128xf32>
    %78 = arith.addf %57, %77 : vector<8x128xf32>
    %c16_65 = arith.constant 16 : index
    %c0_66 = arith.constant 0 : index
    %79 = vector.load %arg1[%c16_65, %c0_66] : memref<128x128xf32, #tpu.memory_space<vmem>>, vector<8x128xf32>
    %cst_67 = arith.constant dense<0.000000e+00> : vector<8x128xf32>
    %80 = tpu.matmul %79, %7, %cst_67 {dimension_numbers = #tpu.dot_dimension_numbers<[1], [0], [0], [1], [0, 0, 1, 1], [], []>} : vector<8x128xf32>, vector<128x128xf32>, vector<8x128xf32> -> vector<8x128xf32>
    %81 = arith.addf %20, %80 : vector<8x128xf32>
    %c24_68 = arith.constant 24 : index
    %c0_69 = arith.constant 0 : index
    %82 = vector.load %arg1[%c24_68, %c0_69] : memref<128x128xf32, #tpu.memory_space<vmem>>, vector<8x128xf32>
    %cst_70 = arith.constant dense<0.000000e+00> : vector<8x128xf32>
    %83 = tpu.matmul %82, %9, %cst_70 {dimension_numbers = #tpu.dot_dimension_numbers<[1], [0], [0], [1], [0, 0, 1, 1], [], []>} : vector<8x128xf32>, vector<128x128xf32>, vector<8x128xf32> -> vector<8x128xf32>
    %84 = arith.addf %81, %83 : vector<8x128xf32>
    %c48_71 = arith.constant 48 : index
    %c0_72 = arith.constant 0 : index
    %85 = vector.load %arg1[%c48_71, %c0_72] : memref<128x128xf32, #tpu.memory_space<vmem>>, vector<8x128xf32>
    %cst_73 = arith.constant dense<0.000000e+00> : vector<8x128xf32>
    %86 = tpu.matmul %85, %13, %cst_73 {dimension_numbers = #tpu.dot_dimension_numbers<[1], [0], [0], [1], [0, 0, 1, 1], [], []>} : vector<8x128xf32>, vector<128x128xf32>, vector<8x128xf32> -> vector<8x128xf32>
    %87 = arith.addf %84, %86 : vector<8x128xf32>
    %c56_74 = arith.constant 56 : index
    %c0_75 = arith.constant 0 : index
    %88 = vector.load %arg1[%c56_74, %c0_75] : memref<128x128xf32, #tpu.memory_space<vmem>>, vector<8x128xf32>
    %cst_76 = arith.constant dense<0.000000e+00> : vector<8x128xf32>
    %89 = tpu.matmul %88, %15, %cst_76 {dimension_numbers = #tpu.dot_dimension_numbers<[1], [0], [0], [1], [0, 0, 1, 1], [], []>} : vector<8x128xf32>, vector<128x128xf32>, vector<8x128xf32> -> vector<8x128xf32>
    %90 = arith.addf %87, %89 : vector<8x128xf32>
    %cst_77 = arith.constant 0.000000e+00 : f32
    %91 = vector.broadcast %cst_77 : f32 to vector<8x128xf32>
    %92 = arith.maximumf %90, %91 : vector<8x128xf32>
    %93 = arith.addf %78, %92 : vector<8x128xf32>
    %c0_78 = arith.constant 0 : index
    %c0_79 = arith.constant 0 : index
    %94 = vector.load %arg1[%c0_78, %c0_79] : memref<128x128xf32, #tpu.memory_space<vmem>>, vector<8x128xf32>
    %cst_80 = arith.constant dense<0.000000e+00> : vector<8x128xf32>
    %95 = tpu.matmul %94, %3, %cst_80 {dimension_numbers = #tpu.dot_dimension_numbers<[1], [0], [0], [1], [0, 0, 1, 1], [], []>} : vector<8x128xf32>, vector<128x128xf32>, vector<8x128xf32> -> vector<8x128xf32>
    %96 = arith.addf %20, %95 : vector<8x128xf32>
    %c8_81 = arith.constant 8 : index
    %c0_82 = arith.constant 0 : index
    %97 = vector.load %arg1[%c8_81, %c0_82] : memref<128x128xf32, #tpu.memory_space<vmem>>, vector<8x128xf32>
    %cst_83 = arith.constant dense<0.000000e+00> : vector<8x128xf32>
    %98 = tpu.matmul %97, %5, %cst_83 {dimension_numbers = #tpu.dot_dimension_numbers<[1], [0], [0], [1], [0, 0, 1, 1], [], []>} : vector<8x128xf32>, vector<128x128xf32>, vector<8x128xf32> -> vector<8x128xf32>
    %99 = arith.addf %96, %98 : vector<8x128xf32>
    %c32_84 = arith.constant 32 : index
    %c0_85 = arith.constant 0 : index
    %100 = vector.load %arg1[%c32_84, %c0_85] : memref<128x128xf32, #tpu.memory_space<vmem>>, vector<8x128xf32>
    %cst_86 = arith.constant dense<0.000000e+00> : vector<8x128xf32>
    %101 = tpu.matmul %100, %9, %cst_86 {dimension_numbers = #tpu.dot_dimension_numbers<[1], [0], [0], [1], [0, 0, 1, 1], [], []>} : vector<8x128xf32>, vector<128x128xf32>, vector<8x128xf32> -> vector<8x128xf32>
    %102 = arith.addf %99, %101 : vector<8x128xf32>
    %c40_87 = arith.constant 40 : index
    %c0_88 = arith.constant 0 : index
    %103 = vector.load %arg1[%c40_87, %c0_88] : memref<128x128xf32, #tpu.memory_space<vmem>>, vector<8x128xf32>
    %cst_89 = arith.constant dense<0.000000e+00> : vector<8x128xf32>
    %104 = tpu.matmul %103, %11, %cst_89 {dimension_numbers = #tpu.dot_dimension_numbers<[1], [0], [0], [1], [0, 0, 1, 1], [], []>} : vector<8x128xf32>, vector<128x128xf32>, vector<8x128xf32> -> vector<8x128xf32>
    %105 = arith.addf %102, %104 : vector<8x128xf32>
    %c64 = arith.constant 64 : index
    %c0_90 = arith.constant 0 : index
    %106 = vector.load %arg1[%c64, %c0_90] : memref<128x128xf32, #tpu.memory_space<vmem>>, vector<8x128xf32>
    %cst_91 = arith.constant dense<0.000000e+00> : vector<8x128xf32>
    %107 = tpu.matmul %106, %15, %cst_91 {dimension_numbers = #tpu.dot_dimension_numbers<[1], [0], [0], [1], [0, 0, 1, 1], [], []>} : vector<8x128xf32>, vector<128x128xf32>, vector<8x128xf32> -> vector<8x128xf32>
    %108 = arith.addf %105, %107 : vector<8x128xf32>
    %c72 = arith.constant 72 : index
    %c0_92 = arith.constant 0 : index
    %109 = vector.load %arg1[%c72, %c0_92] : memref<128x128xf32, #tpu.memory_space<vmem>>, vector<8x128xf32>
    %cst_93 = arith.constant dense<0.000000e+00> : vector<8x128xf32>
    %110 = tpu.matmul %109, %17, %cst_93 {dimension_numbers = #tpu.dot_dimension_numbers<[1], [0], [0], [1], [0, 0, 1, 1], [], []>} : vector<8x128xf32>, vector<128x128xf32>, vector<8x128xf32> -> vector<8x128xf32>
    %111 = arith.addf %108, %110 : vector<8x128xf32>
    %cst_94 = arith.constant 0.000000e+00 : f32
    %112 = vector.broadcast %cst_94 : f32 to vector<8x128xf32>
    %113 = arith.maximumf %111, %112 : vector<8x128xf32>
    %114 = arith.addf %93, %113 : vector<8x128xf32>
    %c0_95 = arith.constant 0 : index
    %c0_96 = arith.constant 0 : index
    %115 = vector.load %arg1[%c0_95, %c0_96] : memref<128x128xf32, #tpu.memory_space<vmem>>, vector<8x128xf32>
    %cst_97 = arith.constant dense<0.000000e+00> : vector<8x128xf32>
    %116 = tpu.matmul %115, %1, %cst_97 {dimension_numbers = #tpu.dot_dimension_numbers<[1], [0], [0], [1], [0, 0, 1, 1], [], []>} : vector<8x128xf32>, vector<128x128xf32>, vector<8x128xf32> -> vector<8x128xf32>
    %117 = arith.addf %20, %116 : vector<8x128xf32>
    %c8_98 = arith.constant 8 : index
    %c0_99 = arith.constant 0 : index
    %118 = vector.load %arg1[%c8_98, %c0_99] : memref<128x128xf32, #tpu.memory_space<vmem>>, vector<8x128xf32>
    %cst_100 = arith.constant dense<0.000000e+00> : vector<8x128xf32>
    %119 = tpu.matmul %118, %3, %cst_100 {dimension_numbers = #tpu.dot_dimension_numbers<[1], [0], [0], [1], [0, 0, 1, 1], [], []>} : vector<8x128xf32>, vector<128x128xf32>, vector<8x128xf32> -> vector<8x128xf32>
    %120 = arith.addf %117, %119 : vector<8x128xf32>
    %c16_101 = arith.constant 16 : index
    %c0_102 = arith.constant 0 : index
    %121 = vector.load %arg1[%c16_101, %c0_102] : memref<128x128xf32, #tpu.memory_space<vmem>>, vector<8x128xf32>
    %cst_103 = arith.constant dense<0.000000e+00> : vector<8x128xf32>
    %122 = tpu.matmul %121, %5, %cst_103 {dimension_numbers = #tpu.dot_dimension_numbers<[1], [0], [0], [1], [0, 0, 1, 1], [], []>} : vector<8x128xf32>, vector<128x128xf32>, vector<8x128xf32> -> vector<8x128xf32>
    %123 = arith.addf %120, %122 : vector<8x128xf32>
    %c32_104 = arith.constant 32 : index
    %c0_105 = arith.constant 0 : index
    %124 = vector.load %arg1[%c32_104, %c0_105] : memref<128x128xf32, #tpu.memory_space<vmem>>, vector<8x128xf32>
    %cst_106 = arith.constant dense<0.000000e+00> : vector<8x128xf32>
    %125 = tpu.matmul %124, %7, %cst_106 {dimension_numbers = #tpu.dot_dimension_numbers<[1], [0], [0], [1], [0, 0, 1, 1], [], []>} : vector<8x128xf32>, vector<128x128xf32>, vector<8x128xf32> -> vector<8x128xf32>
    %126 = arith.addf %123, %125 : vector<8x128xf32>
    %c40_107 = arith.constant 40 : index
    %c0_108 = arith.constant 0 : index
    %127 = vector.load %arg1[%c40_107, %c0_108] : memref<128x128xf32, #tpu.memory_space<vmem>>, vector<8x128xf32>
    %cst_109 = arith.constant dense<0.000000e+00> : vector<8x128xf32>
    %128 = tpu.matmul %127, %9, %cst_109 {dimension_numbers = #tpu.dot_dimension_numbers<[1], [0], [0], [1], [0, 0, 1, 1], [], []>} : vector<8x128xf32>, vector<128x128xf32>, vector<8x128xf32> -> vector<8x128xf32>
    %129 = arith.addf %126, %128 : vector<8x128xf32>
    %c48_110 = arith.constant 48 : index
    %c0_111 = arith.constant 0 : index
    %130 = vector.load %arg1[%c48_110, %c0_111] : memref<128x128xf32, #tpu.memory_space<vmem>>, vector<8x128xf32>
    %cst_112 = arith.constant dense<0.000000e+00> : vector<8x128xf32>
    %131 = tpu.matmul %130, %11, %cst_112 {dimension_numbers = #tpu.dot_dimension_numbers<[1], [0], [0], [1], [0, 0, 1, 1], [], []>} : vector<8x128xf32>, vector<128x128xf32>, vector<8x128xf32> -> vector<8x128xf32>
    %132 = arith.addf %129, %131 : vector<8x128xf32>
    %c64_113 = arith.constant 64 : index
    %c0_114 = arith.constant 0 : index
    %133 = vector.load %arg1[%c64_113, %c0_114] : memref<128x128xf32, #tpu.memory_space<vmem>>, vector<8x128xf32>
    %cst_115 = arith.constant dense<0.000000e+00> : vector<8x128xf32>
    %134 = tpu.matmul %133, %13, %cst_115 {dimension_numbers = #tpu.dot_dimension_numbers<[1], [0], [0], [1], [0, 0, 1, 1], [], []>} : vector<8x128xf32>, vector<128x128xf32>, vector<8x128xf32> -> vector<8x128xf32>
    %135 = arith.addf %132, %134 : vector<8x128xf32>
    %c72_116 = arith.constant 72 : index
    %c0_117 = arith.constant 0 : index
    %136 = vector.load %arg1[%c72_116, %c0_117] : memref<128x128xf32, #tpu.memory_space<vmem>>, vector<8x128xf32>
    %cst_118 = arith.constant dense<0.000000e+00> : vector<8x128xf32>
    %137 = tpu.matmul %136, %15, %cst_118 {dimension_numbers = #tpu.dot_dimension_numbers<[1], [0], [0], [1], [0, 0, 1, 1], [], []>} : vector<8x128xf32>, vector<128x128xf32>, vector<8x128xf32> -> vector<8x128xf32>
    %138 = arith.addf %135, %137 : vector<8x128xf32>
    %c80 = arith.constant 80 : index
    %c0_119 = arith.constant 0 : index
    %139 = vector.load %arg1[%c80, %c0_119] : memref<128x128xf32, #tpu.memory_space<vmem>>, vector<8x128xf32>
    %cst_120 = arith.constant dense<0.000000e+00> : vector<8x128xf32>
    %140 = tpu.matmul %139, %17, %cst_120 {dimension_numbers = #tpu.dot_dimension_numbers<[1], [0], [0], [1], [0, 0, 1, 1], [], []>} : vector<8x128xf32>, vector<128x128xf32>, vector<8x128xf32> -> vector<8x128xf32>
    %141 = arith.addf %138, %140 : vector<8x128xf32>
    %cst_121 = arith.constant 0.000000e+00 : f32
    %142 = vector.broadcast %cst_121 : f32 to vector<8x128xf32>
    %143 = arith.maximumf %141, %142 : vector<8x128xf32>
    %144 = arith.addf %114, %143 : vector<8x128xf32>
    %c8_122 = arith.constant 8 : index
    %c0_123 = arith.constant 0 : index
    %145 = vector.load %arg1[%c8_122, %c0_123] : memref<128x128xf32, #tpu.memory_space<vmem>>, vector<8x128xf32>
    %cst_124 = arith.constant dense<0.000000e+00> : vector<8x128xf32>
    %146 = tpu.matmul %145, %1, %cst_124 {dimension_numbers = #tpu.dot_dimension_numbers<[1], [0], [0], [1], [0, 0, 1, 1], [], []>} : vector<8x128xf32>, vector<128x128xf32>, vector<8x128xf32> -> vector<8x128xf32>
    %147 = arith.addf %20, %146 : vector<8x128xf32>
    %c16_125 = arith.constant 16 : index
    %c0_126 = arith.constant 0 : index
    %148 = vector.load %arg1[%c16_125, %c0_126] : memref<128x128xf32, #tpu.memory_space<vmem>>, vector<8x128xf32>
    %cst_127 = arith.constant dense<0.000000e+00> : vector<8x128xf32>
    %149 = tpu.matmul %148, %3, %cst_127 {dimension_numbers = #tpu.dot_dimension_numbers<[1], [0], [0], [1], [0, 0, 1, 1], [], []>} : vector<8x128xf32>, vector<128x128xf32>, vector<8x128xf32> -> vector<8x128xf32>
    %150 = arith.addf %147, %149 : vector<8x128xf32>
    %c24_128 = arith.constant 24 : index
    %c0_129 = arith.constant 0 : index
    %151 = vector.load %arg1[%c24_128, %c0_129] : memref<128x128xf32, #tpu.memory_space<vmem>>, vector<8x128xf32>
    %cst_130 = arith.constant dense<0.000000e+00> : vector<8x128xf32>
    %152 = tpu.matmul %151, %5, %cst_130 {dimension_numbers = #tpu.dot_dimension_numbers<[1], [0], [0], [1], [0, 0, 1, 1], [], []>} : vector<8x128xf32>, vector<128x128xf32>, vector<8x128xf32> -> vector<8x128xf32>
    %153 = arith.addf %150, %152 : vector<8x128xf32>
    %c40_131 = arith.constant 40 : index
    %c0_132 = arith.constant 0 : index
    %154 = vector.load %arg1[%c40_131, %c0_132] : memref<128x128xf32, #tpu.memory_space<vmem>>, vector<8x128xf32>
    %cst_133 = arith.constant dense<0.000000e+00> : vector<8x128xf32>
    %155 = tpu.matmul %154, %7, %cst_133 {dimension_numbers = #tpu.dot_dimension_numbers<[1], [0], [0], [1], [0, 0, 1, 1], [], []>} : vector<8x128xf32>, vector<128x128xf32>, vector<8x128xf32> -> vector<8x128xf32>
    %156 = arith.addf %153, %155 : vector<8x128xf32>
    %c48_134 = arith.constant 48 : index
    %c0_135 = arith.constant 0 : index
    %157 = vector.load %arg1[%c48_134, %c0_135] : memref<128x128xf32, #tpu.memory_space<vmem>>, vector<8x128xf32>
    %cst_136 = arith.constant dense<0.000000e+00> : vector<8x128xf32>
    %158 = tpu.matmul %157, %9, %cst_136 {dimension_numbers = #tpu.dot_dimension_numbers<[1], [0], [0], [1], [0, 0, 1, 1], [], []>} : vector<8x128xf32>, vector<128x128xf32>, vector<8x128xf32> -> vector<8x128xf32>
    %159 = arith.addf %156, %158 : vector<8x128xf32>
    %c56_137 = arith.constant 56 : index
    %c0_138 = arith.constant 0 : index
    %160 = vector.load %arg1[%c56_137, %c0_138] : memref<128x128xf32, #tpu.memory_space<vmem>>, vector<8x128xf32>
    %cst_139 = arith.constant dense<0.000000e+00> : vector<8x128xf32>
    %161 = tpu.matmul %160, %11, %cst_139 {dimension_numbers = #tpu.dot_dimension_numbers<[1], [0], [0], [1], [0, 0, 1, 1], [], []>} : vector<8x128xf32>, vector<128x128xf32>, vector<8x128xf32> -> vector<8x128xf32>
    %162 = arith.addf %159, %161 : vector<8x128xf32>
    %c72_140 = arith.constant 72 : index
    %c0_141 = arith.constant 0 : index
    %163 = vector.load %arg1[%c72_140, %c0_141] : memref<128x128xf32, #tpu.memory_space<vmem>>, vector<8x128xf32>
    %cst_142 = arith.constant dense<0.000000e+00> : vector<8x128xf32>
    %164 = tpu.matmul %163, %13, %cst_142 {dimension_numbers = #tpu.dot_dimension_numbers<[1], [0], [0], [1], [0, 0, 1, 1], [], []>} : vector<8x128xf32>, vector<128x128xf32>, vector<8x128xf32> -> vector<8x128xf32>
    %165 = arith.addf %162, %164 : vector<8x128xf32>
    %c80_143 = arith.constant 80 : index
    %c0_144 = arith.constant 0 : index
    %166 = vector.load %arg1[%c80_143, %c0_144] : memref<128x128xf32, #tpu.memory_space<vmem>>, vector<8x128xf32>
    %cst_145 = arith.constant dense<0.000000e+00> : vector<8x128xf32>
    %167 = tpu.matmul %166, %15, %cst_145 {dimension_numbers = #tpu.dot_dimension_numbers<[1], [0], [0], [1], [0, 0, 1, 1], [], []>} : vector<8x128xf32>, vector<128x128xf32>, vector<8x128xf32> -> vector<8x128xf32>
    %168 = arith.addf %165, %167 : vector<8x128xf32>
    %c88 = arith.constant 88 : index
    %c0_146 = arith.constant 0 : index
    %169 = vector.load %arg1[%c88, %c0_146] : memref<128x128xf32, #tpu.memory_space<vmem>>, vector<8x128xf32>
    %cst_147 = arith.constant dense<0.000000e+00> : vector<8x128xf32>
    %170 = tpu.matmul %169, %17, %cst_147 {dimension_numbers = #tpu.dot_dimension_numbers<[1], [0], [0], [1], [0, 0, 1, 1], [], []>} : vector<8x128xf32>, vector<128x128xf32>, vector<8x128xf32> -> vector<8x128xf32>
    %171 = arith.addf %168, %170 : vector<8x128xf32>
    %cst_148 = arith.constant 0.000000e+00 : f32
    %172 = vector.broadcast %cst_148 : f32 to vector<8x128xf32>
    %173 = arith.maximumf %171, %172 : vector<8x128xf32>
    %174 = arith.addf %144, %173 : vector<8x128xf32>
    %c16_149 = arith.constant 16 : index
    %c0_150 = arith.constant 0 : index
    %175 = vector.load %arg1[%c16_149, %c0_150] : memref<128x128xf32, #tpu.memory_space<vmem>>, vector<8x128xf32>
    %cst_151 = arith.constant dense<0.000000e+00> : vector<8x128xf32>
    %176 = tpu.matmul %175, %1, %cst_151 {dimension_numbers = #tpu.dot_dimension_numbers<[1], [0], [0], [1], [0, 0, 1, 1], [], []>} : vector<8x128xf32>, vector<128x128xf32>, vector<8x128xf32> -> vector<8x128xf32>
    %177 = arith.addf %20, %176 : vector<8x128xf32>
    %c24_152 = arith.constant 24 : index
    %c0_153 = arith.constant 0 : index
    %178 = vector.load %arg1[%c24_152, %c0_153] : memref<128x128xf32, #tpu.memory_space<vmem>>, vector<8x128xf32>
    %cst_154 = arith.constant dense<0.000000e+00> : vector<8x128xf32>
    %179 = tpu.matmul %178, %3, %cst_154 {dimension_numbers = #tpu.dot_dimension_numbers<[1], [0], [0], [1], [0, 0, 1, 1], [], []>} : vector<8x128xf32>, vector<128x128xf32>, vector<8x128xf32> -> vector<8x128xf32>
    %180 = arith.addf %177, %179 : vector<8x128xf32>
    %c48_155 = arith.constant 48 : index
    %c0_156 = arith.constant 0 : index
    %181 = vector.load %arg1[%c48_155, %c0_156] : memref<128x128xf32, #tpu.memory_space<vmem>>, vector<8x128xf32>
    %cst_157 = arith.constant dense<0.000000e+00> : vector<8x128xf32>
    %182 = tpu.matmul %181, %7, %cst_157 {dimension_numbers = #tpu.dot_dimension_numbers<[1], [0], [0], [1], [0, 0, 1, 1], [], []>} : vector<8x128xf32>, vector<128x128xf32>, vector<8x128xf32> -> vector<8x128xf32>
    %183 = arith.addf %180, %182 : vector<8x128xf32>
    %c56_158 = arith.constant 56 : index
    %c0_159 = arith.constant 0 : index
    %184 = vector.load %arg1[%c56_158, %c0_159] : memref<128x128xf32, #tpu.memory_space<vmem>>, vector<8x128xf32>
    %cst_160 = arith.constant dense<0.000000e+00> : vector<8x128xf32>
    %185 = tpu.matmul %184, %9, %cst_160 {dimension_numbers = #tpu.dot_dimension_numbers<[1], [0], [0], [1], [0, 0, 1, 1], [], []>} : vector<8x128xf32>, vector<128x128xf32>, vector<8x128xf32> -> vector<8x128xf32>
    %186 = arith.addf %183, %185 : vector<8x128xf32>
    %c80_161 = arith.constant 80 : index
    %c0_162 = arith.constant 0 : index
    %187 = vector.load %arg1[%c80_161, %c0_162] : memref<128x128xf32, #tpu.memory_space<vmem>>, vector<8x128xf32>
    %cst_163 = arith.constant dense<0.000000e+00> : vector<8x128xf32>
    %188 = tpu.matmul %187, %13, %cst_163 {dimension_numbers = #tpu.dot_dimension_numbers<[1], [0], [0], [1], [0, 0, 1, 1], [], []>} : vector<8x128xf32>, vector<128x128xf32>, vector<8x128xf32> -> vector<8x128xf32>
    %189 = arith.addf %186, %188 : vector<8x128xf32>
    %c88_164 = arith.constant 88 : index
    %c0_165 = arith.constant 0 : index
    %190 = vector.load %arg1[%c88_164, %c0_165] : memref<128x128xf32, #tpu.memory_space<vmem>>, vector<8x128xf32>
    %cst_166 = arith.constant dense<0.000000e+00> : vector<8x128xf32>
    %191 = tpu.matmul %190, %15, %cst_166 {dimension_numbers = #tpu.dot_dimension_numbers<[1], [0], [0], [1], [0, 0, 1, 1], [], []>} : vector<8x128xf32>, vector<128x128xf32>, vector<8x128xf32> -> vector<8x128xf32>
    %192 = arith.addf %189, %191 : vector<8x128xf32>
    %cst_167 = arith.constant 0.000000e+00 : f32
    %193 = vector.broadcast %cst_167 : f32 to vector<8x128xf32>
    %194 = arith.maximumf %192, %193 : vector<8x128xf32>
    %195 = arith.addf %174, %194 : vector<8x128xf32>
    %c32_168 = arith.constant 32 : index
    %c0_169 = arith.constant 0 : index
    %196 = vector.load %arg1[%c32_168, %c0_169] : memref<128x128xf32, #tpu.memory_space<vmem>>, vector<8x128xf32>
    %cst_170 = arith.constant dense<0.000000e+00> : vector<8x128xf32>
    %197 = tpu.matmul %196, %3, %cst_170 {dimension_numbers = #tpu.dot_dimension_numbers<[1], [0], [0], [1], [0, 0, 1, 1], [], []>} : vector<8x128xf32>, vector<128x128xf32>, vector<8x128xf32> -> vector<8x128xf32>
    %198 = arith.addf %20, %197 : vector<8x128xf32>
    %c40_171 = arith.constant 40 : index
    %c0_172 = arith.constant 0 : index
    %199 = vector.load %arg1[%c40_171, %c0_172] : memref<128x128xf32, #tpu.memory_space<vmem>>, vector<8x128xf32>
    %cst_173 = arith.constant dense<0.000000e+00> : vector<8x128xf32>
    %200 = tpu.matmul %199, %5, %cst_173 {dimension_numbers = #tpu.dot_dimension_numbers<[1], [0], [0], [1], [0, 0, 1, 1], [], []>} : vector<8x128xf32>, vector<128x128xf32>, vector<8x128xf32> -> vector<8x128xf32>
    %201 = arith.addf %198, %200 : vector<8x128xf32>
    %c64_174 = arith.constant 64 : index
    %c0_175 = arith.constant 0 : index
    %202 = vector.load %arg1[%c64_174, %c0_175] : memref<128x128xf32, #tpu.memory_space<vmem>>, vector<8x128xf32>
    %cst_176 = arith.constant dense<0.000000e+00> : vector<8x128xf32>
    %203 = tpu.matmul %202, %9, %cst_176 {dimension_numbers = #tpu.dot_dimension_numbers<[1], [0], [0], [1], [0, 0, 1, 1], [], []>} : vector<8x128xf32>, vector<128x128xf32>, vector<8x128xf32> -> vector<8x128xf32>
    %204 = arith.addf %201, %203 : vector<8x128xf32>
    %c72_177 = arith.constant 72 : index
    %c0_178 = arith.constant 0 : index
    %205 = vector.load %arg1[%c72_177, %c0_178] : memref<128x128xf32, #tpu.memory_space<vmem>>, vector<8x128xf32>
    %cst_179 = arith.constant dense<0.000000e+00> : vector<8x128xf32>
    %206 = tpu.matmul %205, %11, %cst_179 {dimension_numbers = #tpu.dot_dimension_numbers<[1], [0], [0], [1], [0, 0, 1, 1], [], []>} : vector<8x128xf32>, vector<128x128xf32>, vector<8x128xf32> -> vector<8x128xf32>
    %207 = arith.addf %204, %206 : vector<8x128xf32>
    %c96 = arith.constant 96 : index
    %c0_180 = arith.constant 0 : index
    %208 = vector.load %arg1[%c96, %c0_180] : memref<128x128xf32, #tpu.memory_space<vmem>>, vector<8x128xf32>
    %cst_181 = arith.constant dense<0.000000e+00> : vector<8x128xf32>
    %209 = tpu.matmul %208, %15, %cst_181 {dimension_numbers = #tpu.dot_dimension_numbers<[1], [0], [0], [1], [0, 0, 1, 1], [], []>} : vector<8x128xf32>, vector<128x128xf32>, vector<8x128xf32> -> vector<8x128xf32>
    %210 = arith.addf %207, %209 : vector<8x128xf32>
    %c104 = arith.constant 104 : index
    %c0_182 = arith.constant 0 : index
    %211 = vector.load %arg1[%c104, %c0_182] : memref<128x128xf32, #tpu.memory_space<vmem>>, vector<8x128xf32>
    %cst_183 = arith.constant dense<0.000000e+00> : vector<8x128xf32>
    %212 = tpu.matmul %211, %17, %cst_183 {dimension_numbers = #tpu.dot_dimension_numbers<[1], [0], [0], [1], [0, 0, 1, 1], [], []>} : vector<8x128xf32>, vector<128x128xf32>, vector<8x128xf32> -> vector<8x128xf32>
    %213 = arith.addf %210, %212 : vector<8x128xf32>
    %cst_184 = arith.constant 0.000000e+00 : f32
    %214 = vector.broadcast %cst_184 : f32 to vector<8x128xf32>
    %215 = arith.maximumf %213, %214 : vector<8x128xf32>
    %216 = arith.addf %195, %215 : vector<8x128xf32>
    %c32_185 = arith.constant 32 : index
    %c0_186 = arith.constant 0 : index
    %217 = vector.load %arg1[%c32_185, %c0_186] : memref<128x128xf32, #tpu.memory_space<vmem>>, vector<8x128xf32>
    %cst_187 = arith.constant dense<0.000000e+00> : vector<8x128xf32>
    %218 = tpu.matmul %217, %1, %cst_187 {dimension_numbers = #tpu.dot_dimension_numbers<[1], [0], [0], [1], [0, 0, 1, 1], [], []>} : vector<8x128xf32>, vector<128x128xf32>, vector<8x128xf32> -> vector<8x128xf32>
    %219 = arith.addf %20, %218 : vector<8x128xf32>
    %c40_188 = arith.constant 40 : index
    %c0_189 = arith.constant 0 : index
    %220 = vector.load %arg1[%c40_188, %c0_189] : memref<128x128xf32, #tpu.memory_space<vmem>>, vector<8x128xf32>
    %cst_190 = arith.constant dense<0.000000e+00> : vector<8x128xf32>
    %221 = tpu.matmul %220, %3, %cst_190 {dimension_numbers = #tpu.dot_dimension_numbers<[1], [0], [0], [1], [0, 0, 1, 1], [], []>} : vector<8x128xf32>, vector<128x128xf32>, vector<8x128xf32> -> vector<8x128xf32>
    %222 = arith.addf %219, %221 : vector<8x128xf32>
    %c48_191 = arith.constant 48 : index
    %c0_192 = arith.constant 0 : index
    %223 = vector.load %arg1[%c48_191, %c0_192] : memref<128x128xf32, #tpu.memory_space<vmem>>, vector<8x128xf32>
    %cst_193 = arith.constant dense<0.000000e+00> : vector<8x128xf32>
    %224 = tpu.matmul %223, %5, %cst_193 {dimension_numbers = #tpu.dot_dimension_numbers<[1], [0], [0], [1], [0, 0, 1, 1], [], []>} : vector<8x128xf32>, vector<128x128xf32>, vector<8x128xf32> -> vector<8x128xf32>
    %225 = arith.addf %222, %224 : vector<8x128xf32>
    %c64_194 = arith.constant 64 : index
    %c0_195 = arith.constant 0 : index
    %226 = vector.load %arg1[%c64_194, %c0_195] : memref<128x128xf32, #tpu.memory_space<vmem>>, vector<8x128xf32>
    %cst_196 = arith.constant dense<0.000000e+00> : vector<8x128xf32>
    %227 = tpu.matmul %226, %7, %cst_196 {dimension_numbers = #tpu.dot_dimension_numbers<[1], [0], [0], [1], [0, 0, 1, 1], [], []>} : vector<8x128xf32>, vector<128x128xf32>, vector<8x128xf32> -> vector<8x128xf32>
    %228 = arith.addf %225, %227 : vector<8x128xf32>
    %c72_197 = arith.constant 72 : index
    %c0_198 = arith.constant 0 : index
    %229 = vector.load %arg1[%c72_197, %c0_198] : memref<128x128xf32, #tpu.memory_space<vmem>>, vector<8x128xf32>
    %cst_199 = arith.constant dense<0.000000e+00> : vector<8x128xf32>
    %230 = tpu.matmul %229, %9, %cst_199 {dimension_numbers = #tpu.dot_dimension_numbers<[1], [0], [0], [1], [0, 0, 1, 1], [], []>} : vector<8x128xf32>, vector<128x128xf32>, vector<8x128xf32> -> vector<8x128xf32>
    %231 = arith.addf %228, %230 : vector<8x128xf32>
    %c80_200 = arith.constant 80 : index
    %c0_201 = arith.constant 0 : index
    %232 = vector.load %arg1[%c80_200, %c0_201] : memref<128x128xf32, #tpu.memory_space<vmem>>, vector<8x128xf32>
    %cst_202 = arith.constant dense<0.000000e+00> : vector<8x128xf32>
    %233 = tpu.matmul %232, %11, %cst_202 {dimension_numbers = #tpu.dot_dimension_numbers<[1], [0], [0], [1], [0, 0, 1, 1], [], []>} : vector<8x128xf32>, vector<128x128xf32>, vector<8x128xf32> -> vector<8x128xf32>
    %234 = arith.addf %231, %233 : vector<8x128xf32>
    %c96_203 = arith.constant 96 : index
    %c0_204 = arith.constant 0 : index
    %235 = vector.load %arg1[%c96_203, %c0_204] : memref<128x128xf32, #tpu.memory_space<vmem>>, vector<8x128xf32>
    %cst_205 = arith.constant dense<0.000000e+00> : vector<8x128xf32>
    %236 = tpu.matmul %235, %13, %cst_205 {dimension_numbers = #tpu.dot_dimension_numbers<[1], [0], [0], [1], [0, 0, 1, 1], [], []>} : vector<8x128xf32>, vector<128x128xf32>, vector<8x128xf32> -> vector<8x128xf32>
    %237 = arith.addf %234, %236 : vector<8x128xf32>
    %c104_206 = arith.constant 104 : index
    %c0_207 = arith.constant 0 : index
    %238 = vector.load %arg1[%c104_206, %c0_207] : memref<128x128xf32, #tpu.memory_space<vmem>>, vector<8x128xf32>
    %cst_208 = arith.constant dense<0.000000e+00> : vector<8x128xf32>
    %239 = tpu.matmul %238, %15, %cst_208 {dimension_numbers = #tpu.dot_dimension_numbers<[1], [0], [0], [1], [0, 0, 1, 1], [], []>} : vector<8x128xf32>, vector<128x128xf32>, vector<8x128xf32> -> vector<8x128xf32>
    %240 = arith.addf %237, %239 : vector<8x128xf32>
    %c112 = arith.constant 112 : index
    %c0_209 = arith.constant 0 : index
    %241 = vector.load %arg1[%c112, %c0_209] : memref<128x128xf32, #tpu.memory_space<vmem>>, vector<8x128xf32>
    %cst_210 = arith.constant dense<0.000000e+00> : vector<8x128xf32>
    %242 = tpu.matmul %241, %17, %cst_210 {dimension_numbers = #tpu.dot_dimension_numbers<[1], [0], [0], [1], [0, 0, 1, 1], [], []>} : vector<8x128xf32>, vector<128x128xf32>, vector<8x128xf32> -> vector<8x128xf32>
    %243 = arith.addf %240, %242 : vector<8x128xf32>
    %cst_211 = arith.constant 0.000000e+00 : f32
    %244 = vector.broadcast %cst_211 : f32 to vector<8x128xf32>
    %245 = arith.maximumf %243, %244 : vector<8x128xf32>
    %246 = arith.addf %216, %245 : vector<8x128xf32>
    %c40_212 = arith.constant 40 : index
    %c0_213 = arith.constant 0 : index
    %247 = vector.load %arg1[%c40_212, %c0_213] : memref<128x128xf32, #tpu.memory_space<vmem>>, vector<8x128xf32>
    %cst_214 = arith.constant dense<0.000000e+00> : vector<8x128xf32>
    %248 = tpu.matmul %247, %1, %cst_214 {dimension_numbers = #tpu.dot_dimension_numbers<[1], [0], [0], [1], [0, 0, 1, 1], [], []>} : vector<8x128xf32>, vector<128x128xf32>, vector<8x128xf32> -> vector<8x128xf32>
    %249 = arith.addf %20, %248 : vector<8x128xf32>
    %c48_215 = arith.constant 48 : index
    %c0_216 = arith.constant 0 : index
    %250 = vector.load %arg1[%c48_215, %c0_216] : memref<128x128xf32, #tpu.memory_space<vmem>>, vector<8x128xf32>
    %cst_217 = arith.constant dense<0.000000e+00> : vector<8x128xf32>
    %251 = tpu.matmul %250, %3, %cst_217 {dimension_numbers = #tpu.dot_dimension_numbers<[1], [0], [0], [1], [0, 0, 1, 1], [], []>} : vector<8x128xf32>, vector<128x128xf32>, vector<8x128xf32> -> vector<8x128xf32>
    %252 = arith.addf %249, %251 : vector<8x128xf32>
    %c56_218 = arith.constant 56 : index
    %c0_219 = arith.constant 0 : index
    %253 = vector.load %arg1[%c56_218, %c0_219] : memref<128x128xf32, #tpu.memory_space<vmem>>, vector<8x128xf32>
    %cst_220 = arith.constant dense<0.000000e+00> : vector<8x128xf32>
    %254 = tpu.matmul %253, %5, %cst_220 {dimension_numbers = #tpu.dot_dimension_numbers<[1], [0], [0], [1], [0, 0, 1, 1], [], []>} : vector<8x128xf32>, vector<128x128xf32>, vector<8x128xf32> -> vector<8x128xf32>
    %255 = arith.addf %252, %254 : vector<8x128xf32>
    %c72_221 = arith.constant 72 : index
    %c0_222 = arith.constant 0 : index
    %256 = vector.load %arg1[%c72_221, %c0_222] : memref<128x128xf32, #tpu.memory_space<vmem>>, vector<8x128xf32>
    %cst_223 = arith.constant dense<0.000000e+00> : vector<8x128xf32>
    %257 = tpu.matmul %256, %7, %cst_223 {dimension_numbers = #tpu.dot_dimension_numbers<[1], [0], [0], [1], [0, 0, 1, 1], [], []>} : vector<8x128xf32>, vector<128x128xf32>, vector<8x128xf32> -> vector<8x128xf32>
    %258 = arith.addf %255, %257 : vector<8x128xf32>
    %c80_224 = arith.constant 80 : index
    %c0_225 = arith.constant 0 : index
    %259 = vector.load %arg1[%c80_224, %c0_225] : memref<128x128xf32, #tpu.memory_space<vmem>>, vector<8x128xf32>
    %cst_226 = arith.constant dense<0.000000e+00> : vector<8x128xf32>
    %260 = tpu.matmul %259, %9, %cst_226 {dimension_numbers = #tpu.dot_dimension_numbers<[1], [0], [0], [1], [0, 0, 1, 1], [], []>} : vector<8x128xf32>, vector<128x128xf32>, vector<8x128xf32> -> vector<8x128xf32>
    %261 = arith.addf %258, %260 : vector<8x128xf32>
    %c88_227 = arith.constant 88 : index
    %c0_228 = arith.constant 0 : index
    %262 = vector.load %arg1[%c88_227, %c0_228] : memref<128x128xf32, #tpu.memory_space<vmem>>, vector<8x128xf32>
    %cst_229 = arith.constant dense<0.000000e+00> : vector<8x128xf32>
    %263 = tpu.matmul %262, %11, %cst_229 {dimension_numbers = #tpu.dot_dimension_numbers<[1], [0], [0], [1], [0, 0, 1, 1], [], []>} : vector<8x128xf32>, vector<128x128xf32>, vector<8x128xf32> -> vector<8x128xf32>
    %264 = arith.addf %261, %263 : vector<8x128xf32>
    %c104_230 = arith.constant 104 : index
    %c0_231 = arith.constant 0 : index
    %265 = vector.load %arg1[%c104_230, %c0_231] : memref<128x128xf32, #tpu.memory_space<vmem>>, vector<8x128xf32>
    %cst_232 = arith.constant dense<0.000000e+00> : vector<8x128xf32>
    %266 = tpu.matmul %265, %13, %cst_232 {dimension_numbers = #tpu.dot_dimension_numbers<[1], [0], [0], [1], [0, 0, 1, 1], [], []>} : vector<8x128xf32>, vector<128x128xf32>, vector<8x128xf32> -> vector<8x128xf32>
    %267 = arith.addf %264, %266 : vector<8x128xf32>
    %c112_233 = arith.constant 112 : index
    %c0_234 = arith.constant 0 : index
    %268 = vector.load %arg1[%c112_233, %c0_234] : memref<128x128xf32, #tpu.memory_space<vmem>>, vector<8x128xf32>
    %cst_235 = arith.constant dense<0.000000e+00> : vector<8x128xf32>
    %269 = tpu.matmul %268, %15, %cst_235 {dimension_numbers = #tpu.dot_dimension_numbers<[1], [0], [0], [1], [0, 0, 1, 1], [], []>} : vector<8x128xf32>, vector<128x128xf32>, vector<8x128xf32> -> vector<8x128xf32>
    %270 = arith.addf %267, %269 : vector<8x128xf32>
    %c120 = arith.constant 120 : index
    %c0_236 = arith.constant 0 : index
    %271 = vector.load %arg1[%c120, %c0_236] : memref<128x128xf32, #tpu.memory_space<vmem>>, vector<8x128xf32>
    %cst_237 = arith.constant dense<0.000000e+00> : vector<8x128xf32>
    %272 = tpu.matmul %271, %17, %cst_237 {dimension_numbers = #tpu.dot_dimension_numbers<[1], [0], [0], [1], [0, 0, 1, 1], [], []>} : vector<8x128xf32>, vector<128x128xf32>, vector<8x128xf32> -> vector<8x128xf32>
    %273 = arith.addf %270, %272 : vector<8x128xf32>
    %cst_238 = arith.constant 0.000000e+00 : f32
    %274 = vector.broadcast %cst_238 : f32 to vector<8x128xf32>
    %275 = arith.maximumf %273, %274 : vector<8x128xf32>
    %276 = arith.addf %246, %275 : vector<8x128xf32>
    %c48_239 = arith.constant 48 : index
    %c0_240 = arith.constant 0 : index
    %277 = vector.load %arg1[%c48_239, %c0_240] : memref<128x128xf32, #tpu.memory_space<vmem>>, vector<8x128xf32>
    %cst_241 = arith.constant dense<0.000000e+00> : vector<8x128xf32>
    %278 = tpu.matmul %277, %1, %cst_241 {dimension_numbers = #tpu.dot_dimension_numbers<[1], [0], [0], [1], [0, 0, 1, 1], [], []>} : vector<8x128xf32>, vector<128x128xf32>, vector<8x128xf32> -> vector<8x128xf32>
    %279 = arith.addf %20, %278 : vector<8x128xf32>
    %c56_242 = arith.constant 56 : index
    %c0_243 = arith.constant 0 : index
    %280 = vector.load %arg1[%c56_242, %c0_243] : memref<128x128xf32, #tpu.memory_space<vmem>>, vector<8x128xf32>
    %cst_244 = arith.constant dense<0.000000e+00> : vector<8x128xf32>
    %281 = tpu.matmul %280, %3, %cst_244 {dimension_numbers = #tpu.dot_dimension_numbers<[1], [0], [0], [1], [0, 0, 1, 1], [], []>} : vector<8x128xf32>, vector<128x128xf32>, vector<8x128xf32> -> vector<8x128xf32>
    %282 = arith.addf %279, %281 : vector<8x128xf32>
    %c80_245 = arith.constant 80 : index
    %c0_246 = arith.constant 0 : index
    %283 = vector.load %arg1[%c80_245, %c0_246] : memref<128x128xf32, #tpu.memory_space<vmem>>, vector<8x128xf32>
    %cst_247 = arith.constant dense<0.000000e+00> : vector<8x128xf32>
    %284 = tpu.matmul %283, %7, %cst_247 {dimension_numbers = #tpu.dot_dimension_numbers<[1], [0], [0], [1], [0, 0, 1, 1], [], []>} : vector<8x128xf32>, vector<128x128xf32>, vector<8x128xf32> -> vector<8x128xf32>
    %285 = arith.addf %282, %284 : vector<8x128xf32>
    %c88_248 = arith.constant 88 : index
    %c0_249 = arith.constant 0 : index
    %286 = vector.load %arg1[%c88_248, %c0_249] : memref<128x128xf32, #tpu.memory_space<vmem>>, vector<8x128xf32>
    %cst_250 = arith.constant dense<0.000000e+00> : vector<8x128xf32>
    %287 = tpu.matmul %286, %9, %cst_250 {dimension_numbers = #tpu.dot_dimension_numbers<[1], [0], [0], [1], [0, 0, 1, 1], [], []>} : vector<8x128xf32>, vector<128x128xf32>, vector<8x128xf32> -> vector<8x128xf32>
    %288 = arith.addf %285, %287 : vector<8x128xf32>
    %c112_251 = arith.constant 112 : index
    %c0_252 = arith.constant 0 : index
    %289 = vector.load %arg1[%c112_251, %c0_252] : memref<128x128xf32, #tpu.memory_space<vmem>>, vector<8x128xf32>
    %cst_253 = arith.constant dense<0.000000e+00> : vector<8x128xf32>
    %290 = tpu.matmul %289, %13, %cst_253 {dimension_numbers = #tpu.dot_dimension_numbers<[1], [0], [0], [1], [0, 0, 1, 1], [], []>} : vector<8x128xf32>, vector<128x128xf32>, vector<8x128xf32> -> vector<8x128xf32>
    %291 = arith.addf %288, %290 : vector<8x128xf32>
    %c120_254 = arith.constant 120 : index
    %c0_255 = arith.constant 0 : index
    %292 = vector.load %arg1[%c120_254, %c0_255] : memref<128x128xf32, #tpu.memory_space<vmem>>, vector<8x128xf32>
    %cst_256 = arith.constant dense<0.000000e+00> : vector<8x128xf32>
    %293 = tpu.matmul %292, %15, %cst_256 {dimension_numbers = #tpu.dot_dimension_numbers<[1], [0], [0], [1], [0, 0, 1, 1], [], []>} : vector<8x128xf32>, vector<128x128xf32>, vector<8x128xf32> -> vector<8x128xf32>
    %294 = arith.addf %291, %293 : vector<8x128xf32>
    %cst_257 = arith.constant 0.000000e+00 : f32
    %295 = vector.broadcast %cst_257 : f32 to vector<8x128xf32>
    %296 = arith.maximumf %294, %295 : vector<8x128xf32>
    %297 = arith.addf %276, %296 : vector<8x128xf32>
    %c64_258 = arith.constant 64 : index
    %c0_259 = arith.constant 0 : index
    %298 = vector.load %arg1[%c64_258, %c0_259] : memref<128x128xf32, #tpu.memory_space<vmem>>, vector<8x128xf32>
    %cst_260 = arith.constant dense<0.000000e+00> : vector<8x128xf32>
    %299 = tpu.matmul %298, %3, %cst_260 {dimension_numbers = #tpu.dot_dimension_numbers<[1], [0], [0], [1], [0, 0, 1, 1], [], []>} : vector<8x128xf32>, vector<128x128xf32>, vector<8x128xf32> -> vector<8x128xf32>
    %300 = arith.addf %20, %299 : vector<8x128xf32>
    %c72_261 = arith.constant 72 : index
    %c0_262 = arith.constant 0 : index
    %301 = vector.load %arg1[%c72_261, %c0_262] : memref<128x128xf32, #tpu.memory_space<vmem>>, vector<8x128xf32>
    %cst_263 = arith.constant dense<0.000000e+00> : vector<8x128xf32>
    %302 = tpu.matmul %301, %5, %cst_263 {dimension_numbers = #tpu.dot_dimension_numbers<[1], [0], [0], [1], [0, 0, 1, 1], [], []>} : vector<8x128xf32>, vector<128x128xf32>, vector<8x128xf32> -> vector<8x128xf32>
    %303 = arith.addf %300, %302 : vector<8x128xf32>
    %c96_264 = arith.constant 96 : index
    %c0_265 = arith.constant 0 : index
    %304 = vector.load %arg1[%c96_264, %c0_265] : memref<128x128xf32, #tpu.memory_space<vmem>>, vector<8x128xf32>
    %cst_266 = arith.constant dense<0.000000e+00> : vector<8x128xf32>
    %305 = tpu.matmul %304, %9, %cst_266 {dimension_numbers = #tpu.dot_dimension_numbers<[1], [0], [0], [1], [0, 0, 1, 1], [], []>} : vector<8x128xf32>, vector<128x128xf32>, vector<8x128xf32> -> vector<8x128xf32>
    %306 = arith.addf %303, %305 : vector<8x128xf32>
    %c104_267 = arith.constant 104 : index
    %c0_268 = arith.constant 0 : index
    %307 = vector.load %arg1[%c104_267, %c0_268] : memref<128x128xf32, #tpu.memory_space<vmem>>, vector<8x128xf32>
    %cst_269 = arith.constant dense<0.000000e+00> : vector<8x128xf32>
    %308 = tpu.matmul %307, %11, %cst_269 {dimension_numbers = #tpu.dot_dimension_numbers<[1], [0], [0], [1], [0, 0, 1, 1], [], []>} : vector<8x128xf32>, vector<128x128xf32>, vector<8x128xf32> -> vector<8x128xf32>
    %309 = arith.addf %306, %308 : vector<8x128xf32>
    %cst_270 = arith.constant 0.000000e+00 : f32
    %310 = vector.broadcast %cst_270 : f32 to vector<8x128xf32>
    %311 = arith.maximumf %309, %310 : vector<8x128xf32>
    %312 = arith.addf %297, %311 : vector<8x128xf32>
    %c64_271 = arith.constant 64 : index
    %c0_272 = arith.constant 0 : index
    %313 = vector.load %arg1[%c64_271, %c0_272] : memref<128x128xf32, #tpu.memory_space<vmem>>, vector<8x128xf32>
    %cst_273 = arith.constant dense<0.000000e+00> : vector<8x128xf32>
    %314 = tpu.matmul %313, %1, %cst_273 {dimension_numbers = #tpu.dot_dimension_numbers<[1], [0], [0], [1], [0, 0, 1, 1], [], []>} : vector<8x128xf32>, vector<128x128xf32>, vector<8x128xf32> -> vector<8x128xf32>
    %315 = arith.addf %20, %314 : vector<8x128xf32>
    %c72_274 = arith.constant 72 : index
    %c0_275 = arith.constant 0 : index
    %316 = vector.load %arg1[%c72_274, %c0_275] : memref<128x128xf32, #tpu.memory_space<vmem>>, vector<8x128xf32>
    %cst_276 = arith.constant dense<0.000000e+00> : vector<8x128xf32>
    %317 = tpu.matmul %316, %3, %cst_276 {dimension_numbers = #tpu.dot_dimension_numbers<[1], [0], [0], [1], [0, 0, 1, 1], [], []>} : vector<8x128xf32>, vector<128x128xf32>, vector<8x128xf32> -> vector<8x128xf32>
    %318 = arith.addf %315, %317 : vector<8x128xf32>
    %c80_277 = arith.constant 80 : index
    %c0_278 = arith.constant 0 : index
    %319 = vector.load %arg1[%c80_277, %c0_278] : memref<128x128xf32, #tpu.memory_space<vmem>>, vector<8x128xf32>
    %cst_279 = arith.constant dense<0.000000e+00> : vector<8x128xf32>
    %320 = tpu.matmul %319, %5, %cst_279 {dimension_numbers = #tpu.dot_dimension_numbers<[1], [0], [0], [1], [0, 0, 1, 1], [], []>} : vector<8x128xf32>, vector<128x128xf32>, vector<8x128xf32> -> vector<8x128xf32>
    %321 = arith.addf %318, %320 : vector<8x128xf32>
    %c96_280 = arith.constant 96 : index
    %c0_281 = arith.constant 0 : index
    %322 = vector.load %arg1[%c96_280, %c0_281] : memref<128x128xf32, #tpu.memory_space<vmem>>, vector<8x128xf32>
    %cst_282 = arith.constant dense<0.000000e+00> : vector<8x128xf32>
    %323 = tpu.matmul %322, %7, %cst_282 {dimension_numbers = #tpu.dot_dimension_numbers<[1], [0], [0], [1], [0, 0, 1, 1], [], []>} : vector<8x128xf32>, vector<128x128xf32>, vector<8x128xf32> -> vector<8x128xf32>
    %324 = arith.addf %321, %323 : vector<8x128xf32>
    %c104_283 = arith.constant 104 : index
    %c0_284 = arith.constant 0 : index
    %325 = vector.load %arg1[%c104_283, %c0_284] : memref<128x128xf32, #tpu.memory_space<vmem>>, vector<8x128xf32>
    %cst_285 = arith.constant dense<0.000000e+00> : vector<8x128xf32>
    %326 = tpu.matmul %325, %9, %cst_285 {dimension_numbers = #tpu.dot_dimension_numbers<[1], [0], [0], [1], [0, 0, 1, 1], [], []>} : vector<8x128xf32>, vector<128x128xf32>, vector<8x128xf32> -> vector<8x128xf32>
    %327 = arith.addf %324, %326 : vector<8x128xf32>
    %c112_286 = arith.constant 112 : index
    %c0_287 = arith.constant 0 : index
    %328 = vector.load %arg1[%c112_286, %c0_287] : memref<128x128xf32, #tpu.memory_space<vmem>>, vector<8x128xf32>
    %cst_288 = arith.constant dense<0.000000e+00> : vector<8x128xf32>
    %329 = tpu.matmul %328, %11, %cst_288 {dimension_numbers = #tpu.dot_dimension_numbers<[1], [0], [0], [1], [0, 0, 1, 1], [], []>} : vector<8x128xf32>, vector<128x128xf32>, vector<8x128xf32> -> vector<8x128xf32>
    %330 = arith.addf %327, %329 : vector<8x128xf32>
    %cst_289 = arith.constant 0.000000e+00 : f32
    %331 = vector.broadcast %cst_289 : f32 to vector<8x128xf32>
    %332 = arith.maximumf %330, %331 : vector<8x128xf32>
    %333 = arith.addf %312, %332 : vector<8x128xf32>
    %c72_290 = arith.constant 72 : index
    %c0_291 = arith.constant 0 : index
    %334 = vector.load %arg1[%c72_290, %c0_291] : memref<128x128xf32, #tpu.memory_space<vmem>>, vector<8x128xf32>
    %cst_292 = arith.constant dense<0.000000e+00> : vector<8x128xf32>
    %335 = tpu.matmul %334, %1, %cst_292 {dimension_numbers = #tpu.dot_dimension_numbers<[1], [0], [0], [1], [0, 0, 1, 1], [], []>} : vector<8x128xf32>, vector<128x128xf32>, vector<8x128xf32> -> vector<8x128xf32>
    %336 = arith.addf %20, %335 : vector<8x128xf32>
    %c80_293 = arith.constant 80 : index
    %c0_294 = arith.constant 0 : index
    %337 = vector.load %arg1[%c80_293, %c0_294] : memref<128x128xf32, #tpu.memory_space<vmem>>, vector<8x128xf32>
    %cst_295 = arith.constant dense<0.000000e+00> : vector<8x128xf32>
    %338 = tpu.matmul %337, %3, %cst_295 {dimension_numbers = #tpu.dot_dimension_numbers<[1], [0], [0], [1], [0, 0, 1, 1], [], []>} : vector<8x128xf32>, vector<128x128xf32>, vector<8x128xf32> -> vector<8x128xf32>
    %339 = arith.addf %336, %338 : vector<8x128xf32>
    %c88_296 = arith.constant 88 : index
    %c0_297 = arith.constant 0 : index
    %340 = vector.load %arg1[%c88_296, %c0_297] : memref<128x128xf32, #tpu.memory_space<vmem>>, vector<8x128xf32>
    %cst_298 = arith.constant dense<0.000000e+00> : vector<8x128xf32>
    %341 = tpu.matmul %340, %5, %cst_298 {dimension_numbers = #tpu.dot_dimension_numbers<[1], [0], [0], [1], [0, 0, 1, 1], [], []>} : vector<8x128xf32>, vector<128x128xf32>, vector<8x128xf32> -> vector<8x128xf32>
    %342 = arith.addf %339, %341 : vector<8x128xf32>
    %c104_299 = arith.constant 104 : index
    %c0_300 = arith.constant 0 : index
    %343 = vector.load %arg1[%c104_299, %c0_300] : memref<128x128xf32, #tpu.memory_space<vmem>>, vector<8x128xf32>
    %cst_301 = arith.constant dense<0.000000e+00> : vector<8x128xf32>
    %344 = tpu.matmul %343, %7, %cst_301 {dimension_numbers = #tpu.dot_dimension_numbers<[1], [0], [0], [1], [0, 0, 1, 1], [], []>} : vector<8x128xf32>, vector<128x128xf32>, vector<8x128xf32> -> vector<8x128xf32>
    %345 = arith.addf %342, %344 : vector<8x128xf32>
    %c112_302 = arith.constant 112 : index
    %c0_303 = arith.constant 0 : index
    %346 = vector.load %arg1[%c112_302, %c0_303] : memref<128x128xf32, #tpu.memory_space<vmem>>, vector<8x128xf32>
    %cst_304 = arith.constant dense<0.000000e+00> : vector<8x128xf32>
    %347 = tpu.matmul %346, %9, %cst_304 {dimension_numbers = #tpu.dot_dimension_numbers<[1], [0], [0], [1], [0, 0, 1, 1], [], []>} : vector<8x128xf32>, vector<128x128xf32>, vector<8x128xf32> -> vector<8x128xf32>
    %348 = arith.addf %345, %347 : vector<8x128xf32>
    %c120_305 = arith.constant 120 : index
    %c0_306 = arith.constant 0 : index
    %349 = vector.load %arg1[%c120_305, %c0_306] : memref<128x128xf32, #tpu.memory_space<vmem>>, vector<8x128xf32>
    %cst_307 = arith.constant dense<0.000000e+00> : vector<8x128xf32>
    %350 = tpu.matmul %349, %11, %cst_307 {dimension_numbers = #tpu.dot_dimension_numbers<[1], [0], [0], [1], [0, 0, 1, 1], [], []>} : vector<8x128xf32>, vector<128x128xf32>, vector<8x128xf32> -> vector<8x128xf32>
    %351 = arith.addf %348, %350 : vector<8x128xf32>
    %cst_308 = arith.constant 0.000000e+00 : f32
    %352 = vector.broadcast %cst_308 : f32 to vector<8x128xf32>
    %353 = arith.maximumf %351, %352 : vector<8x128xf32>
    %354 = arith.addf %333, %353 : vector<8x128xf32>
    %c80_309 = arith.constant 80 : index
    %c0_310 = arith.constant 0 : index
    %355 = vector.load %arg1[%c80_309, %c0_310] : memref<128x128xf32, #tpu.memory_space<vmem>>, vector<8x128xf32>
    %cst_311 = arith.constant dense<0.000000e+00> : vector<8x128xf32>
    %356 = tpu.matmul %355, %1, %cst_311 {dimension_numbers = #tpu.dot_dimension_numbers<[1], [0], [0], [1], [0, 0, 1, 1], [], []>} : vector<8x128xf32>, vector<128x128xf32>, vector<8x128xf32> -> vector<8x128xf32>
    %357 = arith.addf %20, %356 : vector<8x128xf32>
    %c88_312 = arith.constant 88 : index
    %c0_313 = arith.constant 0 : index
    %358 = vector.load %arg1[%c88_312, %c0_313] : memref<128x128xf32, #tpu.memory_space<vmem>>, vector<8x128xf32>
    %cst_314 = arith.constant dense<0.000000e+00> : vector<8x128xf32>
    %359 = tpu.matmul %358, %3, %cst_314 {dimension_numbers = #tpu.dot_dimension_numbers<[1], [0], [0], [1], [0, 0, 1, 1], [], []>} : vector<8x128xf32>, vector<128x128xf32>, vector<8x128xf32> -> vector<8x128xf32>
    %360 = arith.addf %357, %359 : vector<8x128xf32>
    %c112_315 = arith.constant 112 : index
    %c0_316 = arith.constant 0 : index
    %361 = vector.load %arg1[%c112_315, %c0_316] : memref<128x128xf32, #tpu.memory_space<vmem>>, vector<8x128xf32>
    %cst_317 = arith.constant dense<0.000000e+00> : vector<8x128xf32>
    %362 = tpu.matmul %361, %7, %cst_317 {dimension_numbers = #tpu.dot_dimension_numbers<[1], [0], [0], [1], [0, 0, 1, 1], [], []>} : vector<8x128xf32>, vector<128x128xf32>, vector<8x128xf32> -> vector<8x128xf32>
    %363 = arith.addf %360, %362 : vector<8x128xf32>
    %c120_318 = arith.constant 120 : index
    %c0_319 = arith.constant 0 : index
    %364 = vector.load %arg1[%c120_318, %c0_319] : memref<128x128xf32, #tpu.memory_space<vmem>>, vector<8x128xf32>
    %cst_320 = arith.constant dense<0.000000e+00> : vector<8x128xf32>
    %365 = tpu.matmul %364, %9, %cst_320 {dimension_numbers = #tpu.dot_dimension_numbers<[1], [0], [0], [1], [0, 0, 1, 1], [], []>} : vector<8x128xf32>, vector<128x128xf32>, vector<8x128xf32> -> vector<8x128xf32>
    %366 = arith.addf %363, %365 : vector<8x128xf32>
    %cst_321 = arith.constant 0.000000e+00 : f32
    %367 = vector.broadcast %cst_321 : f32 to vector<8x128xf32>
    %368 = arith.maximumf %366, %367 : vector<8x128xf32>
    %369 = arith.addf %354, %368 : vector<8x128xf32>
    %cst_322 = arith.constant 6.250000e-02 : f32
    %370 = vector.broadcast %cst_322 : f32 to vector<8x128xf32>
    %371 = arith.mulf %369, %370 : vector<8x128xf32>
    %c0_323 = arith.constant 0 : index
    %c0_324 = arith.constant 0 : index
    %372 = vector.load %arg4[%c0_323, %c0_324] : memref<128x128xf32, #tpu.memory_space<vmem>>, vector<128x128xf32>
    %cst_325 = arith.constant dense<0.000000e+00> : vector<8x128xf32>
    %373 = tpu.matmul %371, %372, %cst_325 {dimension_numbers = #tpu.dot_dimension_numbers<[1], [0], [0], [1], [0, 0, 1, 1], [], []>} : vector<8x128xf32>, vector<128x128xf32>, vector<8x128xf32> -> vector<8x128xf32>
    %c0_326 = arith.constant 0 : index
    %c0_327 = arith.constant 0 : index
    %374 = vector.load %arg5[%c0_326, %c0_327] : memref<1x128xf32, #tpu.memory_space<vmem>>, vector<1x128xf32>
    %375 = vector.broadcast %374 : vector<1x128xf32> to vector<8x128xf32>
    %376 = arith.addf %373, %375 : vector<8x128xf32>
    %cst_328 = arith.constant 0.000000e+00 : f32
    %377 = vector.broadcast %cst_328 : f32 to vector<8x128xf32>
    %378 = arith.maximumf %376, %377 : vector<8x128xf32>
    %c0_329 = arith.constant 0 : index
    %c0_330 = arith.constant 0 : index
    %379 = vector.load %arg6[%c0_329, %c0_330] : memref<128x128xf32, #tpu.memory_space<vmem>>, vector<128x128xf32>
    %cst_331 = arith.constant dense<0.000000e+00> : vector<8x128xf32>
    %380 = tpu.matmul %378, %379, %cst_331 {dimension_numbers = #tpu.dot_dimension_numbers<[1], [0], [0], [1], [0, 0, 1, 1], [], []>} : vector<8x128xf32>, vector<128x128xf32>, vector<8x128xf32> -> vector<8x128xf32>
    %c0_332 = arith.constant 0 : index
    %c0_333 = arith.constant 0 : index
    %381 = vector.load %arg7[%c0_332, %c0_333] : memref<1x128xf32, #tpu.memory_space<vmem>>, vector<1x128xf32>
    %382 = vector.broadcast %381 : vector<1x128xf32> to vector<8x128xf32>
    %383 = arith.addf %380, %382 : vector<8x128xf32>
    %c0_334 = arith.constant 0 : index
    %c0_335 = arith.constant 0 : index
    %384 = vector.load %arg8[%c0_334, %c0_335] : memref<8x128xf32, #tpu.memory_space<vmem>>, vector<8x128xf32>
    tpu.vector_store %arg8[%c0_334, %c0_335], %383 {strides = array<i32>} : memref<8x128xf32, #tpu.memory_space<vmem>>, vector<8x128xf32>,
    return
  }
  func.func @transform_0(%arg0: i32) -> (i32, i32) {
    %c0_i32 = arith.constant 0 : i32
    %c0_i32_0 = arith.constant 0 : i32
    return %arg0, %c0_i32 : i32, i32
  }
  func.func @transform_1(%arg0: i32) -> (i32, i32, i32) {
    %c0_i32 = arith.constant 0 : i32
    %c0_i32_0 = arith.constant 0 : i32
    %c0_i32_1 = arith.constant 0 : i32
    %c0_i32_2 = arith.constant 0 : i32
    return %c0_i32, %c0_i32_0, %c0_i32_1 : i32, i32, i32
  }
  func.func @transform_2(%arg0: i32) -> (i32, i32) {
    %c0_i32 = arith.constant 0 : i32
    %c0_i32_0 = arith.constant 0 : i32
    %c0_i32_1 = arith.constant 0 : i32
    return %c0_i32, %c0_i32_0 : i32, i32
  }
  func.func @transform_3(%arg0: i32) -> (i32, i32) {
    %c0_i32 = arith.constant 0 : i32
    %c0_i32_0 = arith.constant 0 : i32
    %c0_i32_1 = arith.constant 0 : i32
    return %c0_i32, %c0_i32_0 : i32, i32
  }
  func.func @transform_4(%arg0: i32) -> (i32, i32) {
    %c0_i32 = arith.constant 0 : i32
    %c0_i32_0 = arith.constant 0 : i32
    %c0_i32_1 = arith.constant 0 : i32
    return %c0_i32, %c0_i32_0 : i32, i32
  }
  func.func @transform_5(%arg0: i32) -> (i32, i32) {
    %c0_i32 = arith.constant 0 : i32
    %c0_i32_0 = arith.constant 0 : i32
    %c0_i32_1 = arith.constant 0 : i32
    return %c0_i32, %c0_i32_0 : i32, i32
  }
  func.func @transform_6(%arg0: i32) -> (i32, i32) {
    %c0_i32 = arith.constant 0 : i32
    %c0_i32_0 = arith.constant 0 : i32
    %c0_i32_1 = arith.constant 0 : i32
    return %c0_i32, %c0_i32_0 : i32, i32
  }
  func.func @transform_7(%arg0: i32) -> (i32, i32) {
    %c0_i32 = arith.constant 0 : i32
    %c0_i32_0 = arith.constant 0 : i32
    return %arg0, %c0_i32 : i32, i32
  }
}

</mosaic_0001>

<bundles_post_ra>
// kernel: tpu_custom_call.1
= control target key start
LH: loop header
LB: loop body
LE: loop exit
PB: predicated region body
PF: predicated region fallthrough
CT: control target
= control target key end

     0   :  { %12 = vsyncpa [#allocation3], 0  ;;  %s18716_s0 = inlined_call_operand.hbm [shape: f32[896,128], index: 0, kind: input, shape index: {}]   ;;  %s18717_s1 = inlined_call_operand.hbm [shape: f32[9,128,128], index: 1, kind: input, shape index: {}]   ;;  %s18718_s2 = inlined_call_operand.vmem [shape: f32[1,128], index: 2, kind: input, shape index: {}]   ;;  %s18719_s3 = inlined_call_operand.hbm [shape: f32[128,128], index: 3, kind: input, shape index: {}]   ;;  %s18720_s4 = inlined_call_operand.vmem [shape: f32[1,128], index: 4, kind: input, shape index: {}]   ;;  %s18721_s5 = inlined_call_operand.hbm [shape: f32[128,128], index: 5, kind: input, shape index: {}]   ;;  %s18722_s6 = inlined_call_operand.vmem [shape: f32[1,128], index: 6, kind: input, shape index: {}]   ;;  %s18723_s7 = inlined_call_operand.hbm [shape: f32[56,128], index: 7, kind: output, shape index: {}]  }
   0x1   :  { %14 = vsyncpa [#allocation3 + $0x1], 0 }
   0x2   :  { %15 = vsyncpa [#allocation6], 0 }
   0x3   :  { %16 = vsyncpa [#allocation9], 0 }
   0x4   :  { %17 = vsyncpa [#allocation4], 0 }
   0x5   :  { %19 = vsyncpa [#allocation4 + $0x1], 0  ;;  %s16252_s24 = smov 0   ;;  %s16254_s25 = smov 0  }
   0x6   :  { %s16256_s26 = smov 0   ;;  %s16258_s27 = smov 0  }
   0x7 LB: > { %s16273_s28 = sadd.s32 4294967295, %s16200_s27   ;;  %s7951_s29 = sadd.s32 4294967294, %s16200_s27   ;;  %s16200_s27 = sphi %s16258_s27, %s19047_s27   ;;  %s16196_s26 = sphi %s16256_s26, %s19046_s26   ;;  %s16192_s25 = sphi %s16254_s25, %s19045_s25   ;;  %s16188_s24 = sphi %s16252_s24, %s19044_s24  }
   0x8   : > { %p45_p0 = scmp.ne.s32.totalorder %s16192_s25, %s16188_s24  ;;  %p18724_p1 = scmp.eq.s32.totalorder %s16273_s28, 0 }
   0x9   : > { %p201_p3 = scmp.eq.s32.totalorder %s7951_s29, 6  ;;  %p7952_p5 = scmp.ge.s32.totalorder %s16200_s27, 1 }
   0xa   : > { %p16282_p4 = por %p18724_p1, %p45_p0  ;;  %p208_p7 = scmp.lt.s32.totalorder %s16200_s27, 8 }
   0xb   : > { %p16287_p6 = por %p201_p3, %p45_p0  ;;  %s16202_s10 = smov [#allocation5]  }
   0xc   : > { %s18860_s30 = scalar_select %p16282_p4, 1, 0 }
   0xd   : > { %s18861_s8 = scalar_select %p16287_p6, 1, 0 }
   0xe   : > { %p16292_p8 = pnand %p7952_p5, %p208_p7  ;;  %s220_s11 = sshll.u32 %s16202_s10, 4  ;;  %s16296_s11 = int_to_ptr.vmem [resolvable:$true] %s220_s11 }
   0xf   : > { %18862 = sst [smem:[#allocation15_spill]] %s18861_s8  ;;  %s16203_s13 = smov [#allocation7]  }
  0x10   : > { %s18863_s9 = scalar_select %p16292_p8, 1, 0 }
  0x11   : > { %p15926_p9 = pneg %p16292_p8  ;;  %s236_s14 = sshll.u32 %s16203_s13, 4  ;;  %s16306_s14 = int_to_ptr.vmem [resolvable:$true] %s236_s14 }
  0x12   : > { %s16204_s15 = smov [#allocation8]   ;;  %s16012_s19 = scalar_lea.hbm %s18717_s1, 18432 }
  0x13   : > { %p16302_p10 = pnand %p15926_p9, %p18724_p1  ;;  %s16308_s16 = sshll.u32 %s16204_s15, 4  ;;  %s253_s16 = int_to_ptr.vmem [resolvable:$true] %s16308_s16 }
  0x14   : > { %p16013_p11 = scmp.ne.s32.totalorder %s18717_s1, %s16012_s19  ;;  %p16019_p3 = scmp.lt.u32.totalorder %s16012_s19, %s18717_s1 }
  0x15   : > { %p16318_p12 = pneg %p16302_p10 }
  0x17   : > { %p16015_p13 = pnand %p16318_p12, %p16013_p11 }
  0x19   : > { %p16016_p0 = pneg %p16015_p13 }
  0x1b   : > { %p16021_p5 = pnand %p16019_p3, %p16016_p0 }
  0x1d   : > { %16024 = shalt.err (!%p16021_p5)
}
  0x1e   : > { %s16025_s10 = scalar_lea.vmem %s16296_s11, 18432  ;;  %p16033_p2 = scmp.lt.s32.totalorder %s16296_s11, %s16296_s11 }
  0x1f   : > { %p16026_p7 = scmp.ne.s32.totalorder %s16296_s11, %s16025_s10  ;;  %p16034_p6 = scmp.lt.s32.totalorder %s16025_s10, %s16025_s10 }
  0x21   : > { %p16028_p9 = pnand %p16026_p7, %p16318_p12  ;;  %p16035_p11 = por %p16034_p6, %p16033_p2 }
  0x23   : > { %p16029_p1 = pneg %p16028_p9 }
  0x25   : > { %p16036_p13 = pnand %p16035_p11, %p16029_p1 }
  0x27   : > { %16039 = shalt.err (!%p16036_p13)
}
  0x28   : > { %s16205_s13 = smov 128   ;;  %s16206_s15 = smov 8  }
  0x29   : > { %15929 = dma.hbm_to_vmem [thread:$0]  (!%p16302_p10), %s18717_s1, 18432, %s16296_s11, [#allocation6], %s16205_s13, %s16205_s13, %s16206_s15  }
  0x2a   : > { %s16040_s21 = scalar_lea.hbm %s18719_s3, 2048 }
  0x2b   : > { %p16041_p1 = scmp.ne.s32.totalorder %s18719_s3, %s16040_s21  ;;  %p16047_p0 = scmp.lt.u32.totalorder %s16040_s21, %s18719_s3 }
  0x2d   : > { %p16043_p2 = pnand %p16041_p1, %p16318_p12 }
  0x2f   : > { %p16044_p6 = pneg %p16043_p2 }
  0x31   : > { %p16049_p3 = pnand %p16047_p0, %p16044_p6 }
  0x33   : > { %16052 = shalt.err (!%p16049_p3)
}
  0x34   : > { %s16053_s11 = scalar_lea.vmem %s16306_s14, 2048  ;;  %p16061_p11 = scmp.lt.s32.totalorder %s16306_s14, %s16306_s14 }
  0x35   : > { %p16054_p5 = scmp.ne.s32.totalorder %s16306_s14, %s16053_s11  ;;  %p16062_p13 = scmp.lt.s32.totalorder %s16053_s11, %s16053_s11 }
  0x37   : > { %p16056_p7 = pnand %p16054_p5, %p16318_p12  ;;  %p16063_p1 = por %p16062_p13, %p16061_p11 }
  0x39   : > { %p16057_p9 = pneg %p16056_p7 }
  0x3b   : > { %p16064_p2 = pnand %p16063_p1, %p16057_p9 }
  0x3d   : > { %16067 = shalt.err (!%p16064_p2)
}
  0x3e   : > { %15932 = dma.hbm_to_vmem [thread:$0]  (!%p16302_p10), %s18719_s3, 2048, %s16306_s14, [#allocation6], %s16205_s13, %s16205_s13, %s16206_s15  }
  0x3f   : > { %s16068_s20 = scalar_lea.hbm %s18721_s5, 2048 }
  0x40   : > { %p16069_p6 = scmp.ne.s32.totalorder %s18721_s5, %s16068_s20  ;;  %p16075_p5 = scmp.lt.u32.totalorder %s16068_s20, %s18721_s5 }
  0x42   : > { %p16071_p0 = pnand %p16069_p6, %p16318_p12 }
  0x44   : > { %p16072_p3 = pneg %p16071_p0 }
  0x46   : > { %p16077_p7 = pnand %p16075_p5, %p16072_p3 }
  0x48   : > { %16080 = shalt.err (!%p16077_p7)
}
  0x49   : > { %s16081_s11 = scalar_lea.vmem %s253_s16, 2048  ;;  %p16089_p1 = scmp.lt.s32.totalorder %s253_s16, %s253_s16 }
  0x4a   : > { %p16082_p9 = scmp.ne.s32.totalorder %s253_s16, %s16081_s11  ;;  %p16090_p2 = scmp.lt.s32.totalorder %s16081_s11, %s16081_s11 }
  0x4c   : > { %p16084_p11 = pnand %p16082_p9, %p16318_p12  ;;  %p16091_p4 = por %p16090_p2, %p16089_p1 }
  0x4e   : > { %p16085_p13 = pneg %p16084_p11 }
  0x50   : > { %p16092_p8 = pnand %p16091_p4, %p16085_p13 }
  0x52   : > { %16095 = shalt.err (!%p16092_p8)
}
  0x53   : > { %15935 = dma.hbm_to_vmem [thread:$0]  (!%p16302_p10), %s18721_s5, 2048, %s253_s16, [#allocation9], %s16205_s13, %s16205_s13, %s16206_s15  }
  0x54   : > { %s16391_s22 = sadd.s32 1, %s16200_s27   ;;  %s32_s17 = sadd.s32 1, %s16196_s26 }
  0x55   : > { %s29_s12 = ssub.s32 %s16200_s27, %s16391_s22  ;;  %p39_p8 = scmp.ne.s32.totalorder %s16196_s26, %s16192_s25 }
  0x56   : > { %p30_p4 = scmp.eq.s32.totalorder %s29_s12, 0  ;;  %p40_p12 = scmp.eq.s32.totalorder %s16200_s27, 0 }
  0x57   : > { %p15947_p6 = scmp.lt.s32.totalorder %s16200_s27, 7  ;;  %p18866_p3 = scmp.eq.s32.totalorder %s16273_s28, 6 }
  0x58   : > { %s16401_s18 = scalar_select %p30_p4, %s16196_s26, %s32_s17  }
  0x59   : > { %p41_p0 = por %p40_p12, %p39_p8  ;;  %p16405_p5 = por %p18866_p3, %p39_p8 }
  0x5a   : > { %s269_s20 = sand.u32 1, %s16196_s26   ;;  %s7973_s21 = sshll.u32 %s16200_s27, 11 }
  0x5b   : > { %s7957_s16 = sshll.u32 %s269_s20, 7  ;;  %s16414_s10 = scalar_lea.hbm %s18716_s0, %s7973_s21 }
  0x5c   : > { %s273_s11 = scalar_lea.vmem [#allocation2], %s7957_s16  ;;  %p16416_p10 = pnand %p15947_p6, %p41_p0 }
  0x5d   : > { %s280_s14 = sshll.u32 %s273_s11, 4  ;;  %s16422_s12 = scalar_lea.sflag [#allocation3], %s269_s20  ;;  %s16420_s14 = int_to_ptr.vmem [resolvable:$true] %s280_s14 }
  0x5e   : > { %s16096_s17 = scalar_lea.hbm %s16414_s10, 2048  ;;  %p16098_p9 = pneg %p16416_p10 }
  0x5f   : > { %p16097_p7 = scmp.ne.s32.totalorder %s16414_s10, %s16096_s17  ;;  %s16101_s23 = scalar_lea.hbm %s18716_s0, 14336 }
  0x60   : > { %p16102_p1 = scmp.lt.u32.totalorder %s16414_s10, %s18716_s0  ;;  %p16103_p2 = scmp.lt.u32.totalorder %s16101_s23, %s16096_s17 }
  0x61   : > { %p16099_p11 = pnand %p16098_p9, %p16097_p7  ;;  %p16105_p8 = scmp.lt.u32.totalorder %s16096_s17, %s16414_s10 }
  0x62   : > { %p16104_p4 = por %p16103_p2, %p16102_p1 }
  0x63   : > { %p16100_p13 = pneg %p16099_p11 }
  0x64   : > { %p16106_p12 = por %p16105_p8, %p16104_p4 }
  0x66   : > { %p16107_p6 = pnand %p16106_p12, %p16100_p13 }
  0x68   : > { %16110 = shalt.err (!%p16107_p6)
}
  0x69   : > { %s16111_s20 = scalar_lea.vmem %s16420_s14, 2048  ;;  %s16207_s21 = smov [#allocation2]  }
  0x6a   : > { %p16112_p0 = scmp.ne.s32.totalorder %s16420_s14, %s16111_s20  ;;  %s16116_s16 = sshll.u32 %s16207_s21, 4  ;;  %s16117_s16 = int_to_ptr.vmem [resolvable:$false] %s16116_s16 }
  0x6b   : > { %s16118_s29 = scalar_lea.vmem %s16117_s16, 4096  ;;  %p16119_p11 = scmp.lt.s32.totalorder %s16420_s14, %s16117_s16 }
  0x6c   : > { %p16114_p3 = pnand %p16112_p0, %p16098_p9  ;;  %p16120_p1 = scmp.lt.s32.totalorder %s16118_s29, %s16111_s20 }
  0x6e   : > { %p16115_p7 = pneg %p16114_p3  ;;  %p16121_p2 = por %p16120_p1, %p16119_p11 }
  0x70   : > { %p16122_p4 = pnand %p16121_p2, %p16115_p7 }
  0x72   : > { %16125 = shalt.err (!%p16122_p4)
}
  0x73   : > { %15939 = dma.hbm_to_vmem [thread:$0]  (!%p16416_p10), %s16414_s10, 2048, %s16420_s14, %s16422_s12, %s16205_s13, %s16205_s13, %s16206_s15  }
  0x74   : > { %p18869_p9 = scmp.ne.s32.totalorder %s18863_s9, 0 }
  0x76   : > { %292 = sbr.rel (%p18869_p9) target bundleno = 2405 (0x965), region = 48 }
  0x7d   : > { %s16456_s17 = sand.u32 1, %s16192_s25   ;;  %p18870_p13 = scmp.ne.s32.totalorder %s18860_s30, 0 }
  0x7e   : > { %s7961_s23 = sshll.u32 %s16456_s17, 7  ;;  %s295_s11 = scalar_lea.sflag [#allocation3], %s16456_s17 }
  0x7f   : > { %s16460_s20 = scalar_lea.vmem [#allocation2], %s7961_s23 }
  0x80   : > { %16171 = dma.done.wait (%p18870_p13), %s295_s11, 2048  }
  0x81   : > { %16173 = vsyncadd (%p18870_p13), %s295_s11, 4294965248  ;;  %p18871_p10 = scmp.eq.s32.totalorder %s16273_s28, 0 }
  0x83   : > { %16175 = dma.done.wait (%p18871_p10), [#allocation6], 20480   ;;  %p18872_p8 = pmov %p18871_p10 }
  0x85   : > { %16177 = vsyncadd (%p18872_p8), [#allocation6], 4294946816  ;;  %p18873_p12 = pmov %p18872_p8 }
  0x86   : > { %p18874_p6 = pmov %p18872_p8 }
  0x87   : > { %16179 = dma.done.wait (%p18873_p12), [#allocation9], 2048  }
  0x88   : > { %16181 = vsyncadd (%p18874_p6), [#allocation9], 4294965248  ;;  %v16208_v0 = vmov 0.0|0.0   ;;  %vm16209_vm0 = vmmov 0   ;;  %v18728_v1 = vmov 0.0   ;;  %v410_v2 = vld [vmem:[#allocation5 + $0x200] sm:$0xff] }
  0x89   : > { %13278 = vmatprep.subr.bf16.mxu0 %v16208_v0  ;;  %13374 = vmatprep.subr.bf16.mxu1 %v16208_v0  ;;  %v411_v3 = vld [vmem:[#allocation5 + $0x208] sm:$0xff]  ;;  %v393_v4 = vld [vmem:[#allocation5 + $0x180] sm:$0xff]  ;;  %v412_v7 = vld [vmem:[#allocation5 + $0x210] sm:$0xff]  ;;  %s7965_s21 = sshll.u32 %s16456_s17, 3  ;;  %s7970_s23 = sshll.u32 %s16273_s28, 7 }
  0x8a   : > { %9740 = vmatprep.mubr.msk.f32.mxu0 %vm16209_vm0, %v18728_v1  ;;  %9880 = vmatprep.mubr.msk.f32.mxu1 %vm16209_vm0, %v18728_v1  ;;  %v16480_v5 = vpack.c.bf16 %v411_v3, %v410_v2  ;;  %v394_v6 = vld [vmem:[#allocation5 + $0x188] sm:$0xff]  ;;  %v413_v8 = vld [vmem:[#allocation5 + $0x218] sm:$0xff]  ;;  %v395_v10 = vld [vmem:[#allocation5 + $0x190] sm:$0xff]  ;;  %s340_s11 = scalar_lea.vmem [#allocation10], %s7965_s21  ;;  %s18673_s13 = scalar_lea.hbm %s18723_s7, %s7970_s23 }
  0x8b   : > { %v16482_v9 = vpack.c.bf16 %v394_v6, %v393_v4  ;;  %v396_v11 = vld [vmem:[#allocation5 + $0x198] sm:$0xff]  ;;  %v16485_v12 = vpack.c.bf16 %v413_v8, %v412_v7  ;;  %v414_v14 = vld [vmem:[#allocation5 + $0x220] sm:$0xff]  ;;  %v415_v15 = vld [vmem:[#allocation5 + $0x228] sm:$0xff]  ;;  %s7839_s15 = scalar_lea.sflag [#allocation4], %s16456_s17  ;;  %s16211_s28 = smov [#allocation10]  }
  0x8c   : > { %13280 = vmatpush3.bf16.msra.mxu0 %v16480_v5  ;;  %v16489_v13 = vpack.c.bf16 %v396_v11, %v395_v10  ;;  %v397_v16 = vld [vmem:[#allocation5 + $0x1a0] sm:$0xff]  ;;  %v398_v17 = vld [vmem:[#allocation5 + $0x1a8] sm:$0xff]  ;;  %v16493_v18 = vpack.c.bf16 %v415_v15, %v414_v14  ;;  %v416_v20 = vld [vmem:[#allocation5 + $0x230] sm:$0xff]  ;;  %s16130_s14 = sshll.u32 %s16211_s28, 4  ;;  %s16131_s14 = int_to_ptr.vmem [resolvable:$false] %s16130_s14 }
  0x8d   : > { %18875 = vst [vmem:[#allocation16_spill] sm:$0xff] %v16482_v9  ;;  %13376 = vmatpush3.bf16.msra.mxu1 %v16482_v9  ;;  %13281 = vmatprep.subr.bf16.mxu0 %v16208_v0  ;;  %v16497_v19 = vpack.c.bf16 %v398_v17, %v397_v16  ;;  %v417_v21 = vld [vmem:[#allocation5 + $0x238] sm:$0xff]  ;;  %v399_v22 = vld [vmem:[#allocation5 + $0x1b0] sm:$0xff]  ;;  %v418_v26 = vld [vmem:[#allocation5 + $0x240] sm:$0xff]  ;;  %s16132_s8 = scalar_lea.vmem %s16131_s14, 256 }
  0x8e   : > { %18876 = vst [vmem:[#allocation17_spill] sm:$0xff] %v16489_v13  ;;  %13377 = vmatprep.subr.bf16.mxu1 %v16208_v0  ;;  %v400_v23 = vld [vmem:[#allocation5 + $0x1b8] sm:$0xff]  ;;  %v16501_v24 = vpack.c.bf16 %v417_v21, %v416_v20  ;;  %v419_v27 = vld [vmem:[#allocation5 + $0x248] sm:$0xff]  ;;  %v401_v28 = vld [vmem:[#allocation5 + $0x1c0] sm:$0xff] }
  0x8f   : > { %18877 = vst [vmem:[#allocation18_spill] sm:$0xff] %v16497_v19  ;;  %v16505_v25 = vpack.c.bf16 %v400_v23, %v399_v22  ;;  %v402_v29 = vld [vmem:[#allocation5 + $0x1c8] sm:$0xff]  ;;  %v16509_v30 = vpack.c.bf16 %v419_v27, %v418_v26  ;;  %v420_v32 = vld [vmem:[#allocation5 + $0x250] sm:$0xff]  ;;  %v421_v33 = vld [vmem:[#allocation5 + $0x258] sm:$0xff] }
  0x90   : > { %13283 = vmatpush3.bf16.msra.mxu0 %v16485_v12  ;;  %v16513_v31 = vpack.c.bf16 %v402_v29, %v401_v28  ;;  %v403_v34 = vld [vmem:[#allocation5 + $0x1d0] sm:$0xff]  ;;  %v404_v35 = vld [vmem:[#allocation5 + $0x1d8] sm:$0xff]  ;;  %v16517_v36 = vpack.c.bf16 %v421_v33, %v420_v32  ;;  %v422_v38 = vld [vmem:[#allocation5 + $0x260] sm:$0xff] }
  0x91   : > { %13379 = vmatpush3.bf16.msra.mxu1 %v16489_v13  ;;  %13284 = vmatprep.subr.bf16.mxu0 %v16208_v0  ;;  %18878 = vst [vmem:[#allocation19_spill] sm:$0xff] %v16505_v25  ;;  %v16521_v37 = vpack.c.bf16 %v404_v35, %v403_v34  ;;  %v423_v39 = vld [vmem:[#allocation5 + $0x268] sm:$0xff]  ;;  %v405_v40 = vld [vmem:[#allocation5 + $0x1e0] sm:$0xff]  ;;  %v424_v44 = vld [vmem:[#allocation5 + $0x270] sm:$0xff] }
  0x92   : > { %13380 = vmatprep.subr.bf16.mxu1 %v16208_v0  ;;  %18879 = vst [vmem:[#allocation20_spill] sm:$0xff] %v16513_v31  ;;  %v406_v41 = vld [vmem:[#allocation5 + $0x1e8] sm:$0xff]  ;;  %v16525_v42 = vpack.c.bf16 %v423_v39, %v422_v38  ;;  %v425_v45 = vld [vmem:[#allocation5 + $0x278] sm:$0xff]  ;;  %v407_v46 = vld [vmem:[#allocation5 + $0x1f0] sm:$0xff] }
  0x93   : > { %18880 = vst [vmem:[#allocation21_spill] sm:$0xff] %v16521_v37  ;;  %v16529_v43 = vpack.c.bf16 %v406_v41, %v405_v40  ;;  %v408_v47 = vld [vmem:[#allocation5 + $0x1f8] sm:$0xff]  ;;  %v16533_v48 = vpack.c.bf16 %v425_v45, %v424_v44  ;;  %v427_v50 = vld [vmem:[#allocation5 + $0x280] sm:$0xff]  ;;  %v428_v51 = vld [vmem:[#allocation5 + $0x288] sm:$0xff] }
  0x94   : > { %13286 = vmatpush3.bf16.msra.mxu0 %v16493_v18  ;;  %v16537_v49 = vpack.c.bf16 %v408_v47, %v407_v46  ;;  %v501_v52 = vld [vmem:[%s16460_s20] sm:$0xff]  ;;  %v16542_v53 = vpack.c.bf16 %v428_v51, %v427_v50  ;;  %v429_v54 = vld [vmem:[#allocation5 + $0x290] sm:$0xff]  ;;  %v430_v55 = vld [vmem:[#allocation5 + $0x298] sm:$0xff] }
  0x95   : > { %13382 = vmatpush3.bf16.msra.mxu1 %v16497_v19  ;;  %13287 = vmatprep.subr.bf16.mxu0 %v16208_v0  ;;  %18881 = vst [vmem:[#allocation22_spill] sm:$0xff] %v16529_v43  ;;  %v16548_v56 = vpack.c.bf16 %v430_v55, %v429_v54  ;;  %v431_v57 = vld [vmem:[#allocation5 + $0x2a0] sm:$0xff]  ;;  %v432_v58 = vld [vmem:[#allocation5 + $0x2a8] sm:$0xff]  ;;  %v433_v60 = vld [vmem:[#allocation5 + $0x2b0] sm:$0xff] }
  0x96   : > { %13383 = vmatprep.subr.bf16.mxu1 %v16208_v0  ;;  %18882 = vst [vmem:[#allocation23_spill] sm:$0xff] %v16537_v49  ;;  %18883 = vst [vmem:[#allocation24_spill] sm:$0xff] %v16542_v53  ;;  %v16558_v59 = vpack.c.bf16 %v432_v58, %v431_v57  ;;  %v434_v61 = vld [vmem:[#allocation5 + $0x2b8] sm:$0xff]  ;;  %v435_v63 = vld [vmem:[#allocation5 + $0x2c0] sm:$0xff] }
  0x97   : > { %18884 = vst [vmem:[#allocation25_spill] sm:$0xff] %v16548_v56  ;;  %v16564_v62 = vpack.c.bf16 %v434_v61, %v433_v60  ;;  %v436_v2 = vld [vmem:[#allocation5 + $0x2c8] sm:$0xff]  ;;  %v437_v4 = vld [vmem:[#allocation5 + $0x2d0] sm:$0xff]  ;;  %v438_v6 = vld [vmem:[#allocation5 + $0x2d8] sm:$0xff] }
  0x98   : > { %13289 = vmatpush3.bf16.msra.mxu0 %v16501_v24  ;;  %18885 = vst [vmem:[#allocation26_spill] sm:$0xff] %v16558_v59  ;;  %v16570_v3 = vpack.c.bf16 %v436_v2, %v435_v63  ;;  %v16576_v7 = vpack.c.bf16 %v438_v6, %v437_v4  ;;  %v439_v8 = vld [vmem:[#allocation5 + $0x2e0] sm:$0xff]  ;;  %v440_v10 = vld [vmem:[#allocation5 + $0x2e8] sm:$0xff]  ;;  %v441_v14 = vld [vmem:[#allocation5 + $0x2f0] sm:$0xff] }
  0x99   : > { %13385 = vmatpush3.bf16.msra.mxu1 %v16505_v25  ;;  %13290 = vmatprep.subr.bf16.mxu0 %v16208_v0  ;;  %18886 = vst [vmem:[#allocation27_spill] sm:$0xff] %v16564_v62  ;;  %v16582_v11 = vpack.c.bf16 %v440_v10, %v439_v8  ;;  %v442_v15 = vld [vmem:[#allocation5 + $0x2f8] sm:$0xff]  ;;  %v461_v17 = vld [vmem:[#allocation5 + $0x380] sm:$0xff]  ;;  %v462_v20 = vld [vmem:[#allocation5 + $0x388] sm:$0xff] }
  0x9a   : > { %13386 = vmatprep.subr.bf16.mxu1 %v16208_v0  ;;  %18887 = vst [vmem:[#allocation28_spill] sm:$0xff] %v16570_v3  ;;  %18888 = vst [vmem:[#allocation29_spill] sm:$0xff] %v16576_v7  ;;  %v16588_v16 = vpack.c.bf16 %v442_v15, %v441_v14  ;;  %v16595_v21 = vld [vmem:[%s16460_s20 + $0x8] sm:$0xff]  ;;  %v16597_v22 = vpack.c.bf16 %v462_v20, %v461_v17  ;;  %v463_v23 = vld [vmem:[#allocation5 + $0x390] sm:$0xff] }
  0x9b   : > { %18889 = vst [vmem:[#allocation30_spill] sm:$0xff] %v16582_v11  ;;  %v464_v26 = vld [vmem:[#allocation5 + $0x398] sm:$0xff]  ;;  %v465_v28 = vld [vmem:[#allocation5 + $0x3a0] sm:$0xff]  ;;  %v466_v29 = vld [vmem:[#allocation5 + $0x3a8] sm:$0xff] }
  0x9c   : > { %13292 = vmatpush3.bf16.msra.mxu0 %v16509_v30  ;;  %18890 = vst [vmem:[#allocation31_spill] sm:$0xff] %v16588_v16  ;;  %v16605_v27 = vpack.c.bf16 %v464_v26, %v463_v23  ;;  %v16615_v32 = vpack.c.bf16 %v466_v29, %v465_v28  ;;  %v467_v33 = vld [vmem:[#allocation5 + $0x3b0] sm:$0xff]  ;;  %v468_v34 = vld [vmem:[#allocation5 + $0x3b8] sm:$0xff]  ;;  %v469_v38 = vld [vmem:[#allocation5 + $0x3c0] sm:$0xff] }
  0x9d   : > { %13388 = vmatpush3.bf16.msra.mxu1 %v16513_v31  ;;  %13293 = vmatprep.subr.bf16.mxu0 %v16208_v0  ;;  %v16621_v35 = vpack.c.bf16 %v468_v34, %v467_v33  ;;  %v470_v39 = vld [vmem:[#allocation5 + $0x3c8] sm:$0xff]  ;;  %v471_v41 = vld [vmem:[#allocation5 + $0x3d0] sm:$0xff]  ;;  %v472_v44 = vld [vmem:[#allocation5 + $0x3d8] sm:$0xff] }
  0x9e   : > { %13389 = vmatprep.subr.bf16.mxu1 %v16208_v0  ;;  %v16627_v40 = vpack.c.bf16 %v470_v39, %v469_v38  ;;  %v16633_v45 = vpack.c.bf16 %v472_v44, %v471_v41  ;;  %v473_v46 = vld [vmem:[#allocation5 + $0x3e0] sm:$0xff]  ;;  %v474_v47 = vld [vmem:[#allocation5 + $0x3e8] sm:$0xff]  ;;  %v475_v51 = vld [vmem:[#allocation5 + $0x3f0] sm:$0xff] }
  0x9f   : > { %v16639_v50 = vpack.c.bf16 %v474_v47, %v473_v46  ;;  %v478_v55 = vld [vmem:[#allocation5 + $0x400] sm:$0xff]  ;;  %v479_v57 = vld [vmem:[#allocation5 + $0x408] sm:$0xff]  ;;  %v16659_v2 = vld [vmem:[%s16460_s20 + $0x10] sm:$0xff] }
  0xa0   : > { %13295 = vmatpush3.bf16.msra.mxu0 %v16517_v36  ;;  %v444_v58 = vld [vmem:[#allocation5 + $0x300] sm:$0xff]  ;;  %v445_v60 = vld [vmem:[#allocation5 + $0x308] sm:$0xff]  ;;  %v16654_v63 = vpack.c.bf16 %v479_v57, %v478_v55  ;;  %v480_v6 = vld [vmem:[#allocation5 + $0x410] sm:$0xff] }
  0xa1   : > { %13391 = vmatpush3.bf16.msra.mxu1 %v16521_v37  ;;  %13296 = vmatprep.subr.bf16.mxu0 %v16208_v0  ;;  %v16652_v61 = vld [vmem:[%s16460_s20 + $0x20] sm:$0xff]  ;;  %v16661_v4 = vpack.c.bf16 %v445_v60, %v444_v58  ;;  %v481_v8 = vld [vmem:[#allocation5 + $0x418] sm:$0xff]  ;;  %v446_v10 = vld [vmem:[#allocation5 + $0x310] sm:$0xff] }
  0xa2   : > { %13392 = vmatprep.subr.bf16.mxu1 %v16208_v0  ;;  %v447_v14 = vld [vmem:[#allocation5 + $0x318] sm:$0xff]  ;;  %v16667_v15 = vpack.c.bf16 %v481_v8, %v480_v6  ;;  %v482_v20 = vld [vmem:[#allocation5 + $0x420] sm:$0xff]  ;;  %v483_v23 = vld [vmem:[#allocation5 + $0x428] sm:$0xff] }
  0xa3   : > { %18891 = vst [vmem:[#allocation32_spill] sm:$0xff] %v16661_v4  ;;  %v16671_v17 = vpack.c.bf16 %v447_v14, %v446_v10  ;;  %v448_v26 = vld [vmem:[#allocation5 + $0x320] sm:$0xff]  ;;  %v449_v28 = vld [vmem:[#allocation5 + $0x328] sm:$0xff]  ;;  %v16679_v29 = vpack.c.bf16 %v483_v23, %v482_v20  ;;  %v484_v34 = vld [vmem:[#allocation5 + $0x430] sm:$0xff] }
  0xa4   : > { %13298 = vmatpush3.bf16.msra.mxu0 %v16525_v42  ;;  %v16683_v33 = vpack.c.bf16 %v449_v28, %v448_v26  ;;  %v485_v38 = vld [vmem:[#allocation5 + $0x438] sm:$0xff]  ;;  %v450_v39 = vld [vmem:[#allocation5 + $0x330] sm:$0xff]  ;;  %v486_v47 = vld [vmem:[#allocation5 + $0x440] sm:$0xff] }
  0xa5   : > { %13394 = vmatpush3.bf16.msra.mxu1 %v16529_v43  ;;  %13299 = vmatprep.subr.bf16.mxu0 %v16208_v0  ;;  %18892 = vst [vmem:[#allocation33_spill] sm:$0xff] %v16671_v17  ;;  %v451_v41 = vld [vmem:[#allocation5 + $0x338] sm:$0xff]  ;;  %v16687_v44 = vpack.c.bf16 %v485_v38, %v484_v34  ;;  %v453_v55 = vld [vmem:[#allocation5 + $0x348] sm:$0xff]  ;;  %v488_v60 = vld [vmem:[#allocation5 + $0x450] sm:$0xff] }
  0xa6   : > { %13395 = vmatprep.subr.bf16.mxu1 %v16208_v0  ;;  %18893 = vst [vmem:[#allocation34_spill] sm:$0xff] %v16683_v33  ;;  %v16691_v46 = vpack.c.bf16 %v451_v41, %v450_v39  ;;  %v489_v6 = vld [vmem:[#allocation5 + $0x458] sm:$0xff]  ;;  %v454_v8 = vld [vmem:[#allocation5 + $0x350] sm:$0xff]  ;;  %v490_v23 = vld [vmem:[#allocation5 + $0x460] sm:$0xff] }
  0xa7   : > { %v455_v10 = vld [vmem:[#allocation5 + $0x358] sm:$0xff]  ;;  %v16703_v14 = vpack.c.bf16 %v489_v6, %v488_v60  ;;  %v491_v26 = vld [vmem:[#allocation5 + $0x468] sm:$0xff]  ;;  %v456_v28 = vld [vmem:[#allocation5 + $0x360] sm:$0xff] }
  0xa8   : > { %13301 = vmatpush3.bf16.msra.mxu0 %v16533_v48  ;;  %18894 = vst [vmem:[#allocation35_spill] sm:$0xff] %v16691_v46  ;;  %v16707_v20 = vpack.c.bf16 %v455_v10, %v454_v8  ;;  %v457_v34 = vld [vmem:[#allocation5 + $0x368] sm:$0xff]  ;;  %v16711_v38 = vpack.c.bf16 %v491_v26, %v490_v23  ;;  %v492_v41 = vld [vmem:[#allocation5 + $0x470] sm:$0xff]  ;;  %v1363_v8 = vld [vmem:[%s16460_s20 + $0x18] sm:$0xff] }
  0xa9   : > { %13397 = vmatpush3.bf16.msra.mxu1 %v16537_v49  ;;  %13302 = vmatprep.subr.bf16.mxu0 %v16208_v0  ;;  %v16715_v39 = vpack.c.bf16 %v457_v34, %v456_v28  ;;  %v16728_v6 = vld [vmem:[%s16460_s20 + $0x28] sm:$0xff]  ;;  %v359_v10 = vld [vmem:[#allocation5 + $0x80] sm:$0xff]  ;;  %v1577_v34 = vld [vmem:[%s16460_s20 + $0x38] sm:$0xff] }
  0xaa   : > { %13398 = vmatprep.subr.bf16.mxu1 %v16208_v0  ;;  %18896 = vst [vmem:[#allocation37_spill] sm:$0xff] %v16707_v20  ;;  %v360_v23 = vld [vmem:[#allocation5 + $0x88] sm:$0xff]  ;;  %v342_v26 = vld [vmem:[#allocation5] sm:$0xff] }
  0xab   : > { %9741 = vmatmul.mubr.f32.vlgmr.msra.gmra.mrb[0].mxu0 %v501_v52  ;;  %18897 = vst [vmem:[#allocation38_spill] sm:$0xff] %v16715_v39  ;;  %v343_v28 = vld [vmem:[#allocation5 + $0x8] sm:$0xff] }
  0xac   : > { %13304 = vmatpush3.bf16.msra.mxu0 %v16542_v53  ;;  %9881 = vmatmul.mubr.f32.vlgmr.msra.gmra.mrb[0].mxu1 %v501_v52  ;;  %v476_v52 = vld [vmem:[#allocation5 + $0x3f8] sm:$0xff] }
  0xad   : > { %13400 = vmatpush3.bf16.msra.mxu1 %v16480_v5  ;;  %13305 = vmatprep.subr.bf16.mxu0 %v16208_v0  ;;  %v16645_v54 = vpack.c.bf16 %v476_v52, %v475_v51  ;;  %v487_v51 = vld [vmem:[#allocation5 + $0x448] sm:$0xff]  ;;  %v452_v52 = vld [vmem:[#allocation5 + $0x340] sm:$0xff] }
  0xae   : > { %13401 = vmatprep.subr.bf16.mxu1 %v16208_v0  ;;  %9775 = vmatprep.mubr.msk.f32.mxu0 %vm16209_vm0, %v18728_v1  ;;  %v16695_v57 = vpack.c.bf16 %v487_v51, %v486_v47  ;;  %v16699_v58 = vpack.c.bf16 %v453_v55, %v452_v52  ;;  %v493_v47 = vld [vmem:[#allocation5 + $0x478] sm:$0xff]  ;;  %v458_v51 = vld [vmem:[#allocation5 + $0x370] sm:$0xff] }
  0xaf   : > { %9915 = vmatprep.mubr.msk.f32.mxu1 %vm16209_vm0, %v18728_v1  ;;  %v459_v52 = vld [vmem:[#allocation5 + $0x378] sm:$0xff]  ;;  %v16719_v55 = vpack.c.bf16 %v493_v47, %v492_v41  ;;  %v16961_v41 = vpack.c.bf16 %v360_v23, %v359_v10  ;;  %v16965_v47 = vpack.c.bf16 %v343_v28, %v342_v26  ;;  %v363_v23 = vld [vmem:[#allocation5 + $0xa0] sm:$0xff]  ;;  %v364_v26 = vld [vmem:[#allocation5 + $0xa8] sm:$0xff] }
  0xb0   : > { %13307 = vmatpush3.bf16.msra.mxu0 %v16548_v56  ;;  %18895 = vst [vmem:[#allocation36_spill] sm:$0xff] %v16699_v58  ;;  %v16723_v60 = vpack.c.bf16 %v459_v52, %v458_v51  ;;  %v361_v51 = vld [vmem:[#allocation5 + $0x90] sm:$0xff]  ;;  %v362_v52 = vld [vmem:[#allocation5 + $0x98] sm:$0xff]  ;;  %v346_v28 = vld [vmem:[#allocation5 + $0x20] sm:$0xff] }
  0xb1   : > { %13403 = vmatpush3.bf16.msra.mxu1 %v16485_v12  ;;  %13308 = vmatprep.subr.bf16.mxu0 %v16208_v0  ;;  %18900 = vst [vmem:[#allocation41_spill] sm:$0xff] %v16961_v41  ;;  %18901 = vst [vmem:[#allocation42_spill] sm:$0xff] %v16965_v47 }
  0xb2   : > { %13404 = vmatprep.subr.bf16.mxu1 %v16208_v0  ;;  %18898 = vst [vmem:[#allocation39_spill] sm:$0xff] %v16723_v60 }
  0xb4   : > { %13310 = vmatpush3.bf16.msra.mxu0 %v16558_v59 }
  0xb5   : > { %13406 = vmatpush3.bf16.msra.mxu1 %v16493_v18  ;;  %13311 = vmatprep.subr.bf16.mxu0 %v16208_v0 }
  0xb6   : > { %13407 = vmatprep.subr.bf16.mxu1 %v16208_v0 }
  0xb8   : > { %13313 = vmatpush3.bf16.msra.mxu0 %v16564_v62 }
  0xb9   : > { %13409 = vmatpush3.bf16.msra.mxu1 %v16501_v24  ;;  %13314 = vmatprep.subr.bf16.mxu0 %v16208_v0 }
  0xba   : > { %13410 = vmatprep.subr.bf16.mxu1 %v16208_v0 }
  0xbc   : > { %13316 = vmatpush3.bf16.msra.mxu0 %v16570_v3 }
  0xbd   : > { %13412 = vmatpush3.bf16.msra.mxu1 %v16509_v30  ;;  %13317 = vmatprep.subr.bf16.mxu0 %v16208_v0 }
  0xbe   : > { %13413 = vmatprep.subr.bf16.mxu1 %v16208_v0 }
  0xc0   : > { %13319 = vmatpush3.bf16.msra.mxu0 %v16576_v7 }
  0xc1   : > { %13415 = vmatpush3.bf16.msra.mxu1 %v16517_v36  ;;  %13320 = vmatprep.subr.bf16.mxu0 %v16208_v0 }
  0xc2   : > { %13416 = vmatprep.subr.bf16.mxu1 %v16208_v0 }
  0xc4   : > { %13322 = vmatpush3.bf16.msra.mxu0 %v16582_v11 }
  0xc5   : > { %13418 = vmatpush3.bf16.msra.mxu1 %v16525_v42  ;;  %13323 = vmatprep.subr.bf16.mxu0 %v16208_v0 }
  0xc6   : > { %13419 = vmatprep.subr.bf16.mxu1 %v16208_v0 }
  0xc8   : > { %13325 = vmatpush3.bf16.msra.mxu0 %v16588_v16 }
  0xc9   : > { %13421 = vmatpush3.bf16.msra.mxu1 %v16533_v48  ;;  %13326 = vmatprep.subr.bf16.mxu0 %v16208_v0 }
  0xca   : > { %13422 = vmatprep.subr.bf16.mxu1 %v16208_v0 }
  0xcb   : > { %9776 = vmatmul.mubr.f32.vlgmr.msra.gmra.mrb[0].mxu0 %v16595_v21 }
  0xcc   : > { %13328 = vmatpush3.bf16.msra.mxu0 %v16597_v22  ;;  %9916 = vmatmul.mubr.f32.vlgmr.msra.gmra.mrb[0].mxu1 %v16595_v21 }
  0xcd   : > { %13424 = vmatpush3.bf16.msra.mxu1 %v16542_v53  ;;  %13329 = vmatprep.subr.bf16.mxu0 %v16208_v0 }
  0xce   : > { %13425 = vmatprep.subr.bf16.mxu1 %v16208_v0  ;;  %9810 = vmatprep.mubr.msk.f32.mxu0 %vm16209_vm0, %v18728_v1 }
  0xcf   : > { %9950 = vmatprep.mubr.msk.f32.mxu1 %vm16209_vm0, %v18728_v1 }
  0xd0   : > { %13331 = vmatpush3.bf16.msra.mxu0 %v16605_v27 }
  0xd1   : > { %13427 = vmatpush3.bf16.msra.mxu1 %v16548_v56  ;;  %13332 = vmatprep.subr.bf16.mxu0 %v16208_v0 }
  0xd2   : > { %13428 = vmatprep.subr.bf16.mxu1 %v16208_v0 }
  0xd4   : > { %13334 = vmatpush3.bf16.msra.mxu0 %v16615_v32 }
  0xd5   : > { %13430 = vmatpush3.bf16.msra.mxu1 %v16558_v59  ;;  %13335 = vmatprep.subr.bf16.mxu0 %v16208_v0 }
  0xd6   : > { %13431 = vmatprep.subr.bf16.mxu1 %v16208_v0 }
  0xd8   : > { %13337 = vmatpush3.bf16.msra.mxu0 %v16621_v35 }
  0xd9   : > { %13433 = vmatpush3.bf16.msra.mxu1 %v16564_v62  ;;  %13338 = vmatprep.subr.bf16.mxu0 %v16208_v0 }
  0xda   : > { %13434 = vmatprep.subr.bf16.mxu1 %v16208_v0 }
  0xdc   : > { %13340 = vmatpush3.bf16.msra.mxu0 %v16627_v40 }
  0xdd   : > { %13436 = vmatpush3.bf16.msra.mxu1 %v16570_v3  ;;  %13341 = vmatprep.subr.bf16.mxu0 %v16208_v0 }
  0xde   : > { %13437 = vmatprep.subr.bf16.mxu1 %v16208_v0 }
  0xe0   : > { %13343 = vmatpush3.bf16.msra.mxu0 %v16633_v45 }
  0xe1   : > { %13439 = vmatpush3.bf16.msra.mxu1 %v16576_v7  ;;  %13344 = vmatprep.subr.bf16.mxu0 %v16208_v0 }
  0xe2   : > { %13440 = vmatprep.subr.bf16.mxu1 %v16208_v0 }
  0xe4   : > { %13346 = vmatpush3.bf16.msra.mxu0 %v16639_v50 }
  0xe5   : > { %13442 = vmatpush3.bf16.msra.mxu1 %v16582_v11  ;;  %13347 = vmatprep.subr.bf16.mxu0 %v16208_v0 }
  0xe6   : > { %13443 = vmatprep.subr.bf16.mxu1 %v16208_v0 }
  0xe8   : > { %13349 = vmatpush3.bf16.msra.mxu0 %v16645_v54 }
  0xe9   : > { %13445 = vmatpush3.bf16.msra.mxu1 %v16588_v16  ;;  %13350 = vmatprep.subr.bf16.mxu0 %v16208_v0 }
  0xea   : > { %13446 = vmatprep.subr.bf16.mxu1 %v16208_v0 }
  0xeb   : > { %9811 = vmatmul.mubr.f32.vlgmr.msra.gmra.mrb[0].mxu0 %v16652_v61 }
  0xec   : > { %13352 = vmatpush3.bf16.msra.mxu0 %v16654_v63  ;;  %9951 = vmatmul.mubr.f32.vlgmr.msra.gmra.mrb[0].mxu1 %v16659_v2 }
  0xed   : > { %13448 = vmatpush3.bf16.msra.mxu1 %v16661_v4  ;;  %13353 = vmatprep.subr.bf16.mxu0 %v16208_v0 }
  0xee   : > { %13449 = vmatprep.subr.bf16.mxu1 %v16208_v0  ;;  %9845 = vmatprep.mubr.msk.f32.mxu0 %vm16209_vm0, %v18728_v1 }
  0xef   : > { %9985 = vmatprep.mubr.msk.f32.mxu1 %vm16209_vm0, %v18728_v1 }
  0xf0   : > { %13355 = vmatpush3.bf16.msra.mxu0 %v16667_v15 }
  0xf1   : > { %13451 = vmatpush3.bf16.msra.mxu1 %v16671_v17  ;;  %13356 = vmatprep.subr.bf16.mxu0 %v16208_v0 }
  0xf2   : > { %13452 = vmatprep.subr.bf16.mxu1 %v16208_v0 }
  0xf4   : > { %13358 = vmatpush3.bf16.msra.mxu0 %v16679_v29 }
  0xf5   : > { %13454 = vmatpush3.bf16.msra.mxu1 %v16683_v33  ;;  %13359 = vmatprep.subr.bf16.mxu0 %v16208_v0 }
  0xf6   : > { %13455 = vmatprep.subr.bf16.mxu1 %v16208_v0 }
  0xf8   : > { %13361 = vmatpush3.bf16.msra.mxu0 %v16687_v44 }
  0xf9   : > { %13457 = vmatpush3.bf16.msra.mxu1 %v16691_v46  ;;  %13362 = vmatprep.subr.bf16.mxu0 %v16208_v0 }
  0xfa   : > { %13458 = vmatprep.subr.bf16.mxu1 %v16208_v0 }
  0xfc   : > { %13364 = vmatpush3.bf16.msra.mxu0 %v16695_v57 }
  0xfd   : > { %13460 = vmatpush3.bf16.msra.mxu1 %v16699_v58  ;;  %13365 = vmatprep.subr.bf16.mxu0 %v16208_v0 }
  0xfe   : > { %13461 = vmatprep.subr.bf16.mxu1 %v16208_v0 }
 0x100   : > { %13367 = vmatpush3.bf16.msra.mxu0 %v16703_v14 }
 0x101   : > { %13463 = vmatpush3.bf16.msra.mxu1 %v16707_v20  ;;  %13368 = vmatprep.subr.bf16.mxu0 %v16208_v0 }
 0x102   : > { %13464 = vmatprep.subr.bf16.mxu1 %v16208_v0 }
 0x104   : > { %13370 = vmatpush3.bf16.msra.mxu0 %v16711_v38 }
 0x105   : > { %13466 = vmatpush3.bf16.msra.mxu1 %v16715_v39  ;;  %13371 = vmatprep.subr.bf16.mxu0 %v16208_v0 }
 0x106   : > { %13467 = vmatprep.subr.bf16.mxu1 %v16208_v0 }
 0x108   : > { %13373 = vmatpush3.bf16.msra.mxu0 %v16719_v55 }
 0x109   : > { %13469 = vmatpush3.bf16.msra.mxu1 %v16723_v60  ;;  %13518 = vmatprep.subr.bf16.mxu0 %v16208_v0 }
 0x10a   : > { %13470 = vmatprep.subr.bf16.mxu1 %v16208_v0 }
 0x10b   : > { %9846 = vmatmul.mubr.f32.vlgmr.msra.gmra.mrb[0].mxu0 %v16728_v6 }
 0x10c   : > { %9986 = vmatmul.mubr.f32.vlgmr.msra.gmra.mrb[0].mxu1 %v16652_v61  ;;  %13520 = vmatpush3.bf16.msra.mxu0 %v16482_v9 }
 0x10d   : > { %13472 = vmatpush3.bf16.msra.mxu1 %v16597_v22  ;;  %13521 = vmatprep.subr.bf16.mxu0 %v16208_v0 }
 0x10e   : > { %13473 = vmatprep.subr.bf16.mxu1 %v16208_v0  ;;  %10020 = vmatprep.mubr.msk.f32.mxu1 %vm16209_vm0, %v18728_v1 }
 0x10f   : > { %10090 = vmatprep.mubr.msk.f32.mxu0 %vm16209_vm0, %v18728_v1 }
 0x110   : > { %13523 = vmatpush3.bf16.msra.mxu0 %v16489_v13 }
 0x111   : > { %13475 = vmatpush3.bf16.msra.mxu1 %v16605_v27  ;;  %13524 = vmatprep.subr.bf16.mxu0 %v16208_v0 }
 0x112   : > { %13476 = vmatprep.subr.bf16.mxu1 %v16208_v0 }
 0x114   : > { %13526 = vmatpush3.bf16.msra.mxu0 %v16497_v19 }
 0x115   : > { %13478 = vmatpush3.bf16.msra.mxu1 %v16615_v32  ;;  %13527 = vmatprep.subr.bf16.mxu0 %v16208_v0 }
 0x116   : > { %13479 = vmatprep.subr.bf16.mxu1 %v16208_v0 }
 0x118   : > { %13529 = vmatpush3.bf16.msra.mxu0 %v16505_v25 }
 0x119   : > { %13481 = vmatpush3.bf16.msra.mxu1 %v16621_v35  ;;  %13530 = vmatprep.subr.bf16.mxu0 %v16208_v0 }
 0x11a   : > { %13482 = vmatprep.subr.bf16.mxu1 %v16208_v0 }
 0x11c   : > { %13532 = vmatpush3.bf16.msra.mxu0 %v16513_v31 }
 0x11d   : > { %13484 = vmatpush3.bf16.msra.mxu1 %v16627_v40  ;;  %13533 = vmatprep.subr.bf16.mxu0 %v16208_v0 }
 0x11e   : > { %13485 = vmatprep.subr.bf16.mxu1 %v16208_v0 }
 0x120   : > { %13535 = vmatpush3.bf16.msra.mxu0 %v16521_v37 }
 0x121   : > { %13487 = vmatpush3.bf16.msra.mxu1 %v16633_v45  ;;  %13536 = vmatprep.subr.bf16.mxu0 %v16208_v0 }
 0x122   : > { %13488 = vmatprep.subr.bf16.mxu1 %v16208_v0 }
 0x124   : > { %13538 = vmatpush3.bf16.msra.mxu0 %v16529_v43 }
 0x125   : > { %13490 = vmatpush3.bf16.msra.mxu1 %v16639_v50  ;;  %13539 = vmatprep.subr.bf16.mxu0 %v16208_v0 }
 0x126   : > { %13491 = vmatprep.subr.bf16.mxu1 %v16208_v0 }
 0x128   : > { %13541 = vmatpush3.bf16.msra.mxu0 %v16537_v49 }
 0x129   : > { %13493 = vmatpush3.bf16.msra.mxu1 %v16645_v54  ;;  %13542 = vmatprep.subr.bf16.mxu0 %v16208_v0 }
 0x12a   : > { %13494 = vmatprep.subr.bf16.mxu1 %v16208_v0 }
 0x12b   : > { %10091 = vmatmul.mubr.f32.vlgmr.msra.gmra.mrb[2].mxu0 %v16595_v21  ;;  %v16808_v21 = vld [vmem:[%s16460_s20 + $0x30] sm:$0xff] }
 0x12c   : > { %10021 = vmatmul.mubr.f32.vlgmr.msra.gmra.mrb[0].mxu1 %v16728_v6  ;;  %13544 = vmatpush3.bf16.msra.mxu0 %v16480_v5  ;;  %18899 = vst [vmem:[#allocation40_spill] sm:$0xff] %v16808_v21 }
 0x12d   : > { %13496 = vmatpush3.bf16.msra.mxu1 %v16654_v63  ;;  %13545 = vmatprep.subr.bf16.mxu0 %v16208_v0 }
 0x12e   : > { %13497 = vmatprep.subr.bf16.mxu1 %v16208_v0  ;;  %10055 = vmatprep.mubr.msk.f32.mxu1 %vm16209_vm0, %v18728_v1 }
 0x12f   : > { %10125 = vmatprep.mubr.msk.f32.mxu0 %vm16209_vm0, %v18728_v1 }
 0x130   : > { %13547 = vmatpush3.bf16.msra.mxu0 %v16485_v12 }
 0x131   : > { %13499 = vmatpush3.bf16.msra.mxu1 %v16667_v15  ;;  %13548 = vmatprep.subr.bf16.mxu0 %v16208_v0 }
 0x132   : > { %13500 = vmatprep.subr.bf16.mxu1 %v16208_v0 }
 0x134   : > { %13550 = vmatpush3.bf16.msra.mxu0 %v16493_v18 }
 0x135   : > { %13502 = vmatpush3.bf16.msra.mxu1 %v16679_v29  ;;  %13551 = vmatprep.subr.bf16.mxu0 %v16208_v0 }
 0x136   : > { %13503 = vmatprep.subr.bf16.mxu1 %v16208_v0 }
 0x138   : > { %13553 = vmatpush3.bf16.msra.mxu0 %v16501_v24 }
 0x139   : > { %13505 = vmatpush3.bf16.msra.mxu1 %v16687_v44  ;;  %13554 = vmatprep.subr.bf16.mxu0 %v16208_v0 }
 0x13a   : > { %13506 = vmatprep.subr.bf16.mxu1 %v16208_v0 }
 0x13c   : > { %13556 = vmatpush3.bf16.msra.mxu0 %v16509_v30 }
 0x13d   : > { %13508 = vmatpush3.bf16.msra.mxu1 %v16695_v57  ;;  %13557 = vmatprep.subr.bf16.mxu0 %v16208_v0 }
 0x13e   : > { %13509 = vmatprep.subr.bf16.mxu1 %v16208_v0 }
 0x140   : > { %13559 = vmatpush3.bf16.msra.mxu0 %v16517_v36 }
 0x141   : > { %13511 = vmatpush3.bf16.msra.mxu1 %v16703_v14  ;;  %13560 = vmatprep.subr.bf16.mxu0 %v16208_v0 }
 0x142   : > { %13512 = vmatprep.subr.bf16.mxu1 %v16208_v0 }
 0x144   : > { %13562 = vmatpush3.bf16.msra.mxu0 %v16525_v42 }
 0x145   : > { %13514 = vmatpush3.bf16.msra.mxu1 %v16711_v38  ;;  %13563 = vmatprep.subr.bf16.mxu0 %v16208_v0 }
 0x146   : > { %13515 = vmatprep.subr.bf16.mxu1 %v16208_v0 }
 0x148   : > { %13565 = vmatpush3.bf16.msra.mxu0 %v16533_v48 }
 0x149   : > { %13517 = vmatpush3.bf16.msra.mxu1 %v16719_v55  ;;  %13566 = vmatprep.subr.bf16.mxu0 %v16208_v0 }
 0x14a   : > { %13662 = vmatprep.subr.bf16.mxu1 %v16208_v0 }
 0x14b   : > { %10126 = vmatmul.mubr.f32.vlgmr.msra.gmra.mrb[2].mxu0 %v16659_v2 }
 0x14c   : > { %10056 = vmatmul.mubr.f32.vlgmr.msra.gmra.mrb[0].mxu1 %v16808_v21  ;;  %13568 = vmatpush3.bf16.msra.mxu0 %v16542_v53 }
 0x14d   : > { %13664 = vmatpush3.bf16.msra.mxu1 %v16482_v9  ;;  %13569 = vmatprep.subr.bf16.mxu0 %v16208_v0 }
 0x14e   : > { %13665 = vmatprep.subr.bf16.mxu1 %v16208_v0  ;;  %10160 = vmatprep.mubr.msk.f32.mxu0 %vm16209_vm0, %v18728_v1 }
 0x14f   : > { %10300 = vmatprep.mubr.msk.f32.mxu1 %vm16209_vm0, %v18728_v1 }
 0x150   : > { %13571 = vmatpush3.bf16.msra.mxu0 %v16548_v56 }
 0x151   : > { %13667 = vmatpush3.bf16.msra.mxu1 %v16489_v13  ;;  %13572 = vmatprep.subr.bf16.mxu0 %v16208_v0 }
 0x152   : > { %13668 = vmatprep.subr.bf16.mxu1 %v16208_v0 }
 0x154   : > { %13574 = vmatpush3.bf16.msra.mxu0 %v16558_v59 }
 0x155   : > { %13670 = vmatpush3.bf16.msra.mxu1 %v16497_v19  ;;  %13575 = vmatprep.subr.bf16.mxu0 %v16208_v0 }
 0x156   : > { %13671 = vmatprep.subr.bf16.mxu1 %v16208_v0 }
 0x158   : > { %13577 = vmatpush3.bf16.msra.mxu0 %v16564_v62 }
 0x159   : > { %13673 = vmatpush3.bf16.msra.mxu1 %v16505_v25  ;;  %13578 = vmatprep.subr.bf16.mxu0 %v16208_v0 }
 0x15a   : > { %13674 = vmatprep.subr.bf16.mxu1 %v16208_v0 }
 0x15c   : > { %13580 = vmatpush3.bf16.msra.mxu0 %v16570_v3 }
 0x15d   : > { %13676 = vmatpush3.bf16.msra.mxu1 %v16513_v31  ;;  %13581 = vmatprep.subr.bf16.mxu0 %v16208_v0 }
 0x15e   : > { %13677 = vmatprep.subr.bf16.mxu1 %v16208_v0 }
 0x160   : > { %13583 = vmatpush3.bf16.msra.mxu0 %v16576_v7 }
 0x161   : > { %13679 = vmatpush3.bf16.msra.mxu1 %v16521_v37  ;;  %13584 = vmatprep.subr.bf16.mxu0 %v16208_v0 }
 0x162   : > { %13680 = vmatprep.subr.bf16.mxu1 %v16208_v0 }
 0x164   : > { %13586 = vmatpush3.bf16.msra.mxu0 %v16582_v11 }
 0x165   : > { %13682 = vmatpush3.bf16.msra.mxu1 %v16529_v43  ;;  %13587 = vmatprep.subr.bf16.mxu0 %v16208_v0 }
 0x166   : > { %13683 = vmatprep.subr.bf16.mxu1 %v16208_v0 }
 0x168   : > { %13589 = vmatpush3.bf16.msra.mxu0 %v16588_v16 }
 0x169   : > { %13685 = vmatpush3.bf16.msra.mxu1 %v16537_v49  ;;  %13590 = vmatprep.subr.bf16.mxu0 %v16208_v0 }
 0x16a   : > { %13686 = vmatprep.subr.bf16.mxu1 %v16208_v0 }
 0x16b   : > { %10161 = vmatmul.mubr.f32.vlgmr.msra.gmra.mrb[2].mxu0 %v1363_v8 }
 0x16c   : > { %13592 = vmatpush3.bf16.msra.mxu0 %v16661_v4  ;;  %10301 = vmatmul.mubr.f32.vlgmr.msra.gmra.mrb[2].mxu1 %v16659_v2 }
 0x16d   : > { %13688 = vmatpush3.bf16.msra.mxu1 %v16480_v5  ;;  %13593 = vmatprep.subr.bf16.mxu0 %v16208_v0 }
 0x16e   : > { %13689 = vmatprep.subr.bf16.mxu1 %v16208_v0  ;;  %10195 = vmatprep.mubr.msk.f32.mxu0 %vm16209_vm0, %v18728_v1 }
 0x16f   : > { %10335 = vmatprep.mubr.msk.f32.mxu1 %vm16209_vm0, %v18728_v1 }
 0x170   : > { %13595 = vmatpush3.bf16.msra.mxu0 %v16671_v17 }
 0x171   : > { %13691 = vmatpush3.bf16.msra.mxu1 %v16485_v12  ;;  %13596 = vmatprep.subr.bf16.mxu0 %v16208_v0 }
 0x172   : > { %13692 = vmatprep.subr.bf16.mxu1 %v16208_v0 }
 0x174   : > { %13598 = vmatpush3.bf16.msra.mxu0 %v16683_v33 }
 0x175   : > { %13694 = vmatpush3.bf16.msra.mxu1 %v16493_v18  ;;  %13599 = vmatprep.subr.bf16.mxu0 %v16208_v0 }
 0x176   : > { %13695 = vmatprep.subr.bf16.mxu1 %v16208_v0 }
 0x178   : > { %13601 = vmatpush3.bf16.msra.mxu0 %v16691_v46 }
 0x179   : > { %13697 = vmatpush3.bf16.msra.mxu1 %v16501_v24  ;;  %13602 = vmatprep.subr.bf16.mxu0 %v16208_v0 }
 0x17a   : > { %13698 = vmatprep.subr.bf16.mxu1 %v16208_v0 }
 0x17c   : > { %13604 = vmatpush3.bf16.msra.mxu0 %v16699_v58 }
 0x17d   : > { %13700 = vmatpush3.bf16.msra.mxu1 %v16509_v30  ;;  %13605 = vmatprep.subr.bf16.mxu0 %v16208_v0 }
 0x17e   : > { %13701 = vmatprep.subr.bf16.mxu1 %v16208_v0 }
 0x180   : > { %13607 = vmatpush3.bf16.msra.mxu0 %v16707_v20 }
 0x181   : > { %13703 = vmatpush3.bf16.msra.mxu1 %v16517_v36  ;;  %13608 = vmatprep.subr.bf16.mxu0 %v16208_v0 }
 0x182   : > { %13704 = vmatprep.subr.bf16.mxu1 %v16208_v0 }
 0x184   : > { %13610 = vmatpush3.bf16.msra.mxu0 %v16715_v39 }
 0x185   : > { %13706 = vmatpush3.bf16.msra.mxu1 %v16525_v42  ;;  %13611 = vmatprep.subr.bf16.mxu0 %v16208_v0 }
 0x186   : > { %13707 = vmatprep.subr.bf16.mxu1 %v16208_v0 }
 0x188   : > { %13613 = vmatpush3.bf16.msra.mxu0 %v16723_v60 }
 0x189   : > { %13709 = vmatpush3.bf16.msra.mxu1 %v16533_v48  ;;  %13614 = vmatprep.subr.bf16.mxu0 %v16208_v0 }
 0x18a   : > { %13710 = vmatprep.subr.bf16.mxu1 %v16208_v0 }
 0x18b   : > { %10196 = vmatmul.mubr.f32.vlgmr.msra.gmra.mrb[2].mxu0 %v16728_v6 }
 0x18c   : > { %13616 = vmatpush3.bf16.msra.mxu0 %v16597_v22  ;;  %10336 = vmatmul.mubr.f32.vlgmr.msra.gmra.mrb[2].mxu1 %v1363_v8  ;;  %v344_v8 = vld [vmem:[#allocation5 + $0x10] sm:$0xff] }
 0x18d   : > { %13712 = vmatpush3.bf16.msra.mxu1 %v16661_v4  ;;  %13617 = vmatprep.subr.bf16.mxu0 %v16208_v0  ;;  %v355_v4 = vld [vmem:[#allocation5 + $0x68] sm:$0xff] }
 0x18e   : > { %13713 = vmatprep.subr.bf16.mxu1 %v16208_v0  ;;  %10230 = vmatprep.mubr.msk.f32.mxu0 %vm16209_vm0, %v18728_v1 }
 0x18f   : > { %10370 = vmatprep.mubr.msk.f32.mxu1 %vm16209_vm0, %v18728_v1 }
 0x190   : > { %13619 = vmatpush3.bf16.msra.mxu0 %v16605_v27 }
 0x191   : > { %13715 = vmatpush3.bf16.msra.mxu1 %v16671_v17  ;;  %13620 = vmatprep.subr.bf16.mxu0 %v16208_v0 }
 0x192   : > { %13716 = vmatprep.subr.bf16.mxu1 %v16208_v0 }
 0x194   : > { %13622 = vmatpush3.bf16.msra.mxu0 %v16615_v32 }
 0x195   : > { %13718 = vmatpush3.bf16.msra.mxu1 %v16683_v33  ;;  %13623 = vmatprep.subr.bf16.mxu0 %v16208_v0  ;;  %v368_v33 = vld [vmem:[#allocation5 + $0xc8] sm:$0xff] }
 0x196   : > { %13719 = vmatprep.subr.bf16.mxu1 %v16208_v0 }
 0x198   : > { %13625 = vmatpush3.bf16.msra.mxu0 %v16621_v35 }
 0x199   : > { %13721 = vmatpush3.bf16.msra.mxu1 %v16691_v46  ;;  %13626 = vmatprep.subr.bf16.mxu0 %v16208_v0 }
 0x19a   : > { %13722 = vmatprep.subr.bf16.mxu1 %v16208_v0 }
 0x19c   : > { %13628 = vmatpush3.bf16.msra.mxu0 %v16627_v40 }
 0x19d   : > { %13724 = vmatpush3.bf16.msra.mxu1 %v16699_v58  ;;  %13629 = vmatprep.subr.bf16.mxu0 %v16208_v0  ;;  %v349_v58 = vld [vmem:[#allocation5 + $0x38] sm:$0xff] }
 0x19e   : > { %13725 = vmatprep.subr.bf16.mxu1 %v16208_v0 }
 0x1a0   : > { %13631 = vmatpush3.bf16.msra.mxu0 %v16633_v45 }
 0x1a1   : > { %13727 = vmatpush3.bf16.msra.mxu1 %v16707_v20  ;;  %13632 = vmatprep.subr.bf16.mxu0 %v16208_v0  ;;  %v18904_v20 = vmov 0.0  }
 0x1a2   : > { %13728 = vmatprep.subr.bf16.mxu1 %v16208_v0 }
 0x1a4   : > { %13634 = vmatpush3.bf16.msra.mxu0 %v16639_v50 }
 0x1a5   : > { %13730 = vmatpush3.bf16.msra.mxu1 %v16715_v39  ;;  %13635 = vmatprep.subr.bf16.mxu0 %v16208_v0  ;;  %v347_v39 = vld [vmem:[#allocation5 + $0x28] sm:$0xff] }
 0x1a6   : > { %13731 = vmatprep.subr.bf16.mxu1 %v16208_v0 }
 0x1a8   : > { %13637 = vmatpush3.bf16.msra.mxu0 %v16645_v54 }
 0x1a9   : > { %13733 = vmatpush3.bf16.msra.mxu1 %v16723_v60  ;;  %13638 = vmatprep.subr.bf16.mxu0 %v16208_v0  ;;  %v16969_v60 = vpack.c.bf16 %v362_v52, %v361_v51  ;;  %v365_v51 = vld [vmem:[#allocation5 + $0xb0] sm:$0xff]  ;;  %v366_v52 = vld [vmem:[#allocation5 + $0xb8] sm:$0xff] }
 0x1aa   : > { %13734 = vmatprep.subr.bf16.mxu1 %v16208_v0  ;;  %v16989_v46 = vpack.c.bf16 %v366_v52, %v365_v51  ;;  %v369_v52 = vld [vmem:[#allocation5 + $0xd0] sm:$0xff] }
 0x1ab   : > { %10231 = vmatmul.mubr.f32.vlgmr.msra.gmra.mrb[2].mxu0 %v16808_v21  ;;  %18902 = vst [vmem:[#allocation43_spill] sm:$0xff] %v16969_v60 }
 0x1ac   : > { %13640 = vmatpush3.bf16.msra.mxu0 %v16654_v63  ;;  %10371 = vmatmul.mubr.f32.vlgmr.msra.gmra.mrb[2].mxu1 %v16808_v21 }
 0x1ad   : > { %13736 = vmatpush3.bf16.msra.mxu1 %v16597_v22  ;;  %13641 = vmatprep.subr.bf16.mxu0 %v16208_v0 }
 0x1ae   : > { %13737 = vmatprep.subr.bf16.mxu1 %v16208_v0  ;;  %10265 = vmatprep.mubr.msk.f32.mxu0 %vm16209_vm0, %v18728_v1 }
 0x1af   : > { %10405 = vmatprep.mubr.msk.f32.mxu1 %vm16209_vm0, %v18728_v1  ;;  %v345_v1 = vld [vmem:[#allocation5 + $0x18] sm:$0xff] }
 0x1b0   : > { %13643 = vmatpush3.bf16.msra.mxu0 %v16667_v15  ;;  %v16973_v10 = vpack.c.bf16 %v345_v1, %v344_v8  ;;  %v16985_v1 = vpack.c.bf16 %v347_v39, %v346_v28  ;;  %v348_v8 = vld [vmem:[#allocation5 + $0x30] sm:$0xff]  ;;  %v350_v39 = vld [vmem:[#allocation5 + $0x40] sm:$0xff]  ;;  %v351_v28 = vld [vmem:[#allocation5 + $0x48] sm:$0xff] }
 0x1b1   : > { %13739 = vmatpush3.bf16.msra.mxu1 %v16605_v27  ;;  %13644 = vmatprep.subr.bf16.mxu0 %v16208_v0  ;;  %v17001_v51 = vpack.c.bf16 %v351_v28, %v350_v39  ;;  %v354_v28 = vld [vmem:[#allocation5 + $0x60] sm:$0xff] }
 0x1b2   : > { %13740 = vmatprep.subr.bf16.mxu1 %v16208_v0  ;;  %18903 = vst [vmem:[#allocation44_spill] sm:$0xff] %v16973_v10  ;;  %18906 = vst [vmem:[#allocation46_spill] sm:$0xff] %v16985_v1 }
 0x1b3   : > { %18908 = vst [vmem:[#allocation48_spill] sm:$0xff] %v17001_v51 }
 0x1b4   : > { %13646 = vmatpush3.bf16.msra.mxu0 %v16679_v29 }
 0x1b5   : > { %13742 = vmatpush3.bf16.msra.mxu1 %v16615_v32  ;;  %13647 = vmatprep.subr.bf16.mxu0 %v16208_v0 }
 0x1b6   : > { %13743 = vmatprep.subr.bf16.mxu1 %v16208_v0 }
 0x1b8   : > { %13649 = vmatpush3.bf16.msra.mxu0 %v16687_v44 }
 0x1b9   : > { %13745 = vmatpush3.bf16.msra.mxu1 %v16621_v35  ;;  %13650 = vmatprep.subr.bf16.mxu0 %v16208_v0 }
 0x1ba   : > { %13746 = vmatprep.subr.bf16.mxu1 %v16208_v0 }
 0x1bc   : > { %13652 = vmatpush3.bf16.msra.mxu0 %v16695_v57 }
 0x1bd   : > { %13748 = vmatpush3.bf16.msra.mxu1 %v16627_v40  ;;  %13653 = vmatprep.subr.bf16.mxu0 %v16208_v0 }
 0x1be   : > { %13749 = vmatprep.subr.bf16.mxu1 %v16208_v0 }
 0x1c0   : > { %13655 = vmatpush3.bf16.msra.mxu0 %v16703_v14 }
 0x1c1   : > { %13751 = vmatpush3.bf16.msra.mxu1 %v16633_v45  ;;  %13656 = vmatprep.subr.bf16.mxu0 %v16208_v0 }
 0x1c2   : > { %13752 = vmatprep.subr.bf16.mxu1 %v16208_v0 }
 0x1c4   : > { %13658 = vmatpush3.bf16.msra.mxu0 %v16711_v38 }
 0x1c5   : > { %13754 = vmatpush3.bf16.msra.mxu1 %v16639_v50  ;;  %13659 = vmatprep.subr.bf16.mxu0 %v16208_v0 }
 0x1c6   : > { %13755 = vmatprep.subr.bf16.mxu1 %v16208_v0 }
 0x1c8   : > { %13661 = vmatpush3.bf16.msra.mxu0 %v16719_v55 }
 0x1c9   : > { %13757 = vmatpush3.bf16.msra.mxu1 %v16645_v54  ;;  %13758 = vmatprep.subr.bf16.mxu0 %v16208_v0 }
 0x1ca   : > { %13902 = vmatprep.subr.bf16.mxu1 %v16208_v0 }
 0x1cb   : > { %10266 = vmatmul.mubr.f32.vlgmr.msra.gmra.mrb[2].mxu0 %v1577_v34 }
 0x1cc   : > { %10406 = vmatmul.mubr.f32.vlgmr.msra.gmra.mrb[2].mxu1 %v1577_v34  ;;  %13760 = vmatpush3.bf16.msra.mxu0 %v16961_v41  ;;  %v16981_v34 = vpack.c.bf16 %v364_v26, %v363_v23  ;;  %v16993_v23 = vpack.c.bf16 %v349_v58, %v348_v8  ;;  %v367_v26 = vld [vmem:[#allocation5 + $0xc0] sm:$0xff]  ;;  %v352_v58 = vld [vmem:[#allocation5 + $0x50] sm:$0xff]  ;;  %v353_v8 = vld [vmem:[#allocation5 + $0x58] sm:$0xff] }
 0x1cd   : > { %13904 = vmatpush3.bf16.msra.mxu1 %v16965_v47  ;;  %13761 = vmatprep.subr.bf16.mxu0 %v16208_v0  ;;  %v16997_v17 = vpack.c.bf16 %v368_v33, %v367_v26  ;;  %v17009_v33 = vpack.c.bf16 %v353_v8, %v352_v58  ;;  %v371_v26 = vld [vmem:[#allocation5 + $0xe0] sm:$0xff]  ;;  %v374_v58 = vld [vmem:[#allocation5 + $0xf8] sm:$0xff]  ;;  %v356_v8 = vld [vmem:[#allocation5 + $0x70] sm:$0xff] }
 0x1ce   : > { %13905 = vmatprep.subr.bf16.mxu1 %v16208_v0  ;;  %10440 = vmatprep.mubr.msk.f32.mxu0 %vm16209_vm0, %v18904_v20  ;;  %18905 = vst [vmem:[#allocation45_spill] sm:$0xff] %v16981_v34  ;;  %18907 = vst [vmem:[#allocation47_spill] sm:$0xff] %v16993_v23 }
 0x1cf   : > { %10650 = vmatprep.mubr.msk.f32.mxu1 %vm16209_vm0, %v18904_v20 }
 0x1d0   : > { %13763 = vmatpush3.bf16.msra.mxu0 %v16969_v60 }
 0x1d1   : > { %13907 = vmatpush3.bf16.msra.mxu1 %v16973_v10  ;;  %13764 = vmatprep.subr.bf16.mxu0 %v16208_v0 }
 0x1d2   : > { %13908 = vmatprep.subr.bf16.mxu1 %v16208_v0 }
 0x1d4   : > { %13766 = vmatpush3.bf16.msra.mxu0 %v16981_v34 }
 0x1d5   : > { %13910 = vmatpush3.bf16.msra.mxu1 %v16985_v1  ;;  %13767 = vmatprep.subr.bf16.mxu0 %v16208_v0  ;;  %v370_v1 = vld [vmem:[#allocation5 + $0xd8] sm:$0xff] }
 0x1d6   : > { %13911 = vmatprep.subr.bf16.mxu1 %v16208_v0  ;;  %v17005_v10 = vpack.c.bf16 %v370_v1, %v369_v52  ;;  %v17019_v1 = vpack.c.bf16 %v355_v4, %v354_v28  ;;  %v373_v52 = vld [vmem:[#allocation5 + $0xf0] sm:$0xff]  ;;  %v377_v4 = vld [vmem:[#allocation5 + $0x108] sm:$0xff] }
 0x1d8   : > { %13769 = vmatpush3.bf16.msra.mxu0 %v16989_v46  ;;  %18909 = vst [vmem:[#allocation49_spill] sm:$0xff] %v17019_v1 }
 0x1d9   : > { %13913 = vmatpush3.bf16.msra.mxu1 %v16993_v23  ;;  %13770 = vmatprep.subr.bf16.mxu0 %v16208_v0  ;;  %v372_v23 = vld [vmem:[#allocation5 + $0xe8] sm:$0xff] }
 0x1da   : > { %13914 = vmatprep.subr.bf16.mxu1 %v16208_v0  ;;  %v17015_v21 = vpack.c.bf16 %v372_v23, %v371_v26  ;;  %v376_v26 = vld [vmem:[#allocation5 + $0x100] sm:$0xff] }
 0x1db   : > { %v17031_v28 = vpack.c.bf16 %v377_v4, %v376_v26  ;;  %v381_v26 = vld [vmem:[#allocation5 + $0x128] sm:$0xff] }
 0x1dc   : > { %13772 = vmatpush3.bf16.msra.mxu0 %v16997_v17 }
 0x1dd   : > { %13916 = vmatpush3.bf16.msra.mxu1 %v17001_v51  ;;  %13773 = vmatprep.subr.bf16.mxu0 %v16208_v0  ;;  %v357_v51 = vld [vmem:[#allocation5 + $0x78] sm:$0xff]  ;;  %18912 = vst [vmem:[#allocation52_spill] sm:$0xff] %v17031_v28 }
 0x1de   : > { %v17011_v39 = vpop.f32.mrb[0].mxu0  ;;  %13917 = vmatprep.subr.bf16.mxu1 %v16208_v0  ;;  %v17027_v23 = vpack.c.bf16 %v357_v51, %v356_v8  ;;  %v380_v8 = vld [vmem:[#allocation5 + $0x120] sm:$0xff] }
 0x1df   : > { %v9847_v47 = vpop.f32.mrb[1].mxu0  ;;  %v17048_v4 = vpack.c.bf16 %v381_v26, %v380_v8  ;;  %v386_v26 = vld [vmem:[#allocation5 + $0x150] sm:$0xff] }
 0x1e0   : > { %13775 = vmatpush3.bf16.msra.mxu0 %v17005_v10  ;;  %v17023_v47 = vpack.c.bf16 %v374_v58, %v373_v52  ;;  %18911 = vst [vmem:[#allocation51_spill] sm:$0xff] %v17027_v23  ;;  %v378_v52 = vld [vmem:[#allocation5 + $0x110] sm:$0xff]  ;;  %v379_v58 = vld [vmem:[#allocation5 + $0x118] sm:$0xff] }
 0x1e1   : > { %13919 = vmatpush3.bf16.msra.mxu1 %v17009_v33  ;;  %13776 = vmatprep.subr.bf16.mxu0 %v16208_v0  ;;  %v17038_v51 = vpack.c.bf16 %v379_v58, %v378_v52  ;;  %18914 = vst [vmem:[#allocation54_spill] sm:$0xff] %v17048_v4  ;;  %v383_v52 = vld [vmem:[#allocation5 + $0x138] sm:$0xff] }
 0x1e2   : > { %13920 = vmatprep.subr.bf16.mxu1 %v16208_v0  ;;  %18910 = vst [vmem:[#allocation50_spill] sm:$0xff] %v17023_v47 }
 0x1e3   : > { %18913 = vst [vmem:[#allocation53_spill] sm:$0xff] %v17038_v51 }
 0x1e4   : > { %13778 = vmatpush3.bf16.msra.mxu0 %v17015_v21 }
 0x1e5   : > { %13922 = vmatpush3.bf16.msra.mxu1 %v17019_v1  ;;  %13779 = vmatprep.subr.bf16.mxu0 %v16208_v0  ;;  %v15992_v1 = vld [vmem:[%s16460_s20] sm:$0xff] }
 0x1e6   : > { %13923 = vmatprep.subr.bf16.mxu1 %v16208_v0 }
 0x1e8   : > { %13781 = vmatpush3.bf16.msra.mxu0 %v17023_v47 }
 0x1e9   : > { %13925 = vmatpush3.bf16.msra.mxu1 %v17027_v23  ;;  %13782 = vmatprep.subr.bf16.mxu0 %v16208_v0  ;;  %v385_v23 = vld [vmem:[#allocation5 + $0x148] sm:$0xff] }
 0x1ea   : > { %13926 = vmatprep.subr.bf16.mxu1 %v16208_v0 }
 0x1eb   : > { %10441 = vmatmul.mubr.f32.vlgmr.msra.gmra.mrb[4].mxu0 %v15992_v1 }
 0x1ec   : > { %13784 = vmatpush3.bf16.msra.mxu0 %v17031_v28  ;;  %10651 = vmatmul.mubr.f32.vlgmr.msra.gmra.mrb[4].mxu1 %v15992_v1  ;;  %v382_v1 = vld [vmem:[#allocation5 + $0x130] sm:$0xff] }
 0x1ed   : > { %13928 = vmatpush3.bf16.msra.mxu1 %v16961_v41  ;;  %13785 = vmatprep.subr.bf16.mxu0 %v16208_v0  ;;  %v17054_v58 = vpack.c.bf16 %v383_v52, %v382_v1  ;;  %v384_v41 = vld [vmem:[#allocation5 + $0x140] sm:$0xff] }
 0x1ee   : > { %13929 = vmatprep.subr.bf16.mxu1 %v16208_v0  ;;  %10475 = vmatprep.mubr.msk.f32.mxu0 %vm16209_vm0, %v18904_v20  ;;  %v17060_v8 = vpack.c.bf16 %v385_v23, %v384_v41  ;;  %v388_v52 = vld [vmem:[#allocation5 + $0x160] sm:$0xff]  ;;  %v390_v23 = vld [vmem:[#allocation5 + $0x170] sm:$0xff] }
 0x1ef   : > { %10685 = vmatprep.mubr.msk.f32.mxu1 %vm16209_vm0, %v18904_v20  ;;  %18915 = vst [vmem:[#allocation55_spill] sm:$0xff] %v17054_v58 }
 0x1f0   : > { %13787 = vmatpush3.bf16.msra.mxu0 %v17038_v51  ;;  %18916 = vst [vmem:[#allocation56_spill] sm:$0xff] %v17060_v8 }
 0x1f1   : > { %13931 = vmatpush3.bf16.msra.mxu1 %v16969_v60  ;;  %13788 = vmatprep.subr.bf16.mxu0 %v16208_v0  ;;  %v387_v60 = vld [vmem:[#allocation5 + $0x158] sm:$0xff] }
 0x1f2   : > { %13932 = vmatprep.subr.bf16.mxu1 %v16208_v0  ;;  %v17066_v1 = vpack.c.bf16 %v387_v60, %v386_v26  ;;  %v391_v60 = vld [vmem:[#allocation5 + $0x178] sm:$0xff] }
 0x1f3   : > { %v17078_v26 = vpack.c.bf16 %v391_v60, %v390_v23 }
 0x1f4   : > { %13790 = vmatpush3.bf16.msra.mxu0 %v17048_v4  ;;  %18917 = vst [vmem:[#allocation57_spill] sm:$0xff] %v17066_v1 }
 0x1f5   : > { %13934 = vmatpush3.bf16.msra.mxu1 %v16981_v34  ;;  %13791 = vmatprep.subr.bf16.mxu0 %v16208_v0  ;;  %v389_v34 = vld [vmem:[#allocation5 + $0x168] sm:$0xff]  ;;  %18919 = vst [vmem:[#allocation59_spill] sm:$0xff] %v17078_v26 }
 0x1f6   : > { %13935 = vmatprep.subr.bf16.mxu1 %v16208_v0  ;;  %v17072_v41 = vpack.c.bf16 %v389_v34, %v388_v52  ;;  %v17088_v34 = vld [vmem:[%s16460_s20 + $0x8] sm:$0xff]  ;;  %v17115_v52 = vld [vmem:[%s18718_s2] ss:$0 sm:$0xff] }
 0x1f7   : > { %v15726_v23 = vadd.f32 %v17115_v52, %v17011_v39  ;;  %v18922_v39 = vld [vmem:[#allocation40_spill] sm:$0xff] }
 0x1f8   : > { %13793 = vmatpush3.bf16.msra.mxu0 %v17054_v58  ;;  %18918 = vst [vmem:[#allocation58_spill] sm:$0xff] %v17072_v41 }
 0x1f9   : > { %13937 = vmatpush3.bf16.msra.mxu1 %v16989_v46  ;;  %13794 = vmatprep.subr.bf16.mxu0 %v16208_v0 }
 0x1fa   : > { %13938 = vmatprep.subr.bf16.mxu1 %v16208_v0 }
 0x1fc   : > { %13796 = vmatpush3.bf16.msra.mxu0 %v17060_v8 }
 0x1fd   : > { %13940 = vmatpush3.bf16.msra.mxu1 %v16997_v17  ;;  %13797 = vmatprep.subr.bf16.mxu0 %v16208_v0 }
 0x1fe   : > { %13941 = vmatprep.subr.bf16.mxu1 %v16208_v0 }
 0x200   : > { %13799 = vmatpush3.bf16.msra.mxu0 %v17066_v1 }
 0x201   : > { %13943 = vmatpush3.bf16.msra.mxu1 %v17005_v10  ;;  %13800 = vmatprep.subr.bf16.mxu0 %v16208_v0 }
 0x202   : > { %13944 = vmatprep.subr.bf16.mxu1 %v16208_v0 }
 0x204   : > { %13802 = vmatpush3.bf16.msra.mxu0 %v17072_v41 }
 0x205   : > { %13946 = vmatpush3.bf16.msra.mxu1 %v17015_v21  ;;  %13803 = vmatprep.subr.bf16.mxu0 %v16208_v0 }
 0x206   : > { %13947 = vmatprep.subr.bf16.mxu1 %v16208_v0 }
 0x208   : > { %13805 = vmatpush3.bf16.msra.mxu0 %v17078_v26 }
 0x209   : > { %13949 = vmatpush3.bf16.msra.mxu1 %v17023_v47  ;;  %13806 = vmatprep.subr.bf16.mxu0 %v16208_v0 }
 0x20a   : > { %13950 = vmatprep.subr.bf16.mxu1 %v16208_v0 }
 0x20b   : > { %10476 = vmatmul.mubr.f32.vlgmr.msra.gmra.mrb[4].mxu0 %v17088_v34 }
 0x20c   : > { %13808 = vmatpush3.bf16.msra.mxu0 %v16480_v5  ;;  %10686 = vmatmul.mubr.f32.vlgmr.msra.gmra.mrb[4].mxu1 %v17088_v34 }
 0x20d   : > { %13952 = vmatpush3.bf16.msra.mxu1 %v17031_v28  ;;  %13809 = vmatprep.subr.bf16.mxu0 %v16208_v0 }
 0x20e   : > { %13953 = vmatprep.subr.bf16.mxu1 %v16208_v0  ;;  %10510 = vmatprep.mubr.msk.f32.mxu0 %vm16209_vm0, %v18904_v20 }
 0x20f   : > { %10720 = vmatprep.mubr.msk.f32.mxu1 %vm16209_vm0, %v18904_v20 }
 0x210   : > { %13811 = vmatpush3.bf16.msra.mxu0 %v16485_v12 }
 0x211   : > { %13955 = vmatpush3.bf16.msra.mxu1 %v17038_v51  ;;  %13812 = vmatprep.subr.bf16.mxu0 %v16208_v0  ;;  %v789_v51 = vmax.f32 %v15726_v23, 0.0  ;;  %v18927_v23 = vld [vmem:[#allocation46_spill] sm:$0xff] }
 0x212   : > { %13956 = vmatprep.subr.bf16.mxu1 %v16208_v0 }
 0x214   : > { %13814 = vmatpush3.bf16.msra.mxu0 %v16493_v18 }
 0x215   : > { %13958 = vmatpush3.bf16.msra.mxu1 %v17048_v4  ;;  %13815 = vmatprep.subr.bf16.mxu0 %v16208_v0 }
 0x216   : > { %13959 = vmatprep.subr.bf16.mxu1 %v16208_v0 }
 0x218   : > { %13817 = vmatpush3.bf16.msra.mxu0 %v16501_v24 }
 0x219   : > { %13961 = vmatpush3.bf16.msra.mxu1 %v17054_v58  ;;  %13818 = vmatprep.subr.bf16.mxu0 %v16208_v0 }
 0x21a   : > { %13962 = vmatprep.subr.bf16.mxu1 %v16208_v0 }
 0x21c   : > { %13820 = vmatpush3.bf16.msra.mxu0 %v16509_v30 }
 0x21d   : > { %13964 = vmatpush3.bf16.msra.mxu1 %v17060_v8  ;;  %13821 = vmatprep.subr.bf16.mxu0 %v16208_v0 }
 0x21e   : > { %13965 = vmatprep.subr.bf16.mxu1 %v16208_v0 }
 0x21f   : > { %v1214_v60 = vpop.f32.mrb[0].mxu1 }
 0x220   : > { %v15727_v58 = vadd.f32 %v17115_v52, %v1214_v60  ;;  %v10057_v4 = vpop.f32.mrb[1].mxu1  ;;  %13823 = vmatpush3.bf16.msra.mxu0 %v16517_v36  ;;  %v18928_v60 = vld [vmem:[#allocation34_spill] sm:$0xff] }
 0x221   : > { %13967 = vmatpush3.bf16.msra.mxu1 %v17066_v1  ;;  %13824 = vmatprep.subr.bf16.mxu0 %v16208_v0  ;;  %v18925_v4 = vld [vmem:[#allocation44_spill] sm:$0xff] }
 0x222   : > { %v1219_v28 = vmax.f32 %v15727_v58, 0.0  ;;  %13968 = vmatprep.subr.bf16.mxu1 %v16208_v0  ;;  %v18926_v58 = vld [vmem:[#allocation33_spill] sm:$0xff] }
 0x224   : > { %v17128_v8 = vadd.f32 %v1219_v28, %v789_v51  ;;  %13826 = vmatpush3.bf16.msra.mxu0 %v16525_v42  ;;  %v18923_v28 = vld [vmem:[#allocation42_spill] sm:$0xff]  ;;  %v18924_v51 = vld [vmem:[#allocation32_spill] sm:$0xff] }
 0x225   : > { %13970 = vmatpush3.bf16.msra.mxu1 %v17072_v41  ;;  %13827 = vmatprep.subr.bf16.mxu0 %v16208_v0 }
 0x226   : > { %13971 = vmatprep.subr.bf16.mxu1 %v16208_v0 }
 0x228   : > { %13829 = vmatpush3.bf16.msra.mxu0 %v16533_v48 }
 0x229   : > { %13973 = vmatpush3.bf16.msra.mxu1 %v17078_v26  ;;  %13830 = vmatprep.subr.bf16.mxu0 %v16208_v0 }
 0x22a   : > { %13974 = vmatprep.subr.bf16.mxu1 %v16208_v0 }
 0x22b   : > { %10511 = vmatmul.mubr.f32.vlgmr.msra.gmra.mrb[4].mxu0 %v16652_v61  ;;  %v17179_v61 = vld [vmem:[%s16460_s20 + $0x20] sm:$0xff] }
 0x22c   : > { %13832 = vmatpush3.bf16.msra.mxu0 %v16542_v53  ;;  %10721 = vmatmul.mubr.f32.vlgmr.msra.gmra.mrb[4].mxu1 %v16659_v2  ;;  %18920 = vst [vmem:[#allocation60_spill] sm:$0xff] %v17179_v61  ;;  %v17215_v2 = vld [vmem:[%s16460_s20 + $0x40] sm:$0xff] }
 0x22d   : > { %13976 = vmatpush3.bf16.msra.mxu1 %v16482_v9  ;;  %13833 = vmatprep.subr.bf16.mxu0 %v16208_v0  ;;  %18921 = vst [vmem:[#allocation61_spill] sm:$0xff] %v17215_v2 }
 0x22e   : > { %13977 = vmatprep.subr.bf16.mxu1 %v16208_v0  ;;  %10545 = vmatprep.mubr.msk.f32.mxu0 %vm16209_vm0, %v18904_v20 }
 0x22f   : > { %10755 = vmatprep.mubr.msk.f32.mxu1 %vm16209_vm0, %v18904_v20 }
 0x230   : > { %13835 = vmatpush3.bf16.msra.mxu0 %v16548_v56 }
 0x231   : > { %13979 = vmatpush3.bf16.msra.mxu1 %v16489_v13  ;;  %13836 = vmatprep.subr.bf16.mxu0 %v16208_v0 }
 0x232   : > { %13980 = vmatprep.subr.bf16.mxu1 %v16208_v0 }
 0x234   : > { %13838 = vmatpush3.bf16.msra.mxu0 %v16558_v59 }
 0x235   : > { %13982 = vmatpush3.bf16.msra.mxu1 %v16497_v19  ;;  %13839 = vmatprep.subr.bf16.mxu0 %v16208_v0 }
 0x236   : > { %13983 = vmatprep.subr.bf16.mxu1 %v16208_v0 }
 0x238   : > { %13841 = vmatpush3.bf16.msra.mxu0 %v16564_v62 }
 0x239   : > { %13985 = vmatpush3.bf16.msra.mxu1 %v16505_v25  ;;  %13842 = vmatprep.subr.bf16.mxu0 %v16208_v0 }
 0x23a   : > { %13986 = vmatprep.subr.bf16.mxu1 %v16208_v0 }
 0x23c   : > { %13844 = vmatpush3.bf16.msra.mxu0 %v16570_v3 }
 0x23d   : > { %13988 = vmatpush3.bf16.msra.mxu1 %v16513_v31  ;;  %13845 = vmatprep.subr.bf16.mxu0 %v16208_v0 }
 0x23e   : > { %13989 = vmatprep.subr.bf16.mxu1 %v16208_v0 }
 0x240   : > { %13847 = vmatpush3.bf16.msra.mxu0 %v16576_v7 }
 0x241   : > { %13991 = vmatpush3.bf16.msra.mxu1 %v16521_v37  ;;  %13848 = vmatprep.subr.bf16.mxu0 %v16208_v0 }
 0x242   : > { %13992 = vmatprep.subr.bf16.mxu1 %v16208_v0 }
 0x244   : > { %13850 = vmatpush3.bf16.msra.mxu0 %v16582_v11 }
 0x245   : > { %13994 = vmatpush3.bf16.msra.mxu1 %v16529_v43  ;;  %13851 = vmatprep.subr.bf16.mxu0 %v16208_v0 }
 0x246   : > { %13995 = vmatprep.subr.bf16.mxu1 %v16208_v0 }
 0x248   : > { %13853 = vmatpush3.bf16.msra.mxu0 %v16588_v16 }
 0x249   : > { %13997 = vmatpush3.bf16.msra.mxu1 %v16537_v49  ;;  %13854 = vmatprep.subr.bf16.mxu0 %v16208_v0 }
 0x24a   : > { %13998 = vmatprep.subr.bf16.mxu1 %v16208_v0 }
 0x24b   : > { %10546 = vmatmul.mubr.f32.vlgmr.msra.gmra.mrb[4].mxu0 %v16728_v6 }
 0x24c   : > { %13856 = vmatpush3.bf16.msra.mxu0 %v16597_v22  ;;  %10756 = vmatmul.mubr.f32.vlgmr.msra.gmra.mrb[4].mxu1 %v17179_v61  ;;  %v18930_v61 = vld [vmem:[#allocation35_spill] sm:$0xff] }
 0x24d   : > { %14000 = vmatpush3.bf16.msra.mxu1 %v16480_v5  ;;  %13857 = vmatprep.subr.bf16.mxu0 %v16208_v0 }
 0x24e   : > { %14001 = vmatprep.subr.bf16.mxu1 %v16208_v0  ;;  %10580 = vmatprep.mubr.msk.f32.mxu0 %vm16209_vm0, %v18904_v20 }
 0x24f   : > { %10790 = vmatprep.mubr.msk.f32.mxu1 %vm16209_vm0, %v18904_v20 }
 0x250   : > { %13859 = vmatpush3.bf16.msra.mxu0 %v16605_v27 }
 0x251   : > { %14003 = vmatpush3.bf16.msra.mxu1 %v16485_v12  ;;  %13860 = vmatprep.subr.bf16.mxu0 %v16208_v0 }
 0x252   : > { %14004 = vmatprep.subr.bf16.mxu1 %v16208_v0 }
 0x254   : > { %13862 = vmatpush3.bf16.msra.mxu0 %v16615_v32 }
 0x255   : > { %14006 = vmatpush3.bf16.msra.mxu1 %v16493_v18  ;;  %13863 = vmatprep.subr.bf16.mxu0 %v16208_v0 }
 0x256   : > { %14007 = vmatprep.subr.bf16.mxu1 %v16208_v0 }
 0x258   : > { %13865 = vmatpush3.bf16.msra.mxu0 %v16621_v35 }
 0x259   : > { %14009 = vmatpush3.bf16.msra.mxu1 %v16501_v24  ;;  %13866 = vmatprep.subr.bf16.mxu0 %v16208_v0 }
 0x25a   : > { %14010 = vmatprep.subr.bf16.mxu1 %v16208_v0 }
 0x25c   : > { %13868 = vmatpush3.bf16.msra.mxu0 %v16627_v40 }
 0x25d   : > { %14012 = vmatpush3.bf16.msra.mxu1 %v16509_v30  ;;  %13869 = vmatprep.subr.bf16.mxu0 %v16208_v0 }
 0x25e   : > { %14013 = vmatprep.subr.bf16.mxu1 %v16208_v0 }
 0x260   : > { %13871 = vmatpush3.bf16.msra.mxu0 %v16633_v45 }
 0x261   : > { %14015 = vmatpush3.bf16.msra.mxu1 %v16517_v36  ;;  %13872 = vmatprep.subr.bf16.mxu0 %v16208_v0 }
 0x262   : > { %14016 = vmatprep.subr.bf16.mxu1 %v16208_v0 }
 0x264   : > { %13874 = vmatpush3.bf16.msra.mxu0 %v16639_v50 }
 0x265   : > { %14018 = vmatpush3.bf16.msra.mxu1 %v16525_v42  ;;  %13875 = vmatprep.subr.bf16.mxu0 %v16208_v0 }
 0x266   : > { %14019 = vmatprep.subr.bf16.mxu1 %v16208_v0 }
 0x268   : > { %13877 = vmatpush3.bf16.msra.mxu0 %v16645_v54 }
 0x269   : > { %14021 = vmatpush3.bf16.msra.mxu1 %v16533_v48  ;;  %13878 = vmatprep.subr.bf16.mxu0 %v16208_v0 }
 0x26a   : > { %14022 = vmatprep.subr.bf16.mxu1 %v16208_v0 }
 0x26b   : > { %10581 = vmatmul.mubr.f32.vlgmr.msra.gmra.mrb[4].mxu0 %v17215_v2 }
 0x26c   : > { %13880 = vmatpush3.bf16.msra.mxu0 %v16654_v63  ;;  %10791 = vmatmul.mubr.f32.vlgmr.msra.gmra.mrb[4].mxu1 %v16728_v6  ;;  %v17256_v6 = vld [vmem:[%s16460_s20 + $0x48] sm:$0xff] }
 0x26d   : > { %14024 = vmatpush3.bf16.msra.mxu1 %v16542_v53  ;;  %13881 = vmatprep.subr.bf16.mxu0 %v16208_v0  ;;  %v18934_v53 = vld [vmem:[#allocation49_spill] sm:$0xff] }
 0x26e   : > { %14025 = vmatprep.subr.bf16.mxu1 %v16208_v0  ;;  %10615 = vmatprep.mubr.msk.f32.mxu0 %vm16209_vm0, %v18904_v20 }
 0x26f   : > { %10825 = vmatprep.mubr.msk.f32.mxu1 %vm16209_vm0, %v18904_v20 }
 0x270   : > { %13883 = vmatpush3.bf16.msra.mxu0 %v16667_v15 }
 0x271   : > { %14027 = vmatpush3.bf16.msra.mxu1 %v16548_v56  ;;  %13884 = vmatprep.subr.bf16.mxu0 %v16208_v0 }
 0x272   : > { %14028 = vmatprep.subr.bf16.mxu1 %v16208_v0 }
 0x274   : > { %13886 = vmatpush3.bf16.msra.mxu0 %v16679_v29 }
 0x275   : > { %14030 = vmatpush3.bf16.msra.mxu1 %v16558_v59  ;;  %13887 = vmatprep.subr.bf16.mxu0 %v16208_v0  ;;  %v18933_v59 = vld [vmem:[#allocation37_spill] sm:$0xff] }
 0x276   : > { %14031 = vmatprep.subr.bf16.mxu1 %v16208_v0 }
 0x278   : > { %13889 = vmatpush3.bf16.msra.mxu0 %v16687_v44 }
 0x279   : > { %14033 = vmatpush3.bf16.msra.mxu1 %v16564_v62  ;;  %13890 = vmatprep.subr.bf16.mxu0 %v16208_v0 }
 0x27a   : > { %14034 = vmatprep.subr.bf16.mxu1 %v16208_v0 }
 0x27c   : > { %13892 = vmatpush3.bf16.msra.mxu0 %v16695_v57 }
 0x27d   : > { %14036 = vmatpush3.bf16.msra.mxu1 %v16570_v3  ;;  %13893 = vmatprep.subr.bf16.mxu0 %v16208_v0 }
 0x27e   : > { %14037 = vmatprep.subr.bf16.mxu1 %v16208_v0 }
 0x280   : > { %13895 = vmatpush3.bf16.msra.mxu0 %v16703_v14 }
 0x281   : > { %14039 = vmatpush3.bf16.msra.mxu1 %v16576_v7  ;;  %13896 = vmatprep.subr.bf16.mxu0 %v16208_v0 }
 0x282   : > { %14040 = vmatprep.subr.bf16.mxu1 %v16208_v0 }
 0x284   : > { %13898 = vmatpush3.bf16.msra.mxu0 %v16711_v38 }
 0x285   : > { %14042 = vmatpush3.bf16.msra.mxu1 %v16582_v11  ;;  %13899 = vmatprep.subr.bf16.mxu0 %v16208_v0 }
 0x286   : > { %14043 = vmatprep.subr.bf16.mxu1 %v16208_v0 }
 0x288   : > { %13901 = vmatpush3.bf16.msra.mxu0 %v16719_v55 }
 0x289   : > { %14045 = vmatpush3.bf16.msra.mxu1 %v16588_v16  ;;  %14118 = vmatprep.subr.bf16.mxu0 %v16208_v0 }
 0x28a   : > { %14046 = vmatprep.subr.bf16.mxu1 %v16208_v0 }
 0x28b   : > { %10616 = vmatmul.mubr.f32.vlgmr.msra.gmra.mrb[4].mxu0 %v17256_v6 }
 0x28c   : > { %10826 = vmatmul.mubr.f32.vlgmr.msra.gmra.mrb[4].mxu1 %v18922_v39  ;;  %14120 = vmatpush3.bf16.msra.mxu0 %v18923_v28  ;;  %v18929_v39 = vld [vmem:[#allocation47_spill] sm:$0xff] }
 0x28d   : > { %14048 = vmatpush3.bf16.msra.mxu1 %v18924_v51  ;;  %14121 = vmatprep.subr.bf16.mxu0 %v16208_v0  ;;  %v18932_v51 = vld [vmem:[#allocation36_spill] sm:$0xff] }
 0x28e   : > { %14049 = vmatprep.subr.bf16.mxu1 %v16208_v0  ;;  %10860 = vmatprep.mubr.msk.f32.mxu1 %vm16209_vm0, %v18904_v20 }
 0x28f   : > { %10965 = vmatprep.mubr.msk.f32.mxu0 %vm16209_vm0, %v18904_v20 }
 0x290   : > { %14123 = vmatpush3.bf16.msra.mxu0 %v18925_v4 }
 0x291   : > { %14051 = vmatpush3.bf16.msra.mxu1 %v18926_v58  ;;  %14124 = vmatprep.subr.bf16.mxu0 %v16208_v0  ;;  %v18931_v58 = vld [vmem:[#allocation48_spill] sm:$0xff] }
 0x292   : > { %14052 = vmatprep.subr.bf16.mxu1 %v16208_v0 }
 0x294   : > { %14126 = vmatpush3.bf16.msra.mxu0 %v18927_v23 }
 0x295   : > { %14054 = vmatpush3.bf16.msra.mxu1 %v18928_v60  ;;  %14127 = vmatprep.subr.bf16.mxu0 %v16208_v0 }
 0x296   : > { %14055 = vmatprep.subr.bf16.mxu1 %v16208_v0 }
 0x298   : > { %14129 = vmatpush3.bf16.msra.mxu0 %v18929_v39 }
 0x299   : > { %14057 = vmatpush3.bf16.msra.mxu1 %v18930_v61  ;;  %14130 = vmatprep.subr.bf16.mxu0 %v16208_v0 }
 0x29a   : > { %14058 = vmatprep.subr.bf16.mxu1 %v16208_v0 }
 0x29c   : > { %14132 = vmatpush3.bf16.msra.mxu0 %v18931_v58 }
 0x29d   : > { %14060 = vmatpush3.bf16.msra.mxu1 %v18932_v51  ;;  %14133 = vmatprep.subr.bf16.mxu0 %v16208_v0 }
 0x29e   : > { %v1644_v16 = vpop.f32.mrb[2].mxu0  ;;  %14061 = vmatprep.subr.bf16.mxu1 %v16208_v0 }
 0x29f   : > { %v15728_v60 = vadd.f32 %v17115_v52, %v1644_v16  ;;  %v1930_v11 = vpop.f32.mrb[2].mxu1  ;;  %v10267_v7 = vpop.f32.mrb[3].mxu0 }
 0x2a0   : > { %v15729_v3 = vadd.f32 %v17115_v52, %v1930_v11  ;;  %v10407_v61 = vpop.f32.mrb[3].mxu1  ;;  %14135 = vmatpush3.bf16.msra.mxu0 %v17009_v33  ;;  %v18935_v7 = vld [vmem:[#allocation38_spill] sm:$0xff]  ;;  %v18936_v11 = vld [vmem:[#allocation51_spill] sm:$0xff] }
 0x2a1   : > { %v1649_v62 = vmax.f32 %v15728_v60, 0.0  ;;  %14063 = vmatpush3.bf16.msra.mxu1 %v18933_v59  ;;  %14136 = vmatprep.subr.bf16.mxu0 %v16208_v0  ;;  %v18937_v61 = vld [vmem:[#allocation39_spill] sm:$0xff]  ;;  %v18943_v60 = vld [vmem:[#allocation54_spill] sm:$0xff] }
 0x2a2   : > { %14064 = vmatprep.subr.bf16.mxu1 %v16208_v0  ;;  %v1935_v56 = vmax.f32 %v15729_v3, 0.0  ;;  %v18940_v3 = vld [vmem:[#allocation45_spill] sm:$0xff] }
 0x2a3   : > { %v1650_v51 = vadd.f32 %v1649_v62, %v17128_v8  ;;  %v18939_v62 = vld [vmem:[#allocation43_spill] sm:$0xff]  ;;  %v17343_v8 = vld [vmem:[%s16460_s20 + $0x10] sm:$0xff] }
 0x2a4   : > { %14138 = vmatpush3.bf16.msra.mxu0 %v18934_v53 }
 0x2a5   : > { %v17295_v16 = vadd.f32 %v1935_v56, %v1650_v51  ;;  %14066 = vmatpush3.bf16.msra.mxu1 %v18935_v7  ;;  %14139 = vmatprep.subr.bf16.mxu0 %v16208_v0  ;;  %v18938_v56 = vld [vmem:[#allocation41_spill] sm:$0xff] }
 0x2a6   : > { %14067 = vmatprep.subr.bf16.mxu1 %v16208_v0  ;;  %v18942_v51 = vld [vmem:[#allocation53_spill] sm:$0xff] }
 0x2a8   : > { %14141 = vmatpush3.bf16.msra.mxu0 %v18936_v11 }
 0x2a9   : > { %14069 = vmatpush3.bf16.msra.mxu1 %v18937_v61  ;;  %14142 = vmatprep.subr.bf16.mxu0 %v16208_v0 }
 0x2aa   : > { %14070 = vmatprep.subr.bf16.mxu1 %v16208_v0 }
 0x2ab   : > { %10966 = vmatmul.mubr.f32.vlgmr.msra.gmra.mrb[6].mxu0 %v17088_v34  ;;  %v18941_v34 = vld [vmem:[#allocation52_spill] sm:$0xff] }
 0x2ac   : > { %10861 = vmatmul.mubr.f32.vlgmr.msra.gmra.mrb[4].mxu1 %v17215_v2  ;;  %14144 = vmatpush3.bf16.msra.mxu0 %v18938_v56  ;;  %v18944_v2 = vld [vmem:[#allocation55_spill] sm:$0xff] }
 0x2ad   : > { %14072 = vmatpush3.bf16.msra.mxu1 %v16597_v22  ;;  %14145 = vmatprep.subr.bf16.mxu0 %v16208_v0 }
 0x2ae   : > { %14073 = vmatprep.subr.bf16.mxu1 %v16208_v0  ;;  %10895 = vmatprep.mubr.msk.f32.mxu1 %vm16209_vm0, %v18904_v20 }
 0x2af   : > { %11000 = vmatprep.mubr.msk.f32.mxu0 %vm16209_vm0, %v18904_v20 }
 0x2b0   : > { %14147 = vmatpush3.bf16.msra.mxu0 %v18939_v62 }
 0x2b1   : > { %14075 = vmatpush3.bf16.msra.mxu1 %v16605_v27  ;;  %14148 = vmatprep.subr.bf16.mxu0 %v16208_v0 }
 0x2b2   : > { %14076 = vmatprep.subr.bf16.mxu1 %v16208_v0 }
 0x2b4   : > { %14150 = vmatpush3.bf16.msra.mxu0 %v18940_v3 }
 0x2b5   : > { %14078 = vmatpush3.bf16.msra.mxu1 %v16615_v32  ;;  %14151 = vmatprep.subr.bf16.mxu0 %v16208_v0 }
 0x2b6   : > { %14079 = vmatprep.subr.bf16.mxu1 %v16208_v0 }
 0x2b8   : > { %14153 = vmatpush3.bf16.msra.mxu0 %v16989_v46 }
 0x2b9   : > { %14081 = vmatpush3.bf16.msra.mxu1 %v16621_v35  ;;  %14154 = vmatprep.subr.bf16.mxu0 %v16208_v0 }
 0x2ba   : > { %14082 = vmatprep.subr.bf16.mxu1 %v16208_v0 }
 0x2bc   : > { %14156 = vmatpush3.bf16.msra.mxu0 %v16997_v17 }
 0x2bd   : > { %14084 = vmatpush3.bf16.msra.mxu1 %v16627_v40  ;;  %14157 = vmatprep.subr.bf16.mxu0 %v16208_v0 }
 0x2be   : > { %14085 = vmatprep.subr.bf16.mxu1 %v16208_v0 }
 0x2c0   : > { %14159 = vmatpush3.bf16.msra.mxu0 %v17005_v10 }
 0x2c1   : > { %14087 = vmatpush3.bf16.msra.mxu1 %v16633_v45  ;;  %14160 = vmatprep.subr.bf16.mxu0 %v16208_v0 }
 0x2c2   : > { %14088 = vmatprep.subr.bf16.mxu1 %v16208_v0 }
 0x2c4   : > { %14162 = vmatpush3.bf16.msra.mxu0 %v17015_v21 }
 0x2c5   : > { %14090 = vmatpush3.bf16.msra.mxu1 %v16639_v50  ;;  %14163 = vmatprep.subr.bf16.mxu0 %v16208_v0 }
 0x2c6   : > { %14091 = vmatprep.subr.bf16.mxu1 %v16208_v0 }
 0x2c8   : > { %14165 = vmatpush3.bf16.msra.mxu0 %v17023_v47 }
 0x2c9   : > { %14093 = vmatpush3.bf16.msra.mxu1 %v16645_v54  ;;  %14166 = vmatprep.subr.bf16.mxu0 %v16208_v0 }
 0x2ca   : > { %14094 = vmatprep.subr.bf16.mxu1 %v16208_v0 }
 0x2cb   : > { %11001 = vmatmul.mubr.f32.vlgmr.msra.gmra.mrb[6].mxu0 %v17343_v8 }
 0x2cc   : > { %10896 = vmatmul.mubr.f32.vlgmr.msra.gmra.mrb[4].mxu1 %v17256_v6  ;;  %14168 = vmatpush3.bf16.msra.mxu0 %v18941_v34 }
 0x2cd   : > { %14096 = vmatpush3.bf16.msra.mxu1 %v16654_v63  ;;  %14169 = vmatprep.subr.bf16.mxu0 %v16208_v0 }
 0x2ce   : > { %14097 = vmatprep.subr.bf16.mxu1 %v16208_v0  ;;  %10930 = vmatprep.mubr.msk.f32.mxu1 %vm16209_vm0, %v18904_v20 }
 0x2cf   : > { %11035 = vmatprep.mubr.msk.f32.mxu0 %vm16209_vm0, %v18904_v20 }
 0x2d0   : > { %14171 = vmatpush3.bf16.msra.mxu0 %v18942_v51  ;;  %v18945_v51 = vld [vmem:[#allocation56_spill] sm:$0xff] }
 0x2d1   : > { %14099 = vmatpush3.bf16.msra.mxu1 %v16667_v15  ;;  %14172 = vmatprep.subr.bf16.mxu0 %v16208_v0 }
 0x2d2   : > { %14100 = vmatprep.subr.bf16.mxu1 %v16208_v0 }
 0x2d4   : > { %14174 = vmatpush3.bf16.msra.mxu0 %v18943_v60 }
 0x2d5   : > { %14102 = vmatpush3.bf16.msra.mxu1 %v16679_v29  ;;  %14175 = vmatprep.subr.bf16.mxu0 %v16208_v0 }
 0x2d6   : > { %14103 = vmatprep.subr.bf16.mxu1 %v16208_v0 }
 0x2d8   : > { %14177 = vmatpush3.bf16.msra.mxu0 %v18944_v2 }
 0x2d9   : > { %14105 = vmatpush3.bf16.msra.mxu1 %v16687_v44  ;;  %14178 = vmatprep.subr.bf16.mxu0 %v16208_v0 }
 0x2da   : > { %14106 = vmatprep.subr.bf16.mxu1 %v16208_v0 }
 0x2dc   : > { %14180 = vmatpush3.bf16.msra.mxu0 %v18945_v51  ;;  %v17382_v51 = vld [vmem:[%s16460_s20 + $0x50] sm:$0xff] }
 0x2dd   : > { %14108 = vmatpush3.bf16.msra.mxu1 %v16695_v57  ;;  %14181 = vmatprep.subr.bf16.mxu0 %v16208_v0 }
 0x2de   : > { %14109 = vmatprep.subr.bf16.mxu1 %v16208_v0 }
 0x2e0   : > { %14183 = vmatpush3.bf16.msra.mxu0 %v17066_v1  ;;  %v17387_v1 = vld [vmem:[%s16460_s20 + $0x18] sm:$0xff] }
 0x2e1   : > { %14111 = vmatpush3.bf16.msra.mxu1 %v16703_v14  ;;  %14184 = vmatprep.subr.bf16.mxu0 %v16208_v0 }
 0x2e2   : > { %14112 = vmatprep.subr.bf16.mxu1 %v16208_v0 }
 0x2e4   : > { %14186 = vmatpush3.bf16.msra.mxu0 %v17072_v41  ;;  %v18949_v41 = vld [vmem:[#allocation25_spill] sm:$0xff] }
 0x2e5   : > { %14114 = vmatpush3.bf16.msra.mxu1 %v16711_v38  ;;  %14187 = vmatprep.subr.bf16.mxu0 %v16208_v0 }
 0x2e6   : > { %14115 = vmatprep.subr.bf16.mxu1 %v16208_v0 }
 0x2e8   : > { %14189 = vmatpush3.bf16.msra.mxu0 %v17078_v26  ;;  %v17428_v26 = vld [vmem:[%s16460_s20 + $0x28] sm:$0xff] }
 0x2e9   : > { %14117 = vmatpush3.bf16.msra.mxu1 %v16719_v55  ;;  %14190 = vmatprep.subr.bf16.mxu0 %v16208_v0  ;;  %18946 = vst [vmem:[#allocation40_spill] sm:$0xff] %v17428_v26 }
 0x2ea   : > { %14334 = vmatprep.subr.bf16.mxu1 %v16208_v0 }
 0x2eb   : > { %11036 = vmatmul.mubr.f32.vlgmr.msra.gmra.mrb[6].mxu0 %v17387_v1 }
 0x2ec   : > { %10931 = vmatmul.mubr.f32.vlgmr.msra.gmra.mrb[4].mxu1 %v17382_v51  ;;  %14192 = vmatpush3.bf16.msra.mxu0 %v16482_v9 }
 0x2ed   : > { %14336 = vmatpush3.bf16.msra.mxu1 %v18923_v28  ;;  %14193 = vmatprep.subr.bf16.mxu0 %v16208_v0 }
 0x2ee   : > { %14337 = vmatprep.subr.bf16.mxu1 %v16208_v0  ;;  %11070 = vmatprep.mubr.msk.f32.mxu0 %vm16209_vm0, %v18904_v20 }
 0x2ef   : > { %11280 = vmatprep.mubr.msk.f32.mxu1 %vm16209_vm0, %v18904_v20 }
 0x2f0   : > { %14195 = vmatpush3.bf16.msra.mxu0 %v16489_v13 }
 0x2f1   : > { %14339 = vmatpush3.bf16.msra.mxu1 %v18925_v4  ;;  %14196 = vmatprep.subr.bf16.mxu0 %v16208_v0 }
 0x2f2   : > { %14340 = vmatprep.subr.bf16.mxu1 %v16208_v0 }
 0x2f4   : > { %14198 = vmatpush3.bf16.msra.mxu0 %v16497_v19 }
 0x2f5   : > { %14342 = vmatpush3.bf16.msra.mxu1 %v18927_v23  ;;  %14199 = vmatprep.subr.bf16.mxu0 %v16208_v0 }
 0x2f6   : > { %14343 = vmatprep.subr.bf16.mxu1 %v16208_v0 }
 0x2f8   : > { %14201 = vmatpush3.bf16.msra.mxu0 %v16505_v25 }
 0x2f9   : > { %14345 = vmatpush3.bf16.msra.mxu1 %v18929_v39  ;;  %14202 = vmatprep.subr.bf16.mxu0 %v16208_v0 }
 0x2fa   : > { %14346 = vmatprep.subr.bf16.mxu1 %v16208_v0 }
 0x2fc   : > { %14204 = vmatpush3.bf16.msra.mxu0 %v16513_v31 }
 0x2fd   : > { %14348 = vmatpush3.bf16.msra.mxu1 %v18931_v58  ;;  %14205 = vmatprep.subr.bf16.mxu0 %v16208_v0 }
 0x2fe   : > { %14349 = vmatprep.subr.bf16.mxu1 %v16208_v0 }
 0x300   : > { %14207 = vmatpush3.bf16.msra.mxu0 %v16521_v37 }
 0x301   : > { %14351 = vmatpush3.bf16.msra.mxu1 %v17009_v33  ;;  %14208 = vmatprep.subr.bf16.mxu0 %v16208_v0 }
 0x302   : > { %14352 = vmatprep.subr.bf16.mxu1 %v16208_v0 }
 0x304   : > { %14210 = vmatpush3.bf16.msra.mxu0 %v16529_v43 }
 0x305   : > { %14354 = vmatpush3.bf16.msra.mxu1 %v18934_v53  ;;  %14211 = vmatprep.subr.bf16.mxu0 %v16208_v0 }
 0x306   : > { %14355 = vmatprep.subr.bf16.mxu1 %v16208_v0 }
 0x308   : > { %14213 = vmatpush3.bf16.msra.mxu0 %v16537_v49 }
 0x309   : > { %14357 = vmatpush3.bf16.msra.mxu1 %v18936_v11  ;;  %14214 = vmatprep.subr.bf16.mxu0 %v16208_v0 }
 0x30a   : > { %14358 = vmatprep.subr.bf16.mxu1 %v16208_v0 }
 0x30b   : > { %11071 = vmatmul.mubr.f32.vlgmr.msra.gmra.mrb[6].mxu0 %v17428_v26  ;;  %v18948_v26 = vld [vmem:[#allocation24_spill] sm:$0xff] }
 0x30c   : > { %14216 = vmatpush3.bf16.msra.mxu0 %v16480_v5  ;;  %11281 = vmatmul.mubr.f32.vlgmr.msra.gmra.mrb[6].mxu1 %v17343_v8  ;;  %v17469_v8 = vld [vmem:[%s16460_s20 + $0x30] sm:$0xff] }
 0x30d   : > { %14360 = vmatpush3.bf16.msra.mxu1 %v18938_v56  ;;  %14217 = vmatprep.subr.bf16.mxu0 %v16208_v0  ;;  %18947 = vst [vmem:[#allocation42_spill] sm:$0xff] %v17469_v8 }
 0x30e   : > { %14361 = vmatprep.subr.bf16.mxu1 %v16208_v0  ;;  %11105 = vmatprep.mubr.msk.f32.mxu0 %vm16209_vm0, %v18904_v20 }
 0x30f   : > { %11315 = vmatprep.mubr.msk.f32.mxu1 %vm16209_vm0, %v18904_v20 }
 0x310   : > { %14219 = vmatpush3.bf16.msra.mxu0 %v16485_v12 }
 0x311   : > { %14363 = vmatpush3.bf16.msra.mxu1 %v18939_v62  ;;  %14220 = vmatprep.subr.bf16.mxu0 %v16208_v0 }
 0x312   : > { %14364 = vmatprep.subr.bf16.mxu1 %v16208_v0 }
 0x314   : > { %14222 = vmatpush3.bf16.msra.mxu0 %v16493_v18 }
 0x315   : > { %14366 = vmatpush3.bf16.msra.mxu1 %v18940_v3  ;;  %14223 = vmatprep.subr.bf16.mxu0 %v16208_v0 }
 0x316   : > { %14367 = vmatprep.subr.bf16.mxu1 %v16208_v0 }
 0x318   : > { %14225 = vmatpush3.bf16.msra.mxu0 %v16501_v24 }
 0x319   : > { %14369 = vmatpush3.bf16.msra.mxu1 %v16989_v46  ;;  %14226 = vmatprep.subr.bf16.mxu0 %v16208_v0 }
 0x31a   : > { %14370 = vmatprep.subr.bf16.mxu1 %v16208_v0 }
 0x31c   : > { %14228 = vmatpush3.bf16.msra.mxu0 %v16509_v30 }
 0x31d   : > { %14372 = vmatpush3.bf16.msra.mxu1 %v16997_v17  ;;  %14229 = vmatprep.subr.bf16.mxu0 %v16208_v0 }
 0x31e   : > { %14373 = vmatprep.subr.bf16.mxu1 %v16208_v0 }
 0x320   : > { %14231 = vmatpush3.bf16.msra.mxu0 %v16517_v36 }
 0x321   : > { %14375 = vmatpush3.bf16.msra.mxu1 %v17005_v10  ;;  %14232 = vmatprep.subr.bf16.mxu0 %v16208_v0 }
 0x322   : > { %14376 = vmatprep.subr.bf16.mxu1 %v16208_v0 }
 0x324   : > { %14234 = vmatpush3.bf16.msra.mxu0 %v16525_v42 }
 0x325   : > { %14378 = vmatpush3.bf16.msra.mxu1 %v17015_v21  ;;  %14235 = vmatprep.subr.bf16.mxu0 %v16208_v0 }
 0x326   : > { %14379 = vmatprep.subr.bf16.mxu1 %v16208_v0 }
 0x328   : > { %14237 = vmatpush3.bf16.msra.mxu0 %v16533_v48 }
 0x329   : > { %14381 = vmatpush3.bf16.msra.mxu1 %v17023_v47  ;;  %14238 = vmatprep.subr.bf16.mxu0 %v16208_v0 }
 0x32a   : > { %14382 = vmatprep.subr.bf16.mxu1 %v16208_v0 }
 0x32b   : > { %11106 = vmatmul.mubr.f32.vlgmr.msra.gmra.mrb[6].mxu0 %v17469_v8 }
 0x32c   : > { %14240 = vmatpush3.bf16.msra.mxu0 %v18948_v26  ;;  %11316 = vmatmul.mubr.f32.vlgmr.msra.gmra.mrb[6].mxu1 %v17387_v1  ;;  %v18950_v1 = vld [vmem:[#allocation26_spill] sm:$0xff] }
 0x32d   : > { %14384 = vmatpush3.bf16.msra.mxu1 %v16482_v9  ;;  %14241 = vmatprep.subr.bf16.mxu0 %v16208_v0  ;;  %v18951_v9 = vld [vmem:[#allocation27_spill] sm:$0xff] }
 0x32e   : > { %14385 = vmatprep.subr.bf16.mxu1 %v16208_v0  ;;  %11140 = vmatprep.mubr.msk.f32.mxu0 %vm16209_vm0, %v18904_v20 }
 0x32f   : > { %11350 = vmatprep.mubr.msk.f32.mxu1 %vm16209_vm0, %v18904_v20 }
 0x330   : > { %14243 = vmatpush3.bf16.msra.mxu0 %v18949_v41 }
 0x331   : > { %14387 = vmatpush3.bf16.msra.mxu1 %v16489_v13  ;;  %14244 = vmatprep.subr.bf16.mxu0 %v16208_v0  ;;  %v18952_v13 = vld [vmem:[#allocation28_spill] sm:$0xff] }
 0x332   : > { %14388 = vmatprep.subr.bf16.mxu1 %v16208_v0 }
 0x334   : > { %14246 = vmatpush3.bf16.msra.mxu0 %v18950_v1 }
 0x335   : > { %14390 = vmatpush3.bf16.msra.mxu1 %v16497_v19  ;;  %14247 = vmatprep.subr.bf16.mxu0 %v16208_v0  ;;  %v18953_v19 = vld [vmem:[#allocation29_spill] sm:$0xff] }
 0x336   : > { %14391 = vmatprep.subr.bf16.mxu1 %v16208_v0 }
 0x338   : > { %14249 = vmatpush3.bf16.msra.mxu0 %v18951_v9 }
 0x339   : > { %14393 = vmatpush3.bf16.msra.mxu1 %v16505_v25  ;;  %14250 = vmatprep.subr.bf16.mxu0 %v16208_v0  ;;  %v18954_v25 = vld [vmem:[#allocation30_spill] sm:$0xff] }
 0x33a   : > { %14394 = vmatprep.subr.bf16.mxu1 %v16208_v0 }
 0x33c   : > { %14252 = vmatpush3.bf16.msra.mxu0 %v18952_v13 }
 0x33d   : > { %14396 = vmatpush3.bf16.msra.mxu1 %v16513_v31  ;;  %14253 = vmatprep.subr.bf16.mxu0 %v16208_v0  ;;  %v18955_v31 = vld [vmem:[#allocation31_spill] sm:$0xff] }
 0x33e   : > { %14397 = vmatprep.subr.bf16.mxu1 %v16208_v0 }
 0x340   : > { %14255 = vmatpush3.bf16.msra.mxu0 %v18953_v19  ;;  %v18957_v19 = vld [vmem:[#allocation32_spill] sm:$0xff] }
 0x341   : > { %14399 = vmatpush3.bf16.msra.mxu1 %v16521_v37  ;;  %14256 = vmatprep.subr.bf16.mxu0 %v16208_v0  ;;  %v17510_v37 = vld [vmem:[%s16460_s20 + $0x38] sm:$0xff] }
 0x342   : > { %14400 = vmatprep.subr.bf16.mxu1 %v16208_v0  ;;  %18956 = vst [vmem:[#allocation44_spill] sm:$0xff] %v17510_v37 }
 0x344   : > { %14258 = vmatpush3.bf16.msra.mxu0 %v18954_v25  ;;  %v18961_v25 = vld [vmem:[#allocation36_spill] sm:$0xff] }
 0x345   : > { %14402 = vmatpush3.bf16.msra.mxu1 %v16529_v43  ;;  %14259 = vmatprep.subr.bf16.mxu0 %v16208_v0  ;;  %v18960_v43 = vld [vmem:[#allocation35_spill] sm:$0xff] }
 0x346   : > { %14403 = vmatprep.subr.bf16.mxu1 %v16208_v0 }
 0x348   : > { %14261 = vmatpush3.bf16.msra.mxu0 %v18955_v31  ;;  %v18959_v31 = vld [vmem:[#allocation34_spill] sm:$0xff] }
 0x349   : > { %14405 = vmatpush3.bf16.msra.mxu1 %v16537_v49  ;;  %14262 = vmatprep.subr.bf16.mxu0 %v16208_v0  ;;  %v18958_v49 = vld [vmem:[#allocation33_spill] sm:$0xff] }
 0x34a   : > { %14406 = vmatprep.subr.bf16.mxu1 %v16208_v0 }
 0x34b   : > { %11141 = vmatmul.mubr.f32.vlgmr.msra.gmra.mrb[6].mxu0 %v17510_v37 }
 0x34c   : > { %14264 = vmatpush3.bf16.msra.mxu0 %v18957_v19  ;;  %11351 = vmatmul.mubr.f32.vlgmr.msra.gmra.mrb[6].mxu1 %v17469_v8 }
 0x34d   : > { %14408 = vmatpush3.bf16.msra.mxu1 %v16480_v5  ;;  %14265 = vmatprep.subr.bf16.mxu0 %v16208_v0 }
 0x34e   : > { %14409 = vmatprep.subr.bf16.mxu1 %v16208_v0  ;;  %11175 = vmatprep.mubr.msk.f32.mxu0 %vm16209_vm0, %v18904_v20 }
 0x34f   : > { %11385 = vmatprep.mubr.msk.f32.mxu1 %vm16209_vm0, %v18904_v20 }
 0x350   : > { %14267 = vmatpush3.bf16.msra.mxu0 %v18958_v49 }
 0x351   : > { %14411 = vmatpush3.bf16.msra.mxu1 %v16485_v12  ;;  %14268 = vmatprep.subr.bf16.mxu0 %v16208_v0 }
 0x352   : > { %14412 = vmatprep.subr.bf16.mxu1 %v16208_v0 }
 0x354   : > { %14270 = vmatpush3.bf16.msra.mxu0 %v18959_v31 }
 0x355   : > { %14414 = vmatpush3.bf16.msra.mxu1 %v16493_v18  ;;  %14271 = vmatprep.subr.bf16.mxu0 %v16208_v0 }
 0x356   : > { %14415 = vmatprep.subr.bf16.mxu1 %v16208_v0 }
 0x358   : > { %14273 = vmatpush3.bf16.msra.mxu0 %v18960_v43 }
 0x359   : > { %14417 = vmatpush3.bf16.msra.mxu1 %v16501_v24  ;;  %14274 = vmatprep.subr.bf16.mxu0 %v16208_v0 }
 0x35a   : > { %14418 = vmatprep.subr.bf16.mxu1 %v16208_v0 }
 0x35c   : > { %14276 = vmatpush3.bf16.msra.mxu0 %v18961_v25 }
 0x35d   : > { %14420 = vmatpush3.bf16.msra.mxu1 %v16509_v30  ;;  %14277 = vmatprep.subr.bf16.mxu0 %v16208_v0 }
 0x35e   : > { %v2360_v13 = vpop.f32.mrb[4].mxu0  ;;  %14421 = vmatprep.subr.bf16.mxu1 %v16208_v0 }
 0x35f   : > { %v15730_v9 = vadd.f32 %v17115_v52, %v2360_v13  ;;  %v10617_v1 = vpop.f32.mrb[5].mxu0 }
 0x360   : > { %14279 = vmatpush3.bf16.msra.mxu0 %v18933_v59 }
 0x361   : > { %v2365_v41 = vmax.f32 %v15730_v9, 0.0  ;;  %14423 = vmatpush3.bf16.msra.mxu1 %v16517_v36  ;;  %14280 = vmatprep.subr.bf16.mxu0 %v16208_v0  ;;  %v17628_v9 = vld [vmem:[%s16460_s20 + $0x58] sm:$0xff] }
 0x362   : > { %14424 = vmatprep.subr.bf16.mxu1 %v16208_v0  ;;  %18962 = vst [vmem:[#allocation46_spill] sm:$0xff] %v17628_v9 }
 0x363   : > { %v17544_v8 = vadd.f32 %v2365_v41, %v17295_v16 }
 0x364   : > { %14282 = vmatpush3.bf16.msra.mxu0 %v18935_v7 }
 0x365   : > { %14426 = vmatpush3.bf16.msra.mxu1 %v16525_v42  ;;  %14283 = vmatprep.subr.bf16.mxu0 %v16208_v0 }
 0x366   : > { %14427 = vmatprep.subr.bf16.mxu1 %v16208_v0 }
 0x368   : > { %14285 = vmatpush3.bf16.msra.mxu0 %v18937_v61 }
 0x369   : > { %14429 = vmatpush3.bf16.msra.mxu1 %v16533_v48  ;;  %14286 = vmatprep.subr.bf16.mxu0 %v16208_v0 }
 0x36a   : > { %14430 = vmatprep.subr.bf16.mxu1 %v16208_v0 }
 0x36b   : > { %11176 = vmatmul.mubr.f32.vlgmr.msra.gmra.mrb[6].mxu0 %v17256_v6 }
 0x36c   : > { %14288 = vmatpush3.bf16.msra.mxu0 %v16597_v22  ;;  %11386 = vmatmul.mubr.f32.vlgmr.msra.gmra.mrb[6].mxu1 %v17510_v37  ;;  %v18970_v37 = vld [vmem:[#allocation61_spill] sm:$0xff] }
 0x36d   : > { %14432 = vmatpush3.bf16.msra.mxu1 %v18957_v19  ;;  %14289 = vmatprep.subr.bf16.mxu0 %v16208_v0 }
 0x36e   : > { %14433 = vmatprep.subr.bf16.mxu1 %v16208_v0  ;;  %11210 = vmatprep.mubr.msk.f32.mxu0 %vm16209_vm0, %v18904_v20 }
 0x36f   : > { %11420 = vmatprep.mubr.msk.f32.mxu1 %vm16209_vm0, %v18904_v20 }
 0x370   : > { %14291 = vmatpush3.bf16.msra.mxu0 %v16605_v27 }
 0x371   : > { %14435 = vmatpush3.bf16.msra.mxu1 %v18958_v49  ;;  %14292 = vmatprep.subr.bf16.mxu0 %v16208_v0 }
 0x372   : > { %14436 = vmatprep.subr.bf16.mxu1 %v16208_v0 }
 0x374   : > { %14294 = vmatpush3.bf16.msra.mxu0 %v16615_v32 }
 0x375   : > { %14438 = vmatpush3.bf16.msra.mxu1 %v18959_v31  ;;  %14295 = vmatprep.subr.bf16.mxu0 %v16208_v0 }
 0x376   : > { %14439 = vmatprep.subr.bf16.mxu1 %v16208_v0 }
 0x378   : > { %14297 = vmatpush3.bf16.msra.mxu0 %v16621_v35 }
 0x379   : > { %14441 = vmatpush3.bf16.msra.mxu1 %v18960_v43  ;;  %14298 = vmatprep.subr.bf16.mxu0 %v16208_v0 }
 0x37a   : > { %14442 = vmatprep.subr.bf16.mxu1 %v16208_v0 }
 0x37c   : > { %14300 = vmatpush3.bf16.msra.mxu0 %v16627_v40 }
 0x37d   : > { %14444 = vmatpush3.bf16.msra.mxu1 %v18961_v25  ;;  %14301 = vmatprep.subr.bf16.mxu0 %v16208_v0 }
 0x37e   : > { %14445 = vmatprep.subr.bf16.mxu1 %v16208_v0 }
 0x380   : > { %14303 = vmatpush3.bf16.msra.mxu0 %v16633_v45 }
 0x381   : > { %14447 = vmatpush3.bf16.msra.mxu1 %v18933_v59  ;;  %14304 = vmatprep.subr.bf16.mxu0 %v16208_v0 }
 0x382   : > { %14448 = vmatprep.subr.bf16.mxu1 %v16208_v0 }
 0x384   : > { %14306 = vmatpush3.bf16.msra.mxu0 %v16639_v50 }
 0x385   : > { %14450 = vmatpush3.bf16.msra.mxu1 %v18935_v7  ;;  %14307 = vmatprep.subr.bf16.mxu0 %v16208_v0 }
 0x386   : > { %14451 = vmatprep.subr.bf16.mxu1 %v16208_v0 }
 0x388   : > { %14309 = vmatpush3.bf16.msra.mxu0 %v16645_v54 }
 0x389   : > { %14453 = vmatpush3.bf16.msra.mxu1 %v18937_v61  ;;  %14310 = vmatprep.subr.bf16.mxu0 %v16208_v0 }
 0x38a   : > { %14454 = vmatprep.subr.bf16.mxu1 %v16208_v0 }
 0x38b   : > { %11211 = vmatmul.mubr.f32.vlgmr.msra.gmra.mrb[6].mxu0 %v17382_v51 }
 0x38c   : > { %14312 = vmatpush3.bf16.msra.mxu0 %v16654_v63  ;;  %11421 = vmatmul.mubr.f32.vlgmr.msra.gmra.mrb[6].mxu1 %v17382_v51 }
 0x38d   : > { %14456 = vmatpush3.bf16.msra.mxu1 %v16597_v22  ;;  %14313 = vmatprep.subr.bf16.mxu0 %v16208_v0 }
 0x38e   : > { %14457 = vmatprep.subr.bf16.mxu1 %v16208_v0  ;;  %11245 = vmatprep.mubr.msk.f32.mxu0 %vm16209_vm0, %v18904_v20 }
 0x38f   : > { %11455 = vmatprep.mubr.msk.f32.mxu1 %vm16209_vm0, %v18904_v20 }
 0x390   : > { %14315 = vmatpush3.bf16.msra.mxu0 %v16667_v15 }
 0x391   : > { %14459 = vmatpush3.bf16.msra.mxu1 %v16605_v27  ;;  %14316 = vmatprep.subr.bf16.mxu0 %v16208_v0 }
 0x392   : > { %14460 = vmatprep.subr.bf16.mxu1 %v16208_v0 }
 0x394   : > { %14318 = vmatpush3.bf16.msra.mxu0 %v16679_v29 }
 0x395   : > { %14462 = vmatpush3.bf16.msra.mxu1 %v16615_v32  ;;  %14319 = vmatprep.subr.bf16.mxu0 %v16208_v0 }
 0x396   : > { %14463 = vmatprep.subr.bf16.mxu1 %v16208_v0 }
 0x398   : > { %14321 = vmatpush3.bf16.msra.mxu0 %v16687_v44 }
 0x399   : > { %14465 = vmatpush3.bf16.msra.mxu1 %v16621_v35  ;;  %14322 = vmatprep.subr.bf16.mxu0 %v16208_v0 }
 0x39a   : > { %14466 = vmatprep.subr.bf16.mxu1 %v16208_v0 }
 0x39c   : > { %14324 = vmatpush3.bf16.msra.mxu0 %v16695_v57 }
 0x39d   : > { %14468 = vmatpush3.bf16.msra.mxu1 %v16627_v40  ;;  %14325 = vmatprep.subr.bf16.mxu0 %v16208_v0 }
 0x39e   : > { %14469 = vmatprep.subr.bf16.mxu1 %v16208_v0 }
 0x3a0   : > { %14327 = vmatpush3.bf16.msra.mxu0 %v16703_v14 }
 0x3a1   : > { %14471 = vmatpush3.bf16.msra.mxu1 %v16633_v45  ;;  %14328 = vmatprep.subr.bf16.mxu0 %v16208_v0 }
 0x3a2   : > { %14472 = vmatprep.subr.bf16.mxu1 %v16208_v0 }
 0x3a4   : > { %14330 = vmatpush3.bf16.msra.mxu0 %v16711_v38 }
 0x3a5   : > { %14474 = vmatpush3.bf16.msra.mxu1 %v16639_v50  ;;  %14331 = vmatprep.subr.bf16.mxu0 %v16208_v0 }
 0x3a6   : > { %14475 = vmatprep.subr.bf16.mxu1 %v16208_v0 }
 0x3a8   : > { %14333 = vmatpush3.bf16.msra.mxu0 %v16719_v55 }
 0x3a9   : > { %14477 = vmatpush3.bf16.msra.mxu1 %v16645_v54  ;;  %14478 = vmatprep.subr.bf16.mxu0 %v16208_v0 }
 0x3aa   : > { %14622 = vmatprep.subr.bf16.mxu1 %v16208_v0 }
 0x3ab   : > { %11246 = vmatmul.mubr.f32.vlgmr.msra.gmra.mrb[6].mxu0 %v17628_v9 }
 0x3ac   : > { %11456 = vmatmul.mubr.f32.vlgmr.msra.gmra.mrb[6].mxu1 %v17628_v9  ;;  %14480 = vmatpush3.bf16.msra.mxu0 %v18938_v56 }
 0x3ad   : > { %14624 = vmatpush3.bf16.msra.mxu1 %v18923_v28  ;;  %14481 = vmatprep.subr.bf16.mxu0 %v16208_v0 }
 0x3ae   : > { %14625 = vmatprep.subr.bf16.mxu1 %v16208_v0  ;;  %11490 = vmatprep.mubr.msk.f32.mxu0 %vm16209_vm0, %v18904_v20 }
 0x3af   : > { %11700 = vmatprep.mubr.msk.f32.mxu1 %vm16209_vm0, %v18904_v20 }
 0x3b0   : > { %14483 = vmatpush3.bf16.msra.mxu0 %v18939_v62 }
 0x3b1   : > { %14627 = vmatpush3.bf16.msra.mxu1 %v18925_v4  ;;  %14484 = vmatprep.subr.bf16.mxu0 %v16208_v0 }
 0x3b2   : > { %14628 = vmatprep.subr.bf16.mxu1 %v16208_v0 }
 0x3b4   : > { %14486 = vmatpush3.bf16.msra.mxu0 %v18940_v3 }
 0x3b5   : > { %14630 = vmatpush3.bf16.msra.mxu1 %v18927_v23  ;;  %14487 = vmatprep.subr.bf16.mxu0 %v16208_v0 }
 0x3b6   : > { %14631 = vmatprep.subr.bf16.mxu1 %v16208_v0 }
 0x3b8   : > { %14489 = vmatpush3.bf16.msra.mxu0 %v16989_v46 }
 0x3b9   : > { %14633 = vmatpush3.bf16.msra.mxu1 %v18929_v39  ;;  %14490 = vmatprep.subr.bf16.mxu0 %v16208_v0 }
 0x3ba   : > { %14634 = vmatprep.subr.bf16.mxu1 %v16208_v0 }
 0x3bc   : > { %14492 = vmatpush3.bf16.msra.mxu0 %v16997_v17 }
 0x3bd   : > { %14636 = vmatpush3.bf16.msra.mxu1 %v18931_v58  ;;  %14493 = vmatprep.subr.bf16.mxu0 %v16208_v0 }
 0x3be   : > { %14637 = vmatprep.subr.bf16.mxu1 %v16208_v0 }
 0x3bf   : > { %v3002_v13 = vpop.f32.mrb[4].mxu1 }
 0x3c0   : > { %v15731_v41 = vadd.f32 %v17115_v52, %v3002_v13  ;;  %v10932_v16 = vpop.f32.mrb[5].mxu1  ;;  %14495 = vmatpush3.bf16.msra.mxu0 %v17005_v10  ;;  %v18963_v52 = vld [vmem:[#allocation60_spill] sm:$0xff] }
 0x3c1   : > { %14639 = vmatpush3.bf16.msra.mxu1 %v17009_v33  ;;  %14496 = vmatprep.subr.bf16.mxu0 %v16208_v0  ;;  %v18965_v13 = vld [vmem:[#allocation56_spill] sm:$0xff]  ;;  %v18967_v16 = vld [vmem:[#allocation58_spill] sm:$0xff] }
 0x3c2   : > { %v3007_v1 = vmax.f32 %v15731_v41, 0.0  ;;  %14640 = vmatprep.subr.bf16.mxu1 %v16208_v0  ;;  %v18966_v41 = vld [vmem:[#allocation57_spill] sm:$0xff] }
 0x3c4   : > { %v17665_v9 = vadd.f32 %v3007_v1, %v17544_v8  ;;  %14498 = vmatpush3.bf16.msra.mxu0 %v17015_v21  ;;  %v18964_v8 = vld [vmem:[#allocation53_spill] sm:$0xff]  ;;  %v18968_v1 = vld [vmem:[#allocation59_spill] sm:$0xff] }
 0x3c5   : > { %14642 = vmatpush3.bf16.msra.mxu1 %v18934_v53  ;;  %14499 = vmatprep.subr.bf16.mxu0 %v16208_v0 }
 0x3c6   : > { %14643 = vmatprep.subr.bf16.mxu1 %v16208_v0 }
 0x3c8   : > { %14501 = vmatpush3.bf16.msra.mxu0 %v17023_v47 }
 0x3c9   : > { %14645 = vmatpush3.bf16.msra.mxu1 %v18936_v11  ;;  %14502 = vmatprep.subr.bf16.mxu0 %v16208_v0 }
 0x3ca   : > { %14646 = vmatprep.subr.bf16.mxu1 %v16208_v0 }
 0x3cb   : > { %11491 = vmatmul.mubr.f32.vlgmr.msra.gmra.mrb[8].mxu0 %v18963_v52 }
 0x3cc   : > { %14504 = vmatpush3.bf16.msra.mxu0 %v18941_v34  ;;  %11701 = vmatmul.mubr.f32.vlgmr.msra.gmra.mrb[8].mxu1 %v18963_v52  ;;  %v18969_v52 = vld [vmem:[#allocation40_spill] sm:$0xff] }
 0x3cd   : > { %14648 = vmatpush3.bf16.msra.mxu1 %v18938_v56  ;;  %14505 = vmatprep.subr.bf16.mxu0 %v16208_v0 }
 0x3ce   : > { %14649 = vmatprep.subr.bf16.mxu1 %v16208_v0  ;;  %11525 = vmatprep.mubr.msk.f32.mxu0 %vm16209_vm0, %v18904_v20 }
 0x3cf   : > { %11735 = vmatprep.mubr.msk.f32.mxu1 %vm16209_vm0, %v18904_v20 }
 0x3d0   : > { %14507 = vmatpush3.bf16.msra.mxu0 %v18964_v8 }
 0x3d1   : > { %14651 = vmatpush3.bf16.msra.mxu1 %v18939_v62  ;;  %14508 = vmatprep.subr.bf16.mxu0 %v16208_v0 }
 0x3d2   : > { %14652 = vmatprep.subr.bf16.mxu1 %v16208_v0 }
 0x3d4   : > { %14510 = vmatpush3.bf16.msra.mxu0 %v18943_v60 }
 0x3d5   : > { %14654 = vmatpush3.bf16.msra.mxu1 %v18940_v3  ;;  %14511 = vmatprep.subr.bf16.mxu0 %v16208_v0 }
 0x3d6   : > { %14655 = vmatprep.subr.bf16.mxu1 %v16208_v0 }
 0x3d8   : > { %14513 = vmatpush3.bf16.msra.mxu0 %v18944_v2 }
 0x3d9   : > { %14657 = vmatpush3.bf16.msra.mxu1 %v16989_v46  ;;  %14514 = vmatprep.subr.bf16.mxu0 %v16208_v0 }
 0x3da   : > { %14658 = vmatprep.subr.bf16.mxu1 %v16208_v0 }
 0x3dc   : > { %14516 = vmatpush3.bf16.msra.mxu0 %v18965_v13 }
 0x3dd   : > { %14660 = vmatpush3.bf16.msra.mxu1 %v16997_v17  ;;  %14517 = vmatprep.subr.bf16.mxu0 %v16208_v0 }
 0x3de   : > { %14661 = vmatprep.subr.bf16.mxu1 %v16208_v0 }
 0x3e0   : > { %14519 = vmatpush3.bf16.msra.mxu0 %v18966_v41 }
 0x3e1   : > { %14663 = vmatpush3.bf16.msra.mxu1 %v17005_v10  ;;  %14520 = vmatprep.subr.bf16.mxu0 %v16208_v0 }
 0x3e2   : > { %14664 = vmatprep.subr.bf16.mxu1 %v16208_v0 }
 0x3e4   : > { %14522 = vmatpush3.bf16.msra.mxu0 %v18967_v16 }
 0x3e5   : > { %14666 = vmatpush3.bf16.msra.mxu1 %v17015_v21  ;;  %14523 = vmatprep.subr.bf16.mxu0 %v16208_v0 }
 0x3e6   : > { %14667 = vmatprep.subr.bf16.mxu1 %v16208_v0 }
 0x3e8   : > { %14525 = vmatpush3.bf16.msra.mxu0 %v18968_v1 }
 0x3e9   : > { %14669 = vmatpush3.bf16.msra.mxu1 %v17023_v47  ;;  %14526 = vmatprep.subr.bf16.mxu0 %v16208_v0  ;;  %v18986_v47 = vld [vmem:[#allocation23_spill] sm:$0xff] }
 0x3ea   : > { %14670 = vmatprep.subr.bf16.mxu1 %v16208_v0 }
 0x3eb   : > { %11526 = vmatmul.mubr.f32.vlgmr.msra.gmra.mrb[8].mxu0 %v18969_v52 }
 0x3ec   : > { %14528 = vmatpush3.bf16.msra.mxu0 %v16480_v5  ;;  %11736 = vmatmul.mubr.f32.vlgmr.msra.gmra.mrb[8].mxu1 %v18969_v52 }
 0x3ed   : > { %14672 = vmatpush3.bf16.msra.mxu1 %v18941_v34  ;;  %14529 = vmatprep.subr.bf16.mxu0 %v16208_v0  ;;  %v18982_v34 = vld [vmem:[#allocation21_spill] sm:$0xff] }
 0x3ee   : > { %14673 = vmatprep.subr.bf16.mxu1 %v16208_v0  ;;  %11560 = vmatprep.mubr.msk.f32.mxu0 %vm16209_vm0, %v18904_v20 }
 0x3ef   : > { %11770 = vmatprep.mubr.msk.f32.mxu1 %vm16209_vm0, %v18904_v20 }
 0x3f0   : > { %14531 = vmatpush3.bf16.msra.mxu0 %v16485_v12 }
 0x3f1   : > { %14675 = vmatpush3.bf16.msra.mxu1 %v18964_v8  ;;  %14532 = vmatprep.subr.bf16.mxu0 %v16208_v0  ;;  %v18980_v8 = vld [vmem:[#allocation20_spill] sm:$0xff] }
 0x3f2   : > { %14676 = vmatprep.subr.bf16.mxu1 %v16208_v0 }
 0x3f4   : > { %14534 = vmatpush3.bf16.msra.mxu0 %v16493_v18 }
 0x3f5   : > { %14678 = vmatpush3.bf16.msra.mxu1 %v18943_v60  ;;  %14535 = vmatprep.subr.bf16.mxu0 %v16208_v0  ;;  %v18978_v60 = vld [vmem:[#allocation19_spill] sm:$0xff] }
 0x3f6   : > { %14679 = vmatprep.subr.bf16.mxu1 %v16208_v0 }
 0x3f8   : > { %14537 = vmatpush3.bf16.msra.mxu0 %v16501_v24 }
 0x3f9   : > { %14681 = vmatpush3.bf16.msra.mxu1 %v18944_v2  ;;  %14538 = vmatprep.subr.bf16.mxu0 %v16208_v0  ;;  %v18977_v2 = vld [vmem:[#allocation27_spill] sm:$0xff] }
 0x3fa   : > { %14682 = vmatprep.subr.bf16.mxu1 %v16208_v0 }
 0x3fc   : > { %14540 = vmatpush3.bf16.msra.mxu0 %v16509_v30 }
 0x3fd   : > { %14684 = vmatpush3.bf16.msra.mxu1 %v18965_v13  ;;  %14541 = vmatprep.subr.bf16.mxu0 %v16208_v0  ;;  %v18972_v13 = vld [vmem:[#allocation16_spill] sm:$0xff] }
 0x3fe   : > { %14685 = vmatprep.subr.bf16.mxu1 %v16208_v0 }
 0x400   : > { %14543 = vmatpush3.bf16.msra.mxu0 %v16517_v36 }
 0x401   : > { %14687 = vmatpush3.bf16.msra.mxu1 %v18966_v41  ;;  %14544 = vmatprep.subr.bf16.mxu0 %v16208_v0  ;;  %v18971_v41 = vld [vmem:[#allocation42_spill] sm:$0xff] }
 0x402   : > { %14688 = vmatprep.subr.bf16.mxu1 %v16208_v0 }
 0x404   : > { %14546 = vmatpush3.bf16.msra.mxu0 %v16525_v42 }
 0x405   : > { %14690 = vmatpush3.bf16.msra.mxu1 %v18967_v16  ;;  %14547 = vmatprep.subr.bf16.mxu0 %v16208_v0  ;;  %v18974_v16 = vld [vmem:[#allocation17_spill] sm:$0xff] }
 0x406   : > { %14691 = vmatprep.subr.bf16.mxu1 %v16208_v0 }
 0x408   : > { %14549 = vmatpush3.bf16.msra.mxu0 %v16533_v48 }
 0x409   : > { %14693 = vmatpush3.bf16.msra.mxu1 %v18968_v1  ;;  %14550 = vmatprep.subr.bf16.mxu0 %v16208_v0  ;;  %v18973_v1 = vld [vmem:[#allocation25_spill] sm:$0xff] }
 0x40a   : > { %14694 = vmatprep.subr.bf16.mxu1 %v16208_v0 }
 0x40b   : > { %11561 = vmatmul.mubr.f32.vlgmr.msra.gmra.mrb[8].mxu0 %v18970_v37  ;;  %v18975_v37 = vld [vmem:[#allocation26_spill] sm:$0xff] }
 0x40c   : > { %14552 = vmatpush3.bf16.msra.mxu0 %v18948_v26  ;;  %11771 = vmatmul.mubr.f32.vlgmr.msra.gmra.mrb[8].mxu1 %v18971_v41  ;;  %v18984_v41 = vld [vmem:[#allocation22_spill] sm:$0xff] }
 0x40d   : > { %14696 = vmatpush3.bf16.msra.mxu1 %v18972_v13  ;;  %14553 = vmatprep.subr.bf16.mxu0 %v16208_v0  ;;  %v18976_v13 = vld [vmem:[#allocation18_spill] sm:$0xff] }
 0x40e   : > { %14697 = vmatprep.subr.bf16.mxu1 %v16208_v0  ;;  %11595 = vmatprep.mubr.msk.f32.mxu0 %vm16209_vm0, %v18904_v20 }
 0x40f   : > { %11805 = vmatprep.mubr.msk.f32.mxu1 %vm16209_vm0, %v18904_v20 }
 0x410   : > { %14555 = vmatpush3.bf16.msra.mxu0 %v18973_v1 }
 0x411   : > { %14699 = vmatpush3.bf16.msra.mxu1 %v18974_v16  ;;  %14556 = vmatprep.subr.bf16.mxu0 %v16208_v0  ;;  %v18979_v16 = vld [vmem:[#allocation28_spill] sm:$0xff] }
 0x412   : > { %14700 = vmatprep.subr.bf16.mxu1 %v16208_v0 }
 0x414   : > { %14558 = vmatpush3.bf16.msra.mxu0 %v18975_v37 }
 0x415   : > { %14702 = vmatpush3.bf16.msra.mxu1 %v18976_v13  ;;  %14559 = vmatprep.subr.bf16.mxu0 %v16208_v0  ;;  %v18981_v13 = vld [vmem:[#allocation29_spill] sm:$0xff] }
 0x416   : > { %14703 = vmatprep.subr.bf16.mxu1 %v16208_v0 }
 0x418   : > { %14561 = vmatpush3.bf16.msra.mxu0 %v18977_v2 }
 0x419   : > { %14705 = vmatpush3.bf16.msra.mxu1 %v18978_v60  ;;  %14562 = vmatprep.subr.bf16.mxu0 %v16208_v0  ;;  %v18983_v60 = vld [vmem:[#allocation30_spill] sm:$0xff] }
 0x41a   : > { %14706 = vmatprep.subr.bf16.mxu1 %v16208_v0 }
 0x41c   : > { %14564 = vmatpush3.bf16.msra.mxu0 %v18979_v16 }
 0x41d   : > { %14708 = vmatpush3.bf16.msra.mxu1 %v18980_v8  ;;  %14565 = vmatprep.subr.bf16.mxu0 %v16208_v0  ;;  %v18985_v8 = vld [vmem:[#allocation31_spill] sm:$0xff] }
 0x41e   : > { %14709 = vmatprep.subr.bf16.mxu1 %v16208_v0 }
 0x420   : > { %14567 = vmatpush3.bf16.msra.mxu0 %v18981_v13 }
 0x421   : > { %14711 = vmatpush3.bf16.msra.mxu1 %v18982_v34  ;;  %14568 = vmatprep.subr.bf16.mxu0 %v16208_v0  ;;  %v17792_v34 = vld [vmem:[%s16460_s20 + $0x40] sm:$0xff] }
 0x422   : > { %14712 = vmatprep.subr.bf16.mxu1 %v16208_v0  ;;  %18987 = vst [vmem:[#allocation47_spill] sm:$0xff] %v17792_v34 }
 0x424   : > { %14570 = vmatpush3.bf16.msra.mxu0 %v18983_v60 }
 0x425   : > { %14714 = vmatpush3.bf16.msra.mxu1 %v18984_v41  ;;  %14571 = vmatprep.subr.bf16.mxu0 %v16208_v0 }
 0x426   : > { %14715 = vmatprep.subr.bf16.mxu1 %v16208_v0 }
 0x428   : > { %14573 = vmatpush3.bf16.msra.mxu0 %v18985_v8 }
 0x429   : > { %14717 = vmatpush3.bf16.msra.mxu1 %v18986_v47  ;;  %14574 = vmatprep.subr.bf16.mxu0 %v16208_v0 }
 0x42a   : > { %14718 = vmatprep.subr.bf16.mxu1 %v16208_v0 }
 0x42b   : > { %11596 = vmatmul.mubr.f32.vlgmr.msra.gmra.mrb[8].mxu0 %v17256_v6  ;;  %v17828_v6 = vld [vmem:[%s16460_s20 + $0x60] sm:$0xff] }
 0x42c   : > { %14576 = vmatpush3.bf16.msra.mxu0 %v16597_v22  ;;  %11806 = vmatmul.mubr.f32.vlgmr.msra.gmra.mrb[8].mxu1 %v17792_v34  ;;  %18988 = vst [vmem:[#allocation48_spill] sm:$0xff] %v17828_v6  ;;  %v17836_v34 = vld [vmem:[%s16460_s20 + $0x48] sm:$0xff] }
 0x42d   : > { %14720 = vmatpush3.bf16.msra.mxu1 %v16480_v5  ;;  %14577 = vmatprep.subr.bf16.mxu0 %v16208_v0  ;;  %18989 = vst [vmem:[#allocation37_spill] sm:$0xff] %v17836_v34 }
 0x42e   : > { %14721 = vmatprep.subr.bf16.mxu1 %v16208_v0  ;;  %11630 = vmatprep.mubr.msk.f32.mxu0 %vm16209_vm0, %v18904_v20 }
 0x42f   : > { %11840 = vmatprep.mubr.msk.f32.mxu1 %vm16209_vm0, %v18904_v20 }
 0x430   : > { %14579 = vmatpush3.bf16.msra.mxu0 %v16605_v27 }
 0x431   : > { %14723 = vmatpush3.bf16.msra.mxu1 %v16485_v12  ;;  %14580 = vmatprep.subr.bf16.mxu0 %v16208_v0 }
 0x432   : > { %14724 = vmatprep.subr.bf16.mxu1 %v16208_v0 }
 0x434   : > { %14582 = vmatpush3.bf16.msra.mxu0 %v16615_v32 }
 0x435   : > { %14726 = vmatpush3.bf16.msra.mxu1 %v16493_v18  ;;  %14583 = vmatprep.subr.bf16.mxu0 %v16208_v0 }
 0x436   : > { %14727 = vmatprep.subr.bf16.mxu1 %v16208_v0 }
 0x438   : > { %14585 = vmatpush3.bf16.msra.mxu0 %v16621_v35 }
 0x439   : > { %14729 = vmatpush3.bf16.msra.mxu1 %v16501_v24  ;;  %14586 = vmatprep.subr.bf16.mxu0 %v16208_v0 }
 0x43a   : > { %14730 = vmatprep.subr.bf16.mxu1 %v16208_v0 }
 0x43c   : > { %14588 = vmatpush3.bf16.msra.mxu0 %v16627_v40 }
 0x43d   : > { %14732 = vmatpush3.bf16.msra.mxu1 %v16509_v30  ;;  %14589 = vmatprep.subr.bf16.mxu0 %v16208_v0 }
 0x43e   : > { %14733 = vmatprep.subr.bf16.mxu1 %v16208_v0 }
 0x440   : > { %14591 = vmatpush3.bf16.msra.mxu0 %v16633_v45 }
 0x441   : > { %14735 = vmatpush3.bf16.msra.mxu1 %v16517_v36  ;;  %14592 = vmatprep.subr.bf16.mxu0 %v16208_v0 }
 0x442   : > { %14736 = vmatprep.subr.bf16.mxu1 %v16208_v0 }
 0x444   : > { %14594 = vmatpush3.bf16.msra.mxu0 %v16639_v50 }
 0x445   : > { %14738 = vmatpush3.bf16.msra.mxu1 %v16525_v42  ;;  %14595 = vmatprep.subr.bf16.mxu0 %v16208_v0 }
 0x446   : > { %14739 = vmatprep.subr.bf16.mxu1 %v16208_v0 }
 0x448   : > { %14597 = vmatpush3.bf16.msra.mxu0 %v16645_v54 }
 0x449   : > { %14741 = vmatpush3.bf16.msra.mxu1 %v16533_v48  ;;  %14598 = vmatprep.subr.bf16.mxu0 %v16208_v0 }
 0x44a   : > { %14742 = vmatprep.subr.bf16.mxu1 %v16208_v0 }
 0x44b   : > { %11631 = vmatmul.mubr.f32.vlgmr.msra.gmra.mrb[8].mxu0 %v17828_v6 }
 0x44c   : > { %14600 = vmatpush3.bf16.msra.mxu0 %v16654_v63  ;;  %11841 = vmatmul.mubr.f32.vlgmr.msra.gmra.mrb[8].mxu1 %v17836_v34 }
 0x44d   : > { %14744 = vmatpush3.bf16.msra.mxu1 %v18948_v26  ;;  %14601 = vmatprep.subr.bf16.mxu0 %v16208_v0 }
 0x44e   : > { %14745 = vmatprep.subr.bf16.mxu1 %v16208_v0  ;;  %11665 = vmatprep.mubr.msk.f32.mxu0 %vm16209_vm0, %v18904_v20 }
 0x44f   : > { %11875 = vmatprep.mubr.msk.f32.mxu1 %vm16209_vm0, %v18904_v20 }
 0x450   : > { %14603 = vmatpush3.bf16.msra.mxu0 %v16667_v15 }
 0x451   : > { %14747 = vmatpush3.bf16.msra.mxu1 %v18973_v1  ;;  %14604 = vmatprep.subr.bf16.mxu0 %v16208_v0 }
 0x452   : > { %14748 = vmatprep.subr.bf16.mxu1 %v16208_v0 }
 0x454   : > { %14606 = vmatpush3.bf16.msra.mxu0 %v16679_v29 }
 0x455   : > { %14750 = vmatpush3.bf16.msra.mxu1 %v18975_v37  ;;  %14607 = vmatprep.subr.bf16.mxu0 %v16208_v0 }
 0x456   : > { %14751 = vmatprep.subr.bf16.mxu1 %v16208_v0 }
 0x458   : > { %14609 = vmatpush3.bf16.msra.mxu0 %v16687_v44 }
 0x459   : > { %14753 = vmatpush3.bf16.msra.mxu1 %v18977_v2  ;;  %14610 = vmatprep.subr.bf16.mxu0 %v16208_v0 }
 0x45a   : > { %14754 = vmatprep.subr.bf16.mxu1 %v16208_v0 }
 0x45c   : > { %14612 = vmatpush3.bf16.msra.mxu0 %v16695_v57 }
 0x45d   : > { %14756 = vmatpush3.bf16.msra.mxu1 %v18979_v16  ;;  %14613 = vmatprep.subr.bf16.mxu0 %v16208_v0  ;;  %v17872_v16 = vld [vmem:[%s16460_s20 + $0x68] sm:$0xff] }
 0x45e   : > { %14757 = vmatprep.subr.bf16.mxu1 %v16208_v0 }
 0x460   : > { %14615 = vmatpush3.bf16.msra.mxu0 %v16703_v14 }
 0x461   : > { %14759 = vmatpush3.bf16.msra.mxu1 %v18981_v13  ;;  %14616 = vmatprep.subr.bf16.mxu0 %v16208_v0 }
 0x462   : > { %14760 = vmatprep.subr.bf16.mxu1 %v16208_v0 }
 0x464   : > { %14618 = vmatpush3.bf16.msra.mxu0 %v16711_v38 }
 0x465   : > { %14762 = vmatpush3.bf16.msra.mxu1 %v18983_v60  ;;  %14619 = vmatprep.subr.bf16.mxu0 %v16208_v0 }
 0x466   : > { %14763 = vmatprep.subr.bf16.mxu1 %v16208_v0 }
 0x468   : > { %14621 = vmatpush3.bf16.msra.mxu0 %v16719_v55 }
 0x469   : > { %14765 = vmatpush3.bf16.msra.mxu1 %v18985_v8  ;;  %14838 = vmatprep.subr.bf16.mxu0 %v16208_v0 }
 0x46a   : > { %14766 = vmatprep.subr.bf16.mxu1 %v16208_v0 }
 0x46b   : > { %11666 = vmatmul.mubr.f32.vlgmr.msra.gmra.mrb[8].mxu0 %v17872_v16 }
 0x46c   : > { %11876 = vmatmul.mubr.f32.vlgmr.msra.gmra.mrb[8].mxu1 %v17382_v51  ;;  %14840 = vmatpush3.bf16.msra.mxu0 %v18923_v28 }
 0x46d   : > { %14768 = vmatpush3.bf16.msra.mxu1 %v18957_v19  ;;  %14841 = vmatprep.subr.bf16.mxu0 %v16208_v0 }
 0x46e   : > { %14769 = vmatprep.subr.bf16.mxu1 %v16208_v0  ;;  %11910 = vmatprep.mubr.msk.f32.mxu1 %vm16209_vm0, %v18904_v20 }
 0x46f   : > { %12015 = vmatprep.mubr.msk.f32.mxu0 %vm16209_vm0, %v18904_v20 }
 0x470   : > { %14843 = vmatpush3.bf16.msra.mxu0 %v18925_v4 }
 0x471   : > { %14771 = vmatpush3.bf16.msra.mxu1 %v18958_v49  ;;  %14844 = vmatprep.subr.bf16.mxu0 %v16208_v0 }
 0x472   : > { %14772 = vmatprep.subr.bf16.mxu1 %v16208_v0 }
 0x474   : > { %14846 = vmatpush3.bf16.msra.mxu0 %v18927_v23 }
 0x475   : > { %14774 = vmatpush3.bf16.msra.mxu1 %v18959_v31  ;;  %14847 = vmatprep.subr.bf16.mxu0 %v16208_v0  ;;  %v17906_v31 = vld [vmem:[%s18718_s2] ss:$0 sm:$0xff] }
 0x476   : > { %14775 = vmatprep.subr.bf16.mxu1 %v16208_v0 }
 0x478   : > { %14849 = vmatpush3.bf16.msra.mxu0 %v18929_v39 }
 0x479   : > { %14777 = vmatpush3.bf16.msra.mxu1 %v18960_v43  ;;  %14850 = vmatprep.subr.bf16.mxu0 %v16208_v0 }
 0x47a   : > { %14778 = vmatprep.subr.bf16.mxu1 %v16208_v0 }
 0x47c   : > { %14852 = vmatpush3.bf16.msra.mxu0 %v18931_v58 }
 0x47d   : > { %14780 = vmatpush3.bf16.msra.mxu1 %v18961_v25  ;;  %14853 = vmatprep.subr.bf16.mxu0 %v16208_v0 }
 0x47e   : > { %v3644_v51 = vpop.f32.mrb[6].mxu0  ;;  %14781 = vmatprep.subr.bf16.mxu1 %v16208_v0 }
 0x47f   : > { %v15732_v43 = vadd.f32 %v17906_v31, %v3644_v51  ;;  %v4072_v49 = vpop.f32.mrb[6].mxu1  ;;  %v11247_v19 = vpop.f32.mrb[7].mxu0 }
 0x480   : > { %v15733_v8 = vadd.f32 %v17906_v31, %v4072_v49  ;;  %v11457_v60 = vpop.f32.mrb[7].mxu1  ;;  %14855 = vmatpush3.bf16.msra.mxu0 %v17009_v33  ;;  %v18990_v19 = vld [vmem:[#allocation50_spill] sm:$0xff]  ;;  %v18993_v49 = vld [vmem:[#allocation53_spill] sm:$0xff] }
 0x481   : > { %v3649_v25 = vmax.f32 %v15732_v43, 0.0  ;;  %14783 = vmatpush3.bf16.msra.mxu1 %v18933_v59  ;;  %14856 = vmatprep.subr.bf16.mxu0 %v16208_v0  ;;  %v18992_v43 = vld [vmem:[#allocation52_spill] sm:$0xff]  ;;  %v18995_v60 = vld [vmem:[#allocation55_spill] sm:$0xff] }
 0x482   : > { %14784 = vmatprep.subr.bf16.mxu1 %v16208_v0  ;;  %v4077_v2 = vmax.f32 %v15733_v8, 0.0  ;;  %v18997_v8 = vld [vmem:[#allocation57_spill] sm:$0xff] }
 0x483   : > { %v3650_v13 = vadd.f32 %v3649_v25, %v17665_v9  ;;  %v18991_v25 = vld [vmem:[#allocation42_spill] sm:$0xff]  ;;  %v18996_v9 = vld [vmem:[#allocation56_spill] sm:$0xff] }
 0x484   : > { %14858 = vmatpush3.bf16.msra.mxu0 %v18934_v53 }
 0x485   : > { %v17916_v51 = vadd.f32 %v4077_v2, %v3650_v13  ;;  %14786 = vmatpush3.bf16.msra.mxu1 %v18935_v7  ;;  %14859 = vmatprep.subr.bf16.mxu0 %v16208_v0  ;;  %v18994_v2 = vld [vmem:[#allocation54_spill] sm:$0xff] }
 0x486   : > { %14787 = vmatprep.subr.bf16.mxu1 %v16208_v0  ;;  %v18998_v13 = vld [vmem:[#allocation58_spill] sm:$0xff] }
 0x488   : > { %14861 = vmatpush3.bf16.msra.mxu0 %v18936_v11 }
 0x489   : > { %14789 = vmatpush3.bf16.msra.mxu1 %v18937_v61  ;;  %14862 = vmatprep.subr.bf16.mxu0 %v16208_v0 }
 0x48a   : > { %14790 = vmatprep.subr.bf16.mxu1 %v16208_v0 }
 0x48b   : > { %12016 = vmatmul.mubr.f32.vlgmr.msra.gmra.mrb[10].mxu0 %v18969_v52  ;;  %v18999_v52 = vld [vmem:[#allocation59_spill] sm:$0xff] }
 0x48c   : > { %11911 = vmatmul.mubr.f32.vlgmr.msra.gmra.mrb[8].mxu1 %v17828_v6  ;;  %14864 = vmatpush3.bf16.msra.mxu0 %v18938_v56  ;;  %v19000_v6 = vld [vmem:[#allocation44_spill] sm:$0xff] }
 0x48d   : > { %14792 = vmatpush3.bf16.msra.mxu1 %v16597_v22  ;;  %14865 = vmatprep.subr.bf16.mxu0 %v16208_v0 }
 0x48e   : > { %14793 = vmatprep.subr.bf16.mxu1 %v16208_v0  ;;  %11945 = vmatprep.mubr.msk.f32.mxu1 %vm16209_vm0, %v18904_v20 }
 0x48f   : > { %12050 = vmatprep.mubr.msk.f32.mxu0 %vm16209_vm0, %v18904_v20 }
 0x490   : > { %14867 = vmatpush3.bf16.msra.mxu0 %v18939_v62 }
 0x491   : > { %14795 = vmatpush3.bf16.msra.mxu1 %v16605_v27  ;;  %14868 = vmatprep.subr.bf16.mxu0 %v16208_v0 }
 0x492   : > { %14796 = vmatprep.subr.bf16.mxu1 %v16208_v0 }
 0x494   : > { %14870 = vmatpush3.bf16.msra.mxu0 %v18940_v3 }
 0x495   : > { %14798 = vmatpush3.bf16.msra.mxu1 %v16615_v32  ;;  %14871 = vmatprep.subr.bf16.mxu0 %v16208_v0 }
 0x496   : > { %14799 = vmatprep.subr.bf16.mxu1 %v16208_v0 }
 0x498   : > { %14873 = vmatpush3.bf16.msra.mxu0 %v16989_v46 }
 0x499   : > { %14801 = vmatpush3.bf16.msra.mxu1 %v16621_v35  ;;  %14874 = vmatprep.subr.bf16.mxu0 %v16208_v0 }
 0x49a   : > { %14802 = vmatprep.subr.bf16.mxu1 %v16208_v0 }
 0x49c   : > { %14876 = vmatpush3.bf16.msra.mxu0 %v16997_v17 }
 0x49d   : > { %14804 = vmatpush3.bf16.msra.mxu1 %v16627_v40  ;;  %14877 = vmatprep.subr.bf16.mxu0 %v16208_v0 }
 0x49e   : > { %14805 = vmatprep.subr.bf16.mxu1 %v16208_v0 }
 0x4a0   : > { %14879 = vmatpush3.bf16.msra.mxu0 %v17005_v10 }
 0x4a1   : > { %14807 = vmatpush3.bf16.msra.mxu1 %v16633_v45  ;;  %14880 = vmatprep.subr.bf16.mxu0 %v16208_v0 }
 0x4a2   : > { %14808 = vmatprep.subr.bf16.mxu1 %v16208_v0 }
 0x4a4   : > { %14882 = vmatpush3.bf16.msra.mxu0 %v17015_v21 }
 0x4a5   : > { %14810 = vmatpush3.bf16.msra.mxu1 %v16639_v50  ;;  %14883 = vmatprep.subr.bf16.mxu0 %v16208_v0 }
 0x4a6   : > { %14811 = vmatprep.subr.bf16.mxu1 %v16208_v0 }
 0x4a8   : > { %14885 = vmatpush3.bf16.msra.mxu0 %v18990_v19 }
 0x4a9   : > { %14813 = vmatpush3.bf16.msra.mxu1 %v16645_v54  ;;  %14886 = vmatprep.subr.bf16.mxu0 %v16208_v0 }
 0x4aa   : > { %14814 = vmatprep.subr.bf16.mxu1 %v16208_v0 }
 0x4ab   : > { %12051 = vmatmul.mubr.f32.vlgmr.msra.gmra.mrb[10].mxu0 %v18991_v25  ;;  %v18000_v25 = vld [vmem:[%s16460_s20 + $0x70] sm:$0xff] }
 0x4ac   : > { %11946 = vmatmul.mubr.f32.vlgmr.msra.gmra.mrb[8].mxu1 %v17872_v16  ;;  %14888 = vmatpush3.bf16.msra.mxu0 %v18992_v43 }
 0x4ad   : > { %14816 = vmatpush3.bf16.msra.mxu1 %v16654_v63  ;;  %14889 = vmatprep.subr.bf16.mxu0 %v16208_v0 }
 0x4ae   : > { %14817 = vmatprep.subr.bf16.mxu1 %v16208_v0  ;;  %11980 = vmatprep.mubr.msk.f32.mxu1 %vm16209_vm0, %v18904_v20 }
 0x4af   : > { %12085 = vmatprep.mubr.msk.f32.mxu0 %vm16209_vm0, %v18904_v20 }
 0x4b0   : > { %14891 = vmatpush3.bf16.msra.mxu0 %v18993_v49 }
 0x4b1   : > { %14819 = vmatpush3.bf16.msra.mxu1 %v16667_v15  ;;  %14892 = vmatprep.subr.bf16.mxu0 %v16208_v0 }
 0x4b2   : > { %14820 = vmatprep.subr.bf16.mxu1 %v16208_v0 }
 0x4b4   : > { %14894 = vmatpush3.bf16.msra.mxu0 %v18994_v2  ;;  %v16003_v2 = vld [vmem:[%s16460_s20 + $0x30] sm:$0xff] }
 0x4b5   : > { %14822 = vmatpush3.bf16.msra.mxu1 %v16679_v29  ;;  %14895 = vmatprep.subr.bf16.mxu0 %v16208_v0 }
 0x4b6   : > { %14823 = vmatprep.subr.bf16.mxu1 %v16208_v0 }
 0x4b8   : > { %14897 = vmatpush3.bf16.msra.mxu0 %v18995_v60  ;;  %v19006_v60 = vld [vmem:[#allocation21_spill] sm:$0xff] }
 0x4b9   : > { %14825 = vmatpush3.bf16.msra.mxu1 %v16687_v44  ;;  %14898 = vmatprep.subr.bf16.mxu0 %v16208_v0 }
 0x4ba   : > { %14826 = vmatprep.subr.bf16.mxu1 %v16208_v0 }
 0x4bc   : > { %14900 = vmatpush3.bf16.msra.mxu0 %v18996_v9  ;;  %v19005_v9 = vld [vmem:[#allocation20_spill] sm:$0xff] }
 0x4bd   : > { %14828 = vmatpush3.bf16.msra.mxu1 %v16695_v57  ;;  %14901 = vmatprep.subr.bf16.mxu0 %v16208_v0 }
 0x4be   : > { %14829 = vmatprep.subr.bf16.mxu1 %v16208_v0 }
 0x4c0   : > { %14903 = vmatpush3.bf16.msra.mxu0 %v18997_v8  ;;  %v19004_v8 = vld [vmem:[#allocation19_spill] sm:$0xff] }
 0x4c1   : > { %14831 = vmatpush3.bf16.msra.mxu1 %v16703_v14  ;;  %14904 = vmatprep.subr.bf16.mxu0 %v16208_v0 }
 0x4c2   : > { %14832 = vmatprep.subr.bf16.mxu1 %v16208_v0 }
 0x4c4   : > { %14906 = vmatpush3.bf16.msra.mxu0 %v18998_v13  ;;  %v19001_v13 = vld [vmem:[#allocation16_spill] sm:$0xff] }
 0x4c5   : > { %14834 = vmatpush3.bf16.msra.mxu1 %v16711_v38  ;;  %14907 = vmatprep.subr.bf16.mxu0 %v16208_v0 }
 0x4c6   : > { %14835 = vmatprep.subr.bf16.mxu1 %v16208_v0 }
 0x4c8   : > { %14909 = vmatpush3.bf16.msra.mxu0 %v18999_v52  ;;  %v19002_v52 = vld [vmem:[#allocation17_spill] sm:$0xff] }
 0x4c9   : > { %14837 = vmatpush3.bf16.msra.mxu1 %v16719_v55  ;;  %14910 = vmatprep.subr.bf16.mxu0 %v16208_v0 }
 0x4ca   : > { %15054 = vmatprep.subr.bf16.mxu1 %v16208_v0 }
 0x4cb   : > { %12086 = vmatmul.mubr.f32.vlgmr.msra.gmra.mrb[10].mxu0 %v19000_v6  ;;  %v19003_v6 = vld [vmem:[#allocation18_spill] sm:$0xff] }
 0x4cc   : > { %11981 = vmatmul.mubr.f32.vlgmr.msra.gmra.mrb[8].mxu1 %v18000_v25  ;;  %14912 = vmatpush3.bf16.msra.mxu0 %v19001_v13 }
 0x4cd   : > { %15056 = vmatpush3.bf16.msra.mxu1 %v18923_v28  ;;  %14913 = vmatprep.subr.bf16.mxu0 %v16208_v0 }
 0x4ce   : > { %15057 = vmatprep.subr.bf16.mxu1 %v16208_v0  ;;  %12120 = vmatprep.mubr.msk.f32.mxu0 %vm16209_vm0, %v18904_v20 }
 0x4cf   : > { %12330 = vmatprep.mubr.msk.f32.mxu1 %vm16209_vm0, %v18904_v20 }
 0x4d0   : > { %14915 = vmatpush3.bf16.msra.mxu0 %v19002_v52 }
 0x4d1   : > { %15059 = vmatpush3.bf16.msra.mxu1 %v18925_v4  ;;  %14916 = vmatprep.subr.bf16.mxu0 %v16208_v0 }
 0x4d2   : > { %15060 = vmatprep.subr.bf16.mxu1 %v16208_v0 }
 0x4d4   : > { %14918 = vmatpush3.bf16.msra.mxu0 %v19003_v6 }
 0x4d5   : > { %15062 = vmatpush3.bf16.msra.mxu1 %v18927_v23  ;;  %14919 = vmatprep.subr.bf16.mxu0 %v16208_v0 }
 0x4d6   : > { %15063 = vmatprep.subr.bf16.mxu1 %v16208_v0 }
 0x4d8   : > { %14921 = vmatpush3.bf16.msra.mxu0 %v19004_v8 }
 0x4d9   : > { %15065 = vmatpush3.bf16.msra.mxu1 %v18929_v39  ;;  %14922 = vmatprep.subr.bf16.mxu0 %v16208_v0 }
 0x4da   : > { %15066 = vmatprep.subr.bf16.mxu1 %v16208_v0 }
 0x4dc   : > { %14924 = vmatpush3.bf16.msra.mxu0 %v19005_v9 }
 0x4dd   : > { %15068 = vmatpush3.bf16.msra.mxu1 %v18931_v58  ;;  %14925 = vmatprep.subr.bf16.mxu0 %v16208_v0 }
 0x4de   : > { %15069 = vmatprep.subr.bf16.mxu1 %v16208_v0 }
 0x4e0   : > { %14927 = vmatpush3.bf16.msra.mxu0 %v19006_v60 }
 0x4e1   : > { %15071 = vmatpush3.bf16.msra.mxu1 %v17009_v33  ;;  %14928 = vmatprep.subr.bf16.mxu0 %v16208_v0 }
 0x4e2   : > { %15072 = vmatprep.subr.bf16.mxu1 %v16208_v0 }
 0x4e4   : > { %14930 = vmatpush3.bf16.msra.mxu0 %v18984_v41 }
 0x4e5   : > { %15074 = vmatpush3.bf16.msra.mxu1 %v18934_v53  ;;  %14931 = vmatprep.subr.bf16.mxu0 %v16208_v0 }
 0x4e6   : > { %15075 = vmatprep.subr.bf16.mxu1 %v16208_v0 }
 0x4e8   : > { %14933 = vmatpush3.bf16.msra.mxu0 %v18986_v47 }
 0x4e9   : > { %15077 = vmatpush3.bf16.msra.mxu1 %v18936_v11  ;;  %14934 = vmatprep.subr.bf16.mxu0 %v16208_v0 }
 0x4ea   : > { %15078 = vmatprep.subr.bf16.mxu1 %v16208_v0 }
 0x4eb   : > { %12121 = vmatmul.mubr.f32.vlgmr.msra.gmra.mrb[10].mxu0 %v17836_v34  ;;  %v16005_v34 = vld [vmem:[%s16460_s20 + $0x38] sm:$0xff] }
 0x4ec   : > { %14936 = vmatpush3.bf16.msra.mxu0 %v16480_v5  ;;  %12331 = vmatmul.mubr.f32.vlgmr.msra.gmra.mrb[10].mxu1 %v16003_v2  ;;  %v18081_v2 = vld [vmem:[%s16460_s20 + $0x50] sm:$0xff] }
 0x4ed   : > { %15080 = vmatpush3.bf16.msra.mxu1 %v18938_v56  ;;  %14937 = vmatprep.subr.bf16.mxu0 %v16208_v0 }
 0x4ee   : > { %15081 = vmatprep.subr.bf16.mxu1 %v16208_v0  ;;  %12155 = vmatprep.mubr.msk.f32.mxu0 %vm16209_vm0, %v18904_v20 }
 0x4ef   : > { %12365 = vmatprep.mubr.msk.f32.mxu1 %vm16209_vm0, %v18904_v20 }
 0x4f0   : > { %14939 = vmatpush3.bf16.msra.mxu0 %v16485_v12 }
 0x4f1   : > { %15083 = vmatpush3.bf16.msra.mxu1 %v18939_v62  ;;  %14940 = vmatprep.subr.bf16.mxu0 %v16208_v0 }
 0x4f2   : > { %15084 = vmatprep.subr.bf16.mxu1 %v16208_v0 }
 0x4f4   : > { %14942 = vmatpush3.bf16.msra.mxu0 %v16493_v18 }
 0x4f5   : > { %15086 = vmatpush3.bf16.msra.mxu1 %v18940_v3  ;;  %14943 = vmatprep.subr.bf16.mxu0 %v16208_v0 }
 0x4f6   : > { %15087 = vmatprep.subr.bf16.mxu1 %v16208_v0 }
 0x4f8   : > { %14945 = vmatpush3.bf16.msra.mxu0 %v16501_v24 }
 0x4f9   : > { %15089 = vmatpush3.bf16.msra.mxu1 %v16989_v46  ;;  %14946 = vmatprep.subr.bf16.mxu0 %v16208_v0 }
 0x4fa   : > { %15090 = vmatprep.subr.bf16.mxu1 %v16208_v0 }
 0x4fc   : > { %14948 = vmatpush3.bf16.msra.mxu0 %v16509_v30 }
 0x4fd   : > { %15092 = vmatpush3.bf16.msra.mxu1 %v16997_v17  ;;  %14949 = vmatprep.subr.bf16.mxu0 %v16208_v0 }
 0x4fe   : > { %15093 = vmatprep.subr.bf16.mxu1 %v16208_v0 }
 0x500   : > { %14951 = vmatpush3.bf16.msra.mxu0 %v16517_v36 }
 0x501   : > { %15095 = vmatpush3.bf16.msra.mxu1 %v17005_v10  ;;  %14952 = vmatprep.subr.bf16.mxu0 %v16208_v0 }
 0x502   : > { %15096 = vmatprep.subr.bf16.mxu1 %v16208_v0 }
 0x504   : > { %14954 = vmatpush3.bf16.msra.mxu0 %v16525_v42 }
 0x505   : > { %15098 = vmatpush3.bf16.msra.mxu1 %v17015_v21  ;;  %14955 = vmatprep.subr.bf16.mxu0 %v16208_v0 }
 0x506   : > { %15099 = vmatprep.subr.bf16.mxu1 %v16208_v0 }
 0x508   : > { %14957 = vmatpush3.bf16.msra.mxu0 %v16533_v48 }
 0x509   : > { %15101 = vmatpush3.bf16.msra.mxu1 %v18990_v19  ;;  %14958 = vmatprep.subr.bf16.mxu0 %v16208_v0 }
 0x50a   : > { %15102 = vmatprep.subr.bf16.mxu1 %v16208_v0 }
 0x50b   : > { %12156 = vmatmul.mubr.f32.vlgmr.msra.gmra.mrb[10].mxu0 %v18081_v2 }
 0x50c   : > { %14960 = vmatpush3.bf16.msra.mxu0 %v18948_v26  ;;  %12366 = vmatmul.mubr.f32.vlgmr.msra.gmra.mrb[10].mxu1 %v16005_v34  ;;  %v19007_v34 = vld [vmem:[#allocation27_spill] sm:$0xff] }
 0x50d   : > { %15104 = vmatpush3.bf16.msra.mxu1 %v19001_v13  ;;  %14961 = vmatprep.subr.bf16.mxu0 %v16208_v0 }
 0x50e   : > { %15105 = vmatprep.subr.bf16.mxu1 %v16208_v0  ;;  %12190 = vmatprep.mubr.msk.f32.mxu0 %vm16209_vm0, %v18904_v20 }
 0x50f   : > { %12400 = vmatprep.mubr.msk.f32.mxu1 %vm16209_vm0, %v18904_v20 }
 0x510   : > { %14963 = vmatpush3.bf16.msra.mxu0 %v18973_v1 }
 0x511   : > { %15107 = vmatpush3.bf16.msra.mxu1 %v19002_v52  ;;  %14964 = vmatprep.subr.bf16.mxu0 %v16208_v0  ;;  %v19008_v52 = vld [vmem:[#allocation28_spill] sm:$0xff] }
 0x512   : > { %15108 = vmatprep.subr.bf16.mxu1 %v16208_v0 }
 0x514   : > { %14966 = vmatpush3.bf16.msra.mxu0 %v18975_v37 }
 0x515   : > { %15110 = vmatpush3.bf16.msra.mxu1 %v19003_v6  ;;  %14967 = vmatprep.subr.bf16.mxu0 %v16208_v0  ;;  %v19009_v6 = vld [vmem:[#allocation29_spill] sm:$0xff] }
 0x516   : > { %15111 = vmatprep.subr.bf16.mxu1 %v16208_v0 }
 0x518   : > { %14969 = vmatpush3.bf16.msra.mxu0 %v19007_v34 }
 0x519   : > { %15113 = vmatpush3.bf16.msra.mxu1 %v19004_v8  ;;  %14970 = vmatprep.subr.bf16.mxu0 %v16208_v0  ;;  %v19010_v8 = vld [vmem:[#allocation30_spill] sm:$0xff] }
 0x51a   : > { %15114 = vmatprep.subr.bf16.mxu1 %v16208_v0 }
 0x51c   : > { %14972 = vmatpush3.bf16.msra.mxu0 %v19008_v52 }
 0x51d   : > { %15116 = vmatpush3.bf16.msra.mxu1 %v19005_v9  ;;  %14973 = vmatprep.subr.bf16.mxu0 %v16208_v0  ;;  %v19011_v9 = vld [vmem:[#allocation31_spill] sm:$0xff] }
 0x51e   : > { %15117 = vmatprep.subr.bf16.mxu1 %v16208_v0 }
 0x520   : > { %14975 = vmatpush3.bf16.msra.mxu0 %v19009_v6  ;;  %v19013_v6 = vld [vmem:[#allocation32_spill] sm:$0xff] }
 0x521   : > { %15119 = vmatpush3.bf16.msra.mxu1 %v19006_v60  ;;  %14976 = vmatprep.subr.bf16.mxu0 %v16208_v0  ;;  %v19012_v60 = vld [vmem:[#allocation46_spill] sm:$0xff] }
 0x522   : > { %15120 = vmatprep.subr.bf16.mxu1 %v16208_v0 }
 0x524   : > { %14978 = vmatpush3.bf16.msra.mxu0 %v19010_v8  ;;  %v19017_v8 = vld [vmem:[#allocation36_spill] sm:$0xff] }
 0x525   : > { %15122 = vmatpush3.bf16.msra.mxu1 %v18984_v41  ;;  %14979 = vmatprep.subr.bf16.mxu0 %v16208_v0  ;;  %v19016_v41 = vld [vmem:[#allocation35_spill] sm:$0xff] }
 0x526   : > { %15123 = vmatprep.subr.bf16.mxu1 %v16208_v0 }
 0x528   : > { %14981 = vmatpush3.bf16.msra.mxu0 %v19011_v9  ;;  %v19015_v9 = vld [vmem:[#allocation34_spill] sm:$0xff] }
 0x529   : > { %15125 = vmatpush3.bf16.msra.mxu1 %v18986_v47  ;;  %14982 = vmatprep.subr.bf16.mxu0 %v16208_v0  ;;  %v19014_v47 = vld [vmem:[#allocation33_spill] sm:$0xff] }
 0x52a   : > { %15126 = vmatprep.subr.bf16.mxu1 %v16208_v0 }
 0x52b   : > { %12191 = vmatmul.mubr.f32.vlgmr.msra.gmra.mrb[10].mxu0 %v19012_v60 }
 0x52c   : > { %14984 = vmatpush3.bf16.msra.mxu0 %v19013_v6  ;;  %12401 = vmatmul.mubr.f32.vlgmr.msra.gmra.mrb[10].mxu1 %v18081_v2 }
 0x52d   : > { %15128 = vmatpush3.bf16.msra.mxu1 %v16480_v5  ;;  %14985 = vmatprep.subr.bf16.mxu0 %v16208_v0 }
 0x52e   : > { %15129 = vmatprep.subr.bf16.mxu1 %v16208_v0  ;;  %12225 = vmatprep.mubr.msk.f32.mxu0 %vm16209_vm0, %v18904_v20 }
 0x52f   : > { %12435 = vmatprep.mubr.msk.f32.mxu1 %vm16209_vm0, %v18904_v20 }
 0x530   : > { %14987 = vmatpush3.bf16.msra.mxu0 %v19014_v47 }
 0x531   : > { %15131 = vmatpush3.bf16.msra.mxu1 %v16485_v12  ;;  %14988 = vmatprep.subr.bf16.mxu0 %v16208_v0 }
 0x532   : > { %15132 = vmatprep.subr.bf16.mxu1 %v16208_v0 }
 0x534   : > { %14990 = vmatpush3.bf16.msra.mxu0 %v19015_v9 }
 0x535   : > { %15134 = vmatpush3.bf16.msra.mxu1 %v16493_v18  ;;  %14991 = vmatprep.subr.bf16.mxu0 %v16208_v0 }
 0x536   : > { %15135 = vmatprep.subr.bf16.mxu1 %v16208_v0 }
 0x538   : > { %14993 = vmatpush3.bf16.msra.mxu0 %v19016_v41 }
 0x539   : > { %15137 = vmatpush3.bf16.msra.mxu1 %v16501_v24  ;;  %14994 = vmatprep.subr.bf16.mxu0 %v16208_v0 }
 0x53a   : > { %15138 = vmatprep.subr.bf16.mxu1 %v16208_v0 }
 0x53c   : > { %14996 = vmatpush3.bf16.msra.mxu0 %v19017_v8 }
 0x53d   : > { %15140 = vmatpush3.bf16.msra.mxu1 %v16509_v30  ;;  %14997 = vmatprep.subr.bf16.mxu0 %v16208_v0 }
 0x53e   : > { %v4502_v52 = vpop.f32.mrb[8].mxu0  ;;  %15141 = vmatprep.subr.bf16.mxu1 %v16208_v0 }
 0x53f   : > { %v15734_v34 = vadd.f32 %v17906_v31, %v4502_v52  ;;  %v11667_v37 = vpop.f32.mrb[9].mxu0  ;;  %v19041_v52 = vld [vmem:[#allocation23_spill] sm:$0xff] }
 0x540   : > { %14999 = vmatpush3.bf16.msra.mxu0 %v18933_v59  ;;  %v19035_v37 = vld [vmem:[#allocation20_spill] sm:$0xff] }
 0x541   : > { %v4507_v1 = vmax.f32 %v15734_v34, 0.0  ;;  %15143 = vmatpush3.bf16.msra.mxu1 %v16517_v36  ;;  %15000 = vmatprep.subr.bf16.mxu0 %v16208_v0  ;;  %v18438_v34 = vld [vmem:[%s16460_s20 + $0x68] sm:$0xff] }
 0x542   : > { %15144 = vmatprep.subr.bf16.mxu1 %v16208_v0 }
 0x543   : > { %v18153_v13 = vadd.f32 %v4507_v1, %v17916_v51  ;;  %v19034_v1 = vld [vmem:[#allocation28_spill] sm:$0xff]  ;;  %v19036_v51 = vld [vmem:[#allocation29_spill] sm:$0xff] }
 0x544   : > { %15002 = vmatpush3.bf16.msra.mxu0 %v18935_v7 }
 0x545   : > { %15146 = vmatpush3.bf16.msra.mxu1 %v16525_v42  ;;  %15003 = vmatprep.subr.bf16.mxu0 %v16208_v0 }
 0x546   : > { %15147 = vmatprep.subr.bf16.mxu1 %v16208_v0 }
 0x548   : > { %15005 = vmatpush3.bf16.msra.mxu0 %v18937_v61 }
 0x549   : > { %15149 = vmatpush3.bf16.msra.mxu1 %v16533_v48  ;;  %15006 = vmatprep.subr.bf16.mxu0 %v16208_v0 }
 0x54a   : > { %15150 = vmatprep.subr.bf16.mxu1 %v16208_v0 }
 0x54b   : > { %12226 = vmatmul.mubr.f32.vlgmr.msra.gmra.mrb[10].mxu0 %v17872_v16 }
 0x54c   : > { %15008 = vmatpush3.bf16.msra.mxu0 %v16597_v22  ;;  %12436 = vmatmul.mubr.f32.vlgmr.msra.gmra.mrb[10].mxu1 %v19012_v60  ;;  %v19037_v60 = vld [vmem:[#allocation21_spill] sm:$0xff] }
 0x54d   : > { %15152 = vmatpush3.bf16.msra.mxu1 %v19013_v6  ;;  %15009 = vmatprep.subr.bf16.mxu0 %v16208_v0  ;;  %v16006_v6 = vld [vmem:[%s16460_s20 + $0x60] sm:$0xff] }
 0x54e   : > { %15153 = vmatprep.subr.bf16.mxu1 %v16208_v0  ;;  %12260 = vmatprep.mubr.msk.f32.mxu0 %vm16209_vm0, %v18904_v20 }
 0x54f   : > { %12470 = vmatprep.mubr.msk.f32.mxu1 %vm16209_vm0, %v18904_v20 }
 0x550   : > { %15011 = vmatpush3.bf16.msra.mxu0 %v16605_v27 }
 0x551   : > { %15155 = vmatpush3.bf16.msra.mxu1 %v19014_v47  ;;  %15012 = vmatprep.subr.bf16.mxu0 %v16208_v0  ;;  %v19030_v47 = vld [vmem:[#allocation26_spill] sm:$0xff] }
 0x552   : > { %15156 = vmatprep.subr.bf16.mxu1 %v16208_v0 }
 0x554   : > { %15014 = vmatpush3.bf16.msra.mxu0 %v16615_v32 }
 0x555   : > { %15158 = vmatpush3.bf16.msra.mxu1 %v19015_v9  ;;  %15015 = vmatprep.subr.bf16.mxu0 %v16208_v0  ;;  %v19038_v9 = vld [vmem:[#allocation30_spill] sm:$0xff] }
 0x556   : > { %15159 = vmatprep.subr.bf16.mxu1 %v16208_v0 }
 0x558   : > { %15017 = vmatpush3.bf16.msra.mxu0 %v16621_v35 }
 0x559   : > { %15161 = vmatpush3.bf16.msra.mxu1 %v19016_v41  ;;  %15018 = vmatprep.subr.bf16.mxu0 %v16208_v0  ;;  %v19033_v41 = vld [vmem:[#allocation19_spill] sm:$0xff] }
 0x55a   : > { %15162 = vmatprep.subr.bf16.mxu1 %v16208_v0 }
 0x55c   : > { %15020 = vmatpush3.bf16.msra.mxu0 %v16627_v40 }
 0x55d   : > { %15164 = vmatpush3.bf16.msra.mxu1 %v19017_v8  ;;  %15021 = vmatprep.subr.bf16.mxu0 %v16208_v0  ;;  %v19039_v8 = vld [vmem:[#allocation22_spill] sm:$0xff] }
 0x55e   : > { %15165 = vmatprep.subr.bf16.mxu1 %v16208_v0 }
 0x560   : > { %15023 = vmatpush3.bf16.msra.mxu0 %v16633_v45 }
 0x561   : > { %15167 = vmatpush3.bf16.msra.mxu1 %v18933_v59  ;;  %15024 = vmatprep.subr.bf16.mxu0 %v16208_v0  ;;  %v18237_v59 = vld [vmem:[%s16460_s20 + $0x78] sm:$0xff] }
 0x562   : > { %15168 = vmatprep.subr.bf16.mxu1 %v16208_v0 }
 0x564   : > { %15026 = vmatpush3.bf16.msra.mxu0 %v16639_v50 }
 0x565   : > { %15170 = vmatpush3.bf16.msra.mxu1 %v18935_v7  ;;  %15027 = vmatprep.subr.bf16.mxu0 %v16208_v0  ;;  %v19031_v7 = vld [vmem:[#allocation18_spill] sm:$0xff] }
 0x566   : > { %15171 = vmatprep.subr.bf16.mxu1 %v16208_v0 }
 0x568   : > { %15029 = vmatpush3.bf16.msra.mxu0 %v16645_v54 }
 0x569   : > { %15173 = vmatpush3.bf16.msra.mxu1 %v18937_v61  ;;  %15030 = vmatprep.subr.bf16.mxu0 %v16208_v0  ;;  %v19032_v61 = vld [vmem:[#allocation27_spill] sm:$0xff] }
 0x56a   : > { %15174 = vmatprep.subr.bf16.mxu1 %v16208_v0 }
 0x56b   : > { %12261 = vmatmul.mubr.f32.vlgmr.msra.gmra.mrb[10].mxu0 %v18000_v25 }
 0x56c   : > { %15032 = vmatpush3.bf16.msra.mxu0 %v16654_v63  ;;  %12471 = vmatmul.mubr.f32.vlgmr.msra.gmra.mrb[10].mxu1 %v18000_v25  ;;  %v19022_v63 = vld [vmem:[#allocation57_spill] sm:$0xff] }
 0x56d   : > { %15176 = vmatpush3.bf16.msra.mxu1 %v16597_v22  ;;  %15033 = vmatprep.subr.bf16.mxu0 %v16208_v0 }
 0x56e   : > { %15177 = vmatprep.subr.bf16.mxu1 %v16208_v0  ;;  %12295 = vmatprep.mubr.msk.f32.mxu0 %vm16209_vm0, %v18904_v20 }
 0x56f   : > { %12505 = vmatprep.mubr.msk.f32.mxu1 %vm16209_vm0, %v18904_v20 }
 0x570   : > { %15035 = vmatpush3.bf16.msra.mxu0 %v16667_v15  ;;  %v19023_v15 = vld [vmem:[#allocation58_spill] sm:$0xff] }
 0x571   : > { %15179 = vmatpush3.bf16.msra.mxu1 %v16605_v27  ;;  %15036 = vmatprep.subr.bf16.mxu0 %v16208_v0 }
 0x572   : > { %15180 = vmatprep.subr.bf16.mxu1 %v16208_v0 }
 0x574   : > { %15038 = vmatpush3.bf16.msra.mxu0 %v16679_v29  ;;  %v19024_v29 = vld [vmem:[#allocation59_spill] sm:$0xff] }
 0x575   : > { %15182 = vmatpush3.bf16.msra.mxu1 %v16615_v32  ;;  %15039 = vmatprep.subr.bf16.mxu0 %v16208_v0 }
 0x576   : > { %15183 = vmatprep.subr.bf16.mxu1 %v16208_v0 }
 0x578   : > { %15041 = vmatpush3.bf16.msra.mxu0 %v16687_v44  ;;  %v19025_v44 = vld [vmem:[#allocation37_spill] sm:$0xff] }
 0x579   : > { %15185 = vmatpush3.bf16.msra.mxu1 %v16621_v35  ;;  %15042 = vmatprep.subr.bf16.mxu0 %v16208_v0 }
 0x57a   : > { %15186 = vmatprep.subr.bf16.mxu1 %v16208_v0 }
 0x57c   : > { %15044 = vmatpush3.bf16.msra.mxu0 %v16695_v57  ;;  %v19026_v57 = vld [vmem:[#allocation48_spill] sm:$0xff] }
 0x57d   : > { %15188 = vmatpush3.bf16.msra.mxu1 %v16627_v40  ;;  %15045 = vmatprep.subr.bf16.mxu0 %v16208_v0 }
 0x57e   : > { %15189 = vmatprep.subr.bf16.mxu1 %v16208_v0 }
 0x580   : > { %15047 = vmatpush3.bf16.msra.mxu0 %v16703_v14  ;;  %v19027_v14 = vld [vmem:[#allocation16_spill] sm:$0xff] }
 0x581   : > { %15191 = vmatpush3.bf16.msra.mxu1 %v16633_v45  ;;  %15048 = vmatprep.subr.bf16.mxu0 %v16208_v0  ;;  %v19019_v45 = vld [vmem:[#allocation54_spill] sm:$0xff] }
 0x582   : > { %15192 = vmatprep.subr.bf16.mxu1 %v16208_v0 }
 0x584   : > { %15050 = vmatpush3.bf16.msra.mxu0 %v16711_v38  ;;  %v19028_v38 = vld [vmem:[#allocation25_spill] sm:$0xff] }
 0x585   : > { %15194 = vmatpush3.bf16.msra.mxu1 %v16639_v50  ;;  %15051 = vmatprep.subr.bf16.mxu0 %v16208_v0  ;;  %v19020_v50 = vld [vmem:[#allocation55_spill] sm:$0xff] }
 0x586   : > { %15195 = vmatprep.subr.bf16.mxu1 %v16208_v0 }
 0x588   : > { %15053 = vmatpush3.bf16.msra.mxu0 %v16719_v55  ;;  %v19029_v55 = vld [vmem:[#allocation17_spill] sm:$0xff] }
 0x589   : > { %15197 = vmatpush3.bf16.msra.mxu1 %v16645_v54  ;;  %15198 = vmatprep.subr.bf16.mxu0 %v16208_v0  ;;  %v19021_v54 = vld [vmem:[#allocation56_spill] sm:$0xff] }
 0x58a   : > { %15294 = vmatprep.subr.bf16.mxu1 %v16208_v0 }
 0x58b   : > { %12296 = vmatmul.mubr.f32.vlgmr.msra.gmra.mrb[10].mxu0 %v18237_v59 }
 0x58c   : > { %12506 = vmatmul.mubr.f32.vlgmr.msra.gmra.mrb[10].mxu1 %v18237_v59  ;;  %15200 = vmatpush3.bf16.msra.mxu0 %v18938_v56 }
 0x58d   : > { %15296 = vmatpush3.bf16.msra.mxu1 %v18923_v28  ;;  %15201 = vmatprep.subr.bf16.mxu0 %v16208_v0 }
 0x58e   : > { %15297 = vmatprep.subr.bf16.mxu1 %v16208_v0  ;;  %12540 = vmatprep.mubr.msk.f32.mxu0 %vm16209_vm0, %v18904_v20 }
 0x58f   : > { %12680 = vmatprep.mubr.msk.f32.mxu1 %vm16209_vm0, %v18904_v20 }
 0x590   : > { %15203 = vmatpush3.bf16.msra.mxu0 %v18939_v62 }
 0x591   : > { %15299 = vmatpush3.bf16.msra.mxu1 %v18925_v4  ;;  %15204 = vmatprep.subr.bf16.mxu0 %v16208_v0 }
 0x592   : > { %15300 = vmatprep.subr.bf16.mxu1 %v16208_v0 }
 0x594   : > { %15206 = vmatpush3.bf16.msra.mxu0 %v18940_v3 }
 0x595   : > { %15302 = vmatpush3.bf16.msra.mxu1 %v18927_v23  ;;  %15207 = vmatprep.subr.bf16.mxu0 %v16208_v0 }
 0x596   : > { %15303 = vmatprep.subr.bf16.mxu1 %v16208_v0 }
 0x598   : > { %15209 = vmatpush3.bf16.msra.mxu0 %v16989_v46 }
 0x599   : > { %15305 = vmatpush3.bf16.msra.mxu1 %v18929_v39  ;;  %15210 = vmatprep.subr.bf16.mxu0 %v16208_v0 }
 0x59a   : > { %15306 = vmatprep.subr.bf16.mxu1 %v16208_v0 }
 0x59c   : > { %15212 = vmatpush3.bf16.msra.mxu0 %v16997_v17 }
 0x59d   : > { %15308 = vmatpush3.bf16.msra.mxu1 %v18931_v58  ;;  %15213 = vmatprep.subr.bf16.mxu0 %v16208_v0 }
 0x59e   : > { %15309 = vmatprep.subr.bf16.mxu1 %v16208_v0 }
 0x59f   : > { %v5144_v22 = vpop.f32.mrb[8].mxu1 }
 0x5a0   : > { %v15735_v27 = vadd.f32 %v17906_v31, %v5144_v22  ;;  %v11982_v32 = vpop.f32.mrb[9].mxu1  ;;  %15215 = vmatpush3.bf16.msra.mxu0 %v17005_v10  ;;  %v19018_v31 = vld [vmem:[#allocation47_spill] sm:$0xff] }
 0x5a1   : > { %15311 = vmatpush3.bf16.msra.mxu1 %v17009_v33  ;;  %15216 = vmatprep.subr.bf16.mxu0 %v16208_v0 }
 0x5a2   : > { %v5149_v35 = vmax.f32 %v15735_v27, 0.0  ;;  %15312 = vmatprep.subr.bf16.mxu1 %v16208_v0 }
 0x5a4   : > { %v18274_v40 = vadd.f32 %v5149_v35, %v18153_v13  ;;  %15218 = vmatpush3.bf16.msra.mxu0 %v17015_v21  ;;  %v19040_v13 = vld [vmem:[#allocation31_spill] sm:$0xff]  ;;  %v7661_v35 = vld [vmem:[#allocation7 + $0x58] sm:$0xff] }
 0x5a5   : > { %15314 = vmatpush3.bf16.msra.mxu1 %v18934_v53  ;;  %15219 = vmatprep.subr.bf16.mxu0 %v16208_v0 }
 0x5a6   : > { %15315 = vmatprep.subr.bf16.mxu1 %v16208_v0 }
 0x5a8   : > { %15221 = vmatpush3.bf16.msra.mxu0 %v18990_v19 }
 0x5a9   : > { %15317 = vmatpush3.bf16.msra.mxu1 %v18936_v11  ;;  %15222 = vmatprep.subr.bf16.mxu0 %v16208_v0 }
 0x5aa   : > { %15318 = vmatprep.subr.bf16.mxu1 %v16208_v0 }
 0x5ab   : > { %12541 = vmatmul.mubr.f32.vlgmr.msra.gmra.mrb[12].mxu0 %v19018_v31 }
 0x5ac   : > { %15224 = vmatpush3.bf16.msra.mxu0 %v18992_v43  ;;  %12681 = vmatmul.mubr.f32.vlgmr.msra.gmra.mrb[12].mxu1 %v19018_v31 }
 0x5ad   : > { %15320 = vmatpush3.bf16.msra.mxu1 %v18938_v56  ;;  %15225 = vmatprep.subr.bf16.mxu0 %v16208_v0 }
 0x5ae   : > { %15321 = vmatprep.subr.bf16.mxu1 %v16208_v0  ;;  %12575 = vmatprep.mubr.msk.f32.mxu0 %vm16209_vm0, %v18904_v20 }
 0x5af   : > { %12715 = vmatprep.mubr.msk.f32.mxu1 %vm16209_vm0, %v18904_v20 }
 0x5b0   : > { %15227 = vmatpush3.bf16.msra.mxu0 %v18993_v49 }
 0x5b1   : > { %15323 = vmatpush3.bf16.msra.mxu1 %v18939_v62  ;;  %15228 = vmatprep.subr.bf16.mxu0 %v16208_v0 }
 0x5b2   : > { %15324 = vmatprep.subr.bf16.mxu1 %v16208_v0 }
 0x5b4   : > { %15230 = vmatpush3.bf16.msra.mxu0 %v19019_v45 }
 0x5b5   : > { %15326 = vmatpush3.bf16.msra.mxu1 %v18940_v3  ;;  %15231 = vmatprep.subr.bf16.mxu0 %v16208_v0 }
 0x5b6   : > { %15327 = vmatprep.subr.bf16.mxu1 %v16208_v0 }
 0x5b8   : > { %15233 = vmatpush3.bf16.msra.mxu0 %v19020_v50 }
 0x5b9   : > { %15329 = vmatpush3.bf16.msra.mxu1 %v16989_v46  ;;  %15234 = vmatprep.subr.bf16.mxu0 %v16208_v0 }
 0x5ba   : > { %15330 = vmatprep.subr.bf16.mxu1 %v16208_v0 }
 0x5bc   : > { %15236 = vmatpush3.bf16.msra.mxu0 %v19021_v54 }
 0x5bd   : > { %15332 = vmatpush3.bf16.msra.mxu1 %v16997_v17  ;;  %15237 = vmatprep.subr.bf16.mxu0 %v16208_v0 }
 0x5be   : > { %15333 = vmatprep.subr.bf16.mxu1 %v16208_v0 }
 0x5c0   : > { %15239 = vmatpush3.bf16.msra.mxu0 %v19022_v63 }
 0x5c1   : > { %15335 = vmatpush3.bf16.msra.mxu1 %v17005_v10  ;;  %15240 = vmatprep.subr.bf16.mxu0 %v16208_v0 }
 0x5c2   : > { %15336 = vmatprep.subr.bf16.mxu1 %v16208_v0 }
 0x5c4   : > { %15242 = vmatpush3.bf16.msra.mxu0 %v19023_v15 }
 0x5c5   : > { %15338 = vmatpush3.bf16.msra.mxu1 %v17015_v21  ;;  %15243 = vmatprep.subr.bf16.mxu0 %v16208_v0 }
 0x5c6   : > { %15339 = vmatprep.subr.bf16.mxu1 %v16208_v0 }
 0x5c8   : > { %15245 = vmatpush3.bf16.msra.mxu0 %v19024_v29 }
 0x5c9   : > { %15341 = vmatpush3.bf16.msra.mxu1 %v18990_v19  ;;  %15246 = vmatprep.subr.bf16.mxu0 %v16208_v0 }
 0x5ca   : > { %15342 = vmatprep.subr.bf16.mxu1 %v16208_v0 }
 0x5cb   : > { %12576 = vmatmul.mubr.f32.vlgmr.msra.gmra.mrb[12].mxu0 %v19025_v44 }
 0x5cc   : > { %15248 = vmatpush3.bf16.msra.mxu0 %v16480_v5  ;;  %12716 = vmatmul.mubr.f32.vlgmr.msra.gmra.mrb[12].mxu1 %v19025_v44 }
 0x5cd   : > { %15344 = vmatpush3.bf16.msra.mxu1 %v18992_v43  ;;  %15249 = vmatprep.subr.bf16.mxu0 %v16208_v0 }
 0x5ce   : > { %15345 = vmatprep.subr.bf16.mxu1 %v16208_v0  ;;  %12610 = vmatprep.mubr.msk.f32.mxu0 %vm16209_vm0, %v18904_v20 }
 0x5cf   : > { %12750 = vmatprep.mubr.msk.f32.mxu1 %vm16209_vm0, %v18904_v20 }
 0x5d0   : > { %15251 = vmatpush3.bf16.msra.mxu0 %v16485_v12 }
 0x5d1   : > { %15347 = vmatpush3.bf16.msra.mxu1 %v18993_v49  ;;  %15252 = vmatprep.subr.bf16.mxu0 %v16208_v0 }
 0x5d2   : > { %15348 = vmatprep.subr.bf16.mxu1 %v16208_v0 }
 0x5d4   : > { %15254 = vmatpush3.bf16.msra.mxu0 %v16493_v18 }
 0x5d5   : > { %15350 = vmatpush3.bf16.msra.mxu1 %v19019_v45  ;;  %15255 = vmatprep.subr.bf16.mxu0 %v16208_v0 }
 0x5d6   : > { %15351 = vmatprep.subr.bf16.mxu1 %v16208_v0 }
 0x5d8   : > { %15257 = vmatpush3.bf16.msra.mxu0 %v16501_v24 }
 0x5d9   : > { %15353 = vmatpush3.bf16.msra.mxu1 %v19020_v50  ;;  %15258 = vmatprep.subr.bf16.mxu0 %v16208_v0 }
 0x5da   : > { %15354 = vmatprep.subr.bf16.mxu1 %v16208_v0 }
 0x5dc   : > { %15260 = vmatpush3.bf16.msra.mxu0 %v16509_v30 }
 0x5dd   : > { %15356 = vmatpush3.bf16.msra.mxu1 %v19021_v54  ;;  %15261 = vmatprep.subr.bf16.mxu0 %v16208_v0 }
 0x5de   : > { %15357 = vmatprep.subr.bf16.mxu1 %v16208_v0 }
 0x5e0   : > { %15263 = vmatpush3.bf16.msra.mxu0 %v16517_v36 }
 0x5e1   : > { %15359 = vmatpush3.bf16.msra.mxu1 %v19022_v63  ;;  %15264 = vmatprep.subr.bf16.mxu0 %v16208_v0 }
 0x5e2   : > { %15360 = vmatprep.subr.bf16.mxu1 %v16208_v0 }
 0x5e4   : > { %15266 = vmatpush3.bf16.msra.mxu0 %v16525_v42 }
 0x5e5   : > { %15362 = vmatpush3.bf16.msra.mxu1 %v19023_v15  ;;  %15267 = vmatprep.subr.bf16.mxu0 %v16208_v0 }
 0x5e6   : > { %15363 = vmatprep.subr.bf16.mxu1 %v16208_v0 }
 0x5e8   : > { %15269 = vmatpush3.bf16.msra.mxu0 %v16533_v48 }
 0x5e9   : > { %15365 = vmatpush3.bf16.msra.mxu1 %v19024_v29  ;;  %15270 = vmatprep.subr.bf16.mxu0 %v16208_v0 }
 0x5ea   : > { %15366 = vmatprep.subr.bf16.mxu1 %v16208_v0 }
 0x5eb   : > { %12611 = vmatmul.mubr.f32.vlgmr.msra.gmra.mrb[12].mxu0 %v19026_v57  ;;  %v7664_v57 = vld [vmem:[#allocation7 + $0x70] sm:$0xff] }
 0x5ec   : > { %15272 = vmatpush3.bf16.msra.mxu0 %v18948_v26  ;;  %12751 = vmatmul.mubr.f32.vlgmr.msra.gmra.mrb[12].mxu1 %v18081_v2 }
 0x5ed   : > { %15368 = vmatpush3.bf16.msra.mxu1 %v19027_v14  ;;  %15273 = vmatprep.subr.bf16.mxu0 %v16208_v0 }
 0x5ee   : > { %15369 = vmatprep.subr.bf16.mxu1 %v16208_v0  ;;  %12645 = vmatprep.mubr.msk.f32.mxu0 %vm16209_vm0, %v18904_v20 }
 0x5ef   : > { %12785 = vmatprep.mubr.msk.f32.mxu1 %vm16209_vm0, %v18904_v20 }
 0x5f0   : > { %15275 = vmatpush3.bf16.msra.mxu0 %v19028_v38 }
 0x5f1   : > { %15371 = vmatpush3.bf16.msra.mxu1 %v19029_v55  ;;  %15276 = vmatprep.subr.bf16.mxu0 %v16208_v0 }
 0x5f2   : > { %15372 = vmatprep.subr.bf16.mxu1 %v16208_v0 }
 0x5f4   : > { %15278 = vmatpush3.bf16.msra.mxu0 %v19030_v47 }
 0x5f5   : > { %15374 = vmatpush3.bf16.msra.mxu1 %v19031_v7  ;;  %15279 = vmatprep.subr.bf16.mxu0 %v16208_v0 }
 0x5f6   : > { %15375 = vmatprep.subr.bf16.mxu1 %v16208_v0 }
 0x5f8   : > { %15281 = vmatpush3.bf16.msra.mxu0 %v19032_v61 }
 0x5f9   : > { %15377 = vmatpush3.bf16.msra.mxu1 %v19033_v41  ;;  %15282 = vmatprep.subr.bf16.mxu0 %v16208_v0 }
 0x5fa   : > { %15378 = vmatprep.subr.bf16.mxu1 %v16208_v0 }
 0x5fc   : > { %15284 = vmatpush3.bf16.msra.mxu0 %v19034_v1 }
 0x5fd   : > { %15380 = vmatpush3.bf16.msra.mxu1 %v19035_v37  ;;  %15285 = vmatprep.subr.bf16.mxu0 %v16208_v0 }
 0x5fe   : > { %15381 = vmatprep.subr.bf16.mxu1 %v16208_v0 }
 0x600   : > { %15287 = vmatpush3.bf16.msra.mxu0 %v19036_v51 }
 0x601   : > { %15383 = vmatpush3.bf16.msra.mxu1 %v19037_v60  ;;  %15288 = vmatprep.subr.bf16.mxu0 %v16208_v0 }
 0x602   : > { %15384 = vmatprep.subr.bf16.mxu1 %v16208_v0 }
 0x604   : > { %15290 = vmatpush3.bf16.msra.mxu0 %v19038_v9 }
 0x605   : > { %15386 = vmatpush3.bf16.msra.mxu1 %v19039_v8  ;;  %15291 = vmatprep.subr.bf16.mxu0 %v16208_v0 }
 0x606   : > { %15387 = vmatprep.subr.bf16.mxu1 %v16208_v0 }
 0x608   : > { %15293 = vmatpush3.bf16.msra.mxu0 %v19040_v13 }
 0x609   : > { %15389 = vmatpush3.bf16.msra.mxu1 %v19041_v52  ;;  %15438 = vmatprep.subr.bf16.mxu0 %v16208_v0 }
 0x60a   : > { %15390 = vmatprep.subr.bf16.mxu1 %v16208_v0 }
 0x60b   : > { %12646 = vmatmul.mubr.f32.vlgmr.msra.gmra.mrb[12].mxu0 %v17872_v16  ;;  %v16007_v16 = vld [vmem:[%s16460_s20 + $0x48] sm:$0xff] }
 0x60c   : > { %12786 = vmatmul.mubr.f32.vlgmr.msra.gmra.mrb[12].mxu1 %v16006_v6  ;;  %15440 = vmatpush3.bf16.msra.mxu0 %v18923_v28  ;;  %v7753_v6 = vld [vmem:[#allocation8 + $0x48] sm:$0xff] }
 0x60d   : > { %15392 = vmatpush3.bf16.msra.mxu1 %v16480_v5  ;;  %15441 = vmatprep.subr.bf16.mxu0 %v16208_v0 }
 0x60e   : > { %15393 = vmatprep.subr.bf16.mxu1 %v16208_v0  ;;  %12820 = vmatprep.mubr.msk.f32.mxu1 %vm16209_vm0, %v18904_v20 }
 0x60f   : > { %12890 = vmatprep.mubr.msk.f32.mxu0 %vm16209_vm0, %v18904_v20 }
 0x610   : > { %15443 = vmatpush3.bf16.msra.mxu0 %v18925_v4 }
 0x611   : > { %15395 = vmatpush3.bf16.msra.mxu1 %v16485_v12  ;;  %15444 = vmatprep.subr.bf16.mxu0 %v16208_v0 }
 0x612   : > { %15396 = vmatprep.subr.bf16.mxu1 %v16208_v0 }
 0x614   : > { %15446 = vmatpush3.bf16.msra.mxu0 %v18927_v23 }
 0x615   : > { %15398 = vmatpush3.bf16.msra.mxu1 %v16493_v18  ;;  %15447 = vmatprep.subr.bf16.mxu0 %v16208_v0 }
 0x616   : > { %15399 = vmatprep.subr.bf16.mxu1 %v16208_v0 }
 0x618   : > { %15449 = vmatpush3.bf16.msra.mxu0 %v18929_v39 }
 0x619   : > { %15401 = vmatpush3.bf16.msra.mxu1 %v16501_v24  ;;  %15450 = vmatprep.subr.bf16.mxu0 %v16208_v0 }
 0x61a   : > { %15402 = vmatprep.subr.bf16.mxu1 %v16208_v0 }
 0x61c   : > { %15452 = vmatpush3.bf16.msra.mxu0 %v18931_v58 }
 0x61d   : > { %15404 = vmatpush3.bf16.msra.mxu1 %v16509_v30  ;;  %15453 = vmatprep.subr.bf16.mxu0 %v16208_v0 }
 0x61e   : > { %15405 = vmatprep.subr.bf16.mxu1 %v16208_v0 }
 0x620   : > { %15455 = vmatpush3.bf16.msra.mxu0 %v17009_v33 }
 0x621   : > { %15407 = vmatpush3.bf16.msra.mxu1 %v16517_v36  ;;  %15456 = vmatprep.subr.bf16.mxu0 %v16208_v0 }
 0x622   : > { %15408 = vmatprep.subr.bf16.mxu1 %v16208_v0 }
 0x624   : > { %15458 = vmatpush3.bf16.msra.mxu0 %v18934_v53 }
 0x625   : > { %15410 = vmatpush3.bf16.msra.mxu1 %v16525_v42  ;;  %15459 = vmatprep.subr.bf16.mxu0 %v16208_v0 }
 0x626   : > { %15411 = vmatprep.subr.bf16.mxu1 %v16208_v0 }
 0x628   : > { %15461 = vmatpush3.bf16.msra.mxu0 %v18936_v11 }
 0x629   : > { %15413 = vmatpush3.bf16.msra.mxu1 %v16533_v48  ;;  %15462 = vmatprep.subr.bf16.mxu0 %v16208_v0 }
 0x62a   : > { %15414 = vmatprep.subr.bf16.mxu1 %v16208_v0 }
 0x62b   : > { %12891 = vmatmul.mubr.f32.vlgmr.msra.gmra.mrb[14].mxu0 %v16007_v16 }
 0x62c   : > { %12821 = vmatmul.mubr.f32.vlgmr.msra.gmra.mrb[12].mxu1 %v18438_v34  ;;  %15464 = vmatpush3.bf16.msra.mxu0 %v18938_v56 }
 0x62d   : > { %15416 = vmatpush3.bf16.msra.mxu1 %v18948_v26  ;;  %15465 = vmatprep.subr.bf16.mxu0 %v16208_v0 }
 0x62e   : > { %15417 = vmatprep.subr.bf16.mxu1 %v16208_v0  ;;  %12855 = vmatprep.mubr.msk.f32.mxu1 %vm16209_vm0, %v18904_v20 }
 0x62f   : > { %12925 = vmatprep.mubr.msk.f32.mxu0 %vm16209_vm0, %v18904_v20 }
 0x630   : > { %15467 = vmatpush3.bf16.msra.mxu0 %v18939_v62 }
 0x631   : > { %15419 = vmatpush3.bf16.msra.mxu1 %v19028_v38  ;;  %15468 = vmatprep.subr.bf16.mxu0 %v16208_v0 }
 0x632   : > { %15420 = vmatprep.subr.bf16.mxu1 %v16208_v0 }
 0x634   : > { %15470 = vmatpush3.bf16.msra.mxu0 %v18940_v3 }
 0x635   : > { %15422 = vmatpush3.bf16.msra.mxu1 %v19030_v47  ;;  %15471 = vmatprep.subr.bf16.mxu0 %v16208_v0 }
 0x636   : > { %15423 = vmatprep.subr.bf16.mxu1 %v16208_v0 }
 0x638   : > { %15473 = vmatpush3.bf16.msra.mxu0 %v16989_v46 }
 0x639   : > { %15425 = vmatpush3.bf16.msra.mxu1 %v19032_v61  ;;  %15474 = vmatprep.subr.bf16.mxu0 %v16208_v0 }
 0x63a   : > { %15426 = vmatprep.subr.bf16.mxu1 %v16208_v0 }
 0x63c   : > { %15476 = vmatpush3.bf16.msra.mxu0 %v16997_v17 }
 0x63d   : > { %15428 = vmatpush3.bf16.msra.mxu1 %v19034_v1  ;;  %15477 = vmatprep.subr.bf16.mxu0 %v16208_v0 }
 0x63e   : > { %15429 = vmatprep.subr.bf16.mxu1 %v16208_v0 }
 0x640   : > { %15479 = vmatpush3.bf16.msra.mxu0 %v17005_v10 }
 0x641   : > { %15431 = vmatpush3.bf16.msra.mxu1 %v19036_v51  ;;  %15480 = vmatprep.subr.bf16.mxu0 %v16208_v0 }
 0x642   : > { %15432 = vmatprep.subr.bf16.mxu1 %v16208_v0 }
 0x644   : > { %15482 = vmatpush3.bf16.msra.mxu0 %v17015_v21 }
 0x645   : > { %15434 = vmatpush3.bf16.msra.mxu1 %v19038_v9  ;;  %15483 = vmatprep.subr.bf16.mxu0 %v16208_v0 }
 0x646   : > { %15435 = vmatprep.subr.bf16.mxu1 %v16208_v0 }
 0x648   : > { %15485 = vmatpush3.bf16.msra.mxu0 %v18990_v19 }
 0x649   : > { %15437 = vmatpush3.bf16.msra.mxu1 %v19040_v13  ;;  %15486 = vmatprep.subr.bf16.mxu0 %v16208_v0 }
 0x64a   : > { %15582 = vmatprep.subr.bf16.mxu1 %v16208_v0 }
 0x64b   : > { %12926 = vmatmul.mubr.f32.vlgmr.msra.gmra.mrb[14].mxu0 %v18081_v2 }
 0x64c   : > { %12856 = vmatmul.mubr.f32.vlgmr.msra.gmra.mrb[12].mxu1 %v18000_v25  ;;  %15488 = vmatpush3.bf16.msra.mxu0 %v18992_v43 }
 0x64d   : > { %15584 = vmatpush3.bf16.msra.mxu1 %v18923_v28  ;;  %15489 = vmatprep.subr.bf16.mxu0 %v16208_v0 }
 0x64e   : > { %15585 = vmatprep.subr.bf16.mxu1 %v16208_v0  ;;  %12960 = vmatprep.mubr.msk.f32.mxu0 %vm16209_vm0, %v18904_v20 }
 0x64f   : > { %13100 = vmatprep.mubr.msk.f32.mxu1 %vm16209_vm0, %v18904_v20 }
 0x650   : > { %15491 = vmatpush3.bf16.msra.mxu0 %v18993_v49 }
 0x651   : > { %15587 = vmatpush3.bf16.msra.mxu1 %v18925_v4  ;;  %15492 = vmatprep.subr.bf16.mxu0 %v16208_v0  ;;  %v18506_v4 = vld [vmem:[%s18718_s2] ss:$0 sm:$0xff] }
 0x652   : > { %15588 = vmatprep.subr.bf16.mxu1 %v16208_v0 }
 0x654   : > { %15494 = vmatpush3.bf16.msra.mxu0 %v19019_v45 }
 0x655   : > { %15590 = vmatpush3.bf16.msra.mxu1 %v18927_v23  ;;  %15495 = vmatprep.subr.bf16.mxu0 %v16208_v0 }
 0x656   : > { %15591 = vmatprep.subr.bf16.mxu1 %v16208_v0 }
 0x658   : > { %15497 = vmatpush3.bf16.msra.mxu0 %v19020_v50 }
 0x659   : > { %15593 = vmatpush3.bf16.msra.mxu1 %v18929_v39  ;;  %15498 = vmatprep.subr.bf16.mxu0 %v16208_v0 }
 0x65a   : > { %15594 = vmatprep.subr.bf16.mxu1 %v16208_v0 }
 0x65c   : > { %15500 = vmatpush3.bf16.msra.mxu0 %v19021_v54  ;;  %v7662_v54 = vld [vmem:[#allocation7 + $0x60] sm:$0xff] }
 0x65d   : > { %15596 = vmatpush3.bf16.msra.mxu1 %v18931_v58  ;;  %15501 = vmatprep.subr.bf16.mxu0 %v16208_v0 }
 0x65e   : > { %v5786_v28 = vpop.f32.mrb[10].mxu0  ;;  %15597 = vmatprep.subr.bf16.mxu1 %v16208_v0 }
 0x65f   : > { %v15736_v23 = vadd.f32 %v18506_v4, %v5786_v28  ;;  %v6214_v39 = vpop.f32.mrb[10].mxu1  ;;  %v12297_v43 = vpop.f32.mrb[11].mxu0  ;;  %v7755_v28 = vld [vmem:[#allocation8 + $0x58] sm:$0xff] }
 0x660   : > { %v15737_v49 = vadd.f32 %v18506_v4, %v6214_v39  ;;  %v12507_v25 = vpop.f32.mrb[11].mxu1  ;;  %15503 = vmatpush3.bf16.msra.mxu0 %v19022_v63  ;;  %v7663_v63 = vld [vmem:[#allocation7 + $0x68] sm:$0xff]  ;;  %v7756_v39 = vld [vmem:[#allocation8 + $0x60] sm:$0xff] }
 0x661   : > { %v5791_v58 = vmax.f32 %v15736_v23, 0.0  ;;  %15599 = vmatpush3.bf16.msra.mxu1 %v17009_v33  ;;  %15504 = vmatprep.subr.bf16.mxu0 %v16208_v0  ;;  %v16010_v33 = vld [vmem:[%s16460_s20 + $0x58] sm:$0xff]  ;;  %v7757_v43 = vld [vmem:[#allocation8 + $0x68] sm:$0xff] }
 0x662   : > { %15600 = vmatprep.subr.bf16.mxu1 %v16208_v0  ;;  %v6219_v27 = vmax.f32 %v15737_v49, 0.0  ;;  %v15721_v49 = vpack.c.bf16 %v7757_v43, %v7756_v39 }
 0x663   : > { %v5792_v22 = vadd.f32 %v5791_v58, %v18274_v40 }
 0x664   : > { %15506 = vmatpush3.bf16.msra.mxu0 %v19023_v15  ;;  %v15697_v15 = vpack.c.bf16 %v7663_v63, %v7662_v54 }
 0x665   : > { %v18516_v32 = vadd.f32 %v6219_v27, %v5792_v22  ;;  %15602 = vmatpush3.bf16.msra.mxu1 %v18934_v53  ;;  %15507 = vmatprep.subr.bf16.mxu0 %v16208_v0  ;;  %v16011_v53 = vld [vmem:[%s16460_s20 + $0x70] sm:$0xff]  ;;  %s7852_s20 = sshll.u32 %s340_s11, 4  ;;  %s18675_s20 = int_to_ptr.vmem [resolvable:$true] %s7852_s20 }
 0x666   : > { %15603 = vmatprep.subr.bf16.mxu1 %v16208_v0  ;;  %s16126_s10 = scalar_lea.vmem %s18675_s20, 128  ;;  %p16133_p11 = scmp.lt.s32.totalorder %s18675_s20, %s16131_s14 }
 0x667   : > { %p16127_p0 = scmp.ne.s32.totalorder %s18675_s20, %s16126_s10  ;;  %p16134_p1 = scmp.lt.s32.totalorder %s16132_s8, %s16126_s10 }
 0x668   : > { %15509 = vmatpush3.bf16.msra.mxu0 %v19024_v29 }
 0x669   : > { %15605 = vmatpush3.bf16.msra.mxu1 %v18936_v11  ;;  %15510 = vmatprep.subr.bf16.mxu0 %v16208_v0  ;;  %v7659_v11 = vld [vmem:[#allocation7 + $0x48] sm:$0xff]  ;;  %p16128_p3 = pnand %p16127_p0, %p16405_p5  ;;  %p16135_p2 = por %p16134_p1, %p16133_p11 }
 0x66a   : > { %15606 = vmatprep.subr.bf16.mxu1 %v16208_v0 }
 0x66b   : > { %12961 = vmatmul.mubr.f32.vlgmr.msra.gmra.mrb[14].mxu0 %v16010_v33  ;;  %p16129_p7 = pneg %p16128_p3 }
 0x66c   : > { %15512 = vmatpush3.bf16.msra.mxu0 %v19027_v14  ;;  %13101 = vmatmul.mubr.f32.vlgmr.msra.gmra.mrb[14].mxu1 %v18081_v2 }
 0x66d   : > { %15608 = vmatpush3.bf16.msra.mxu1 %v18938_v56  ;;  %15513 = vmatprep.subr.bf16.mxu0 %v16208_v0  ;;  %p16136_p4 = pnand %p16135_p2, %p16129_p7 }
 0x66e   : > { %15609 = vmatprep.subr.bf16.mxu1 %v16208_v0  ;;  %12995 = vmatprep.mubr.msk.f32.mxu0 %vm16209_vm0, %v18904_v20 }
 0x66f   : > { %13135 = vmatprep.mubr.msk.f32.mxu1 %vm16209_vm0, %v18904_v20 }
 0x670   : > { %15515 = vmatpush3.bf16.msra.mxu0 %v19029_v55 }
 0x671   : > { %15611 = vmatpush3.bf16.msra.mxu1 %v18939_v62  ;;  %15516 = vmatprep.subr.bf16.mxu0 %v16208_v0 }
 0x672   : > { %15612 = vmatprep.subr.bf16.mxu1 %v16208_v0 }
 0x674   : > { %15518 = vmatpush3.bf16.msra.mxu0 %v19031_v7 }
 0x675   : > { %15614 = vmatpush3.bf16.msra.mxu1 %v18940_v3  ;;  %15519 = vmatprep.subr.bf16.mxu0 %v16208_v0 }
 0x676   : > { %15615 = vmatprep.subr.bf16.mxu1 %v16208_v0 }
 0x678   : > { %15521 = vmatpush3.bf16.msra.mxu0 %v19033_v41 }
 0x679   : > { %15617 = vmatpush3.bf16.msra.mxu1 %v16989_v46  ;;  %15522 = vmatprep.subr.bf16.mxu0 %v16208_v0  ;;  %v7656_v46 = vld [vmem:[#allocation7 + $0x30] sm:$0xff] }
 0x67a   : > { %15618 = vmatprep.subr.bf16.mxu1 %v16208_v0 }
 0x67c   : > { %15524 = vmatpush3.bf16.msra.mxu0 %v19035_v37 }
 0x67d   : > { %15620 = vmatpush3.bf16.msra.mxu1 %v16997_v17  ;;  %15525 = vmatprep.subr.bf16.mxu0 %v16208_v0  ;;  %v7655_v17 = vld [vmem:[#allocation7 + $0x28] sm:$0xff] }
 0x67e   : > { %15621 = vmatprep.subr.bf16.mxu1 %v16208_v0 }
 0x680   : > { %15527 = vmatpush3.bf16.msra.mxu0 %v19037_v60 }
 0x681   : > { %15623 = vmatpush3.bf16.msra.mxu1 %v17005_v10  ;;  %15528 = vmatprep.subr.bf16.mxu0 %v16208_v0 }
 0x682   : > { %15624 = vmatprep.subr.bf16.mxu1 %v16208_v0 }
 0x684   : > { %15530 = vmatpush3.bf16.msra.mxu0 %v19039_v8 }
 0x685   : > { %15626 = vmatpush3.bf16.msra.mxu1 %v17015_v21  ;;  %15531 = vmatprep.subr.bf16.mxu0 %v16208_v0  ;;  %v7657_v21 = vld [vmem:[#allocation7 + $0x38] sm:$0xff] }
 0x686   : > { %15627 = vmatprep.subr.bf16.mxu1 %v16208_v0  ;;  %v15688_v10 = vpack.c.bf16 %v7657_v21, %v7656_v46  ;;  %v7968_v21 = vld [vmem:[%s18722_s6] ss:$0 sm:$0xff] }
 0x688   : > { %15533 = vmatpush3.bf16.msra.mxu0 %v19041_v52 }
 0x689   : > { %15629 = vmatpush3.bf16.msra.mxu1 %v18990_v19  ;;  %15534 = vmatprep.subr.bf16.mxu0 %v16208_v0 }
 0x68a   : > { %15630 = vmatprep.subr.bf16.mxu1 %v16208_v0 }
 0x68b   : > { %12996 = vmatmul.mubr.f32.vlgmr.msra.gmra.mrb[14].mxu0 %v18438_v34  ;;  %v7754_v34 = vld [vmem:[#allocation8 + $0x50] sm:$0xff] }
 0x68c   : > { %15536 = vmatpush3.bf16.msra.mxu0 %v16480_v5  ;;  %13136 = vmatmul.mubr.f32.vlgmr.msra.gmra.mrb[14].mxu1 %v16010_v33  ;;  %v15718_v23 = vpack.c.bf16 %v7755_v28, %v7754_v34 }
 0x68d   : > { %15632 = vmatpush3.bf16.msra.mxu1 %v19027_v14  ;;  %15537 = vmatprep.subr.bf16.mxu0 %v16208_v0  ;;  %v7665_v14 = vld [vmem:[#allocation7 + $0x78] sm:$0xff] }
 0x68e   : > { %15633 = vmatprep.subr.bf16.mxu1 %v16208_v0  ;;  %13030 = vmatprep.mubr.msk.f32.mxu0 %vm16209_vm0, %v18904_v20 }
 0x68f   : > { %13170 = vmatprep.mubr.msk.f32.mxu1 %vm16209_vm0, %v18904_v20 }
 0x690   : > { %15539 = vmatpush3.bf16.msra.mxu0 %v16485_v12 }
 0x691   : > { %15635 = vmatpush3.bf16.msra.mxu1 %v19029_v55  ;;  %15540 = vmatprep.subr.bf16.mxu0 %v16208_v0  ;;  %v7744_v55 = vld [vmem:[#allocation8] sm:$0xff] }
 0x692   : > { %15636 = vmatprep.subr.bf16.mxu1 %v16208_v0 }
 0x694   : > { %15542 = vmatpush3.bf16.msra.mxu0 %v16493_v18 }
 0x695   : > { %15638 = vmatpush3.bf16.msra.mxu1 %v19031_v7  ;;  %15543 = vmatprep.subr.bf16.mxu0 %v16208_v0  ;;  %v7746_v7 = vld [vmem:[#allocation8 + $0x10] sm:$0xff] }
 0x696   : > { %15639 = vmatprep.subr.bf16.mxu1 %v16208_v0 }
 0x698   : > { %15545 = vmatpush3.bf16.msra.mxu0 %v16501_v24 }
 0x699   : > { %15641 = vmatpush3.bf16.msra.mxu1 %v19033_v41  ;;  %15546 = vmatprep.subr.bf16.mxu0 %v16208_v0  ;;  %v7747_v41 = vld [vmem:[#allocation8 + $0x18] sm:$0xff] }
 0x69a   : > { %15642 = vmatprep.subr.bf16.mxu1 %v16208_v0 }
 0x69c   : > { %15548 = vmatpush3.bf16.msra.mxu0 %v16509_v30 }
 0x69d   : > { %15644 = vmatpush3.bf16.msra.mxu1 %v19035_v37  ;;  %15549 = vmatprep.subr.bf16.mxu0 %v16208_v0  ;;  %v7748_v37 = vld [vmem:[#allocation8 + $0x20] sm:$0xff] }
 0x69e   : > { %15645 = vmatprep.subr.bf16.mxu1 %v16208_v0 }
 0x6a0   : > { %15551 = vmatpush3.bf16.msra.mxu0 %v16517_v36 }
 0x6a1   : > { %15647 = vmatpush3.bf16.msra.mxu1 %v19037_v60  ;;  %15552 = vmatprep.subr.bf16.mxu0 %v16208_v0 }
 0x6a2   : > { %15648 = vmatprep.subr.bf16.mxu1 %v16208_v0 }
 0x6a4   : > { %15554 = vmatpush3.bf16.msra.mxu0 %v16525_v42 }
 0x6a5   : > { %15650 = vmatpush3.bf16.msra.mxu1 %v19039_v8  ;;  %15555 = vmatprep.subr.bf16.mxu0 %v16208_v0  ;;  %v7751_v8 = vld [vmem:[#allocation8 + $0x38] sm:$0xff] }
 0x6a6   : > { %15651 = vmatprep.subr.bf16.mxu1 %v16208_v0 }
 0x6a8   : > { %15557 = vmatpush3.bf16.msra.mxu0 %v16533_v48 }
 0x6a9   : > { %15653 = vmatpush3.bf16.msra.mxu1 %v19041_v52  ;;  %15558 = vmatprep.subr.bf16.mxu0 %v16208_v0  ;;  %v7752_v52 = vld [vmem:[#allocation8 + $0x40] sm:$0xff] }
 0x6aa   : > { %15654 = vmatprep.subr.bf16.mxu1 %v16208_v0  ;;  %v15715_v16 = vpack.c.bf16 %v7753_v6, %v7752_v52 }
 0x6ab   : > { %13031 = vmatmul.mubr.f32.vlgmr.msra.gmra.mrb[14].mxu0 %v16011_v53 }
 0x6ac   : > { %15560 = vmatpush3.bf16.msra.mxu0 %v18948_v26  ;;  %13171 = vmatmul.mubr.f32.vlgmr.msra.gmra.mrb[14].mxu1 %v16011_v53  ;;  %v7658_v26 = vld [vmem:[#allocation7 + $0x40] sm:$0xff] }
 0x6ad   : > { %15656 = vmatpush3.bf16.msra.mxu1 %v16480_v5  ;;  %15561 = vmatprep.subr.bf16.mxu0 %v16208_v0  ;;  %v7650_v5 = vld [vmem:[#allocation7] sm:$0xff]  ;;  %v15691_v56 = vpack.c.bf16 %v7659_v11, %v7658_v26 }
 0x6ae   : > { %15657 = vmatprep.subr.bf16.mxu1 %v16208_v0  ;;  %13065 = vmatprep.mubr.msk.f32.mxu0 %vm16209_vm0, %v18904_v20 }
 0x6af   : > { %13205 = vmatprep.mubr.msk.f32.mxu1 %vm16209_vm0, %v18904_v20 }
 0x6b0   : > { %15563 = vmatpush3.bf16.msra.mxu0 %v19028_v38  ;;  %v15700_v38 = vpack.c.bf16 %v7665_v14, %v7664_v57 }
 0x6b1   : > { %15659 = vmatpush3.bf16.msra.mxu1 %v16485_v12  ;;  %15564 = vmatprep.subr.bf16.mxu0 %v16208_v0  ;;  %v7651_v12 = vld [vmem:[#allocation7 + $0x8] sm:$0xff] }
 0x6b2   : > { %15660 = vmatprep.subr.bf16.mxu1 %v16208_v0 }
 0x6b4   : > { %15566 = vmatpush3.bf16.msra.mxu0 %v19030_v47  ;;  %v7745_v47 = vld [vmem:[#allocation8 + $0x8] sm:$0xff] }
 0x6b5   : > { %15662 = vmatpush3.bf16.msra.mxu1 %v16493_v18  ;;  %15567 = vmatprep.subr.bf16.mxu0 %v16208_v0  ;;  %v15679_v18 = vpack.c.bf16 %v7651_v12, %v7650_v5 }
 0x6b6   : > { %15663 = vmatprep.subr.bf16.mxu1 %v16208_v0 }
 0x6b8   : > { %15569 = vmatpush3.bf16.msra.mxu0 %v19032_v61  ;;  %v15703_v61 = vpack.c.bf16 %v7745_v47, %v7744_v55 }
 0x6b9   : > { %15665 = vmatpush3.bf16.msra.mxu1 %v16501_v24  ;;  %15570 = vmatprep.subr.bf16.mxu0 %v16208_v0  ;;  %v7652_v24 = vld [vmem:[#allocation7 + $0x10] sm:$0xff] }
 0x6ba   : > { %15666 = vmatprep.subr.bf16.mxu1 %v16208_v0 }
 0x6bc   : > { %15572 = vmatpush3.bf16.msra.mxu0 %v19034_v1  ;;  %v15706_v1 = vpack.c.bf16 %v7747_v41, %v7746_v7 }
 0x6bd   : > { %15668 = vmatpush3.bf16.msra.mxu1 %v16509_v30  ;;  %15573 = vmatprep.subr.bf16.mxu0 %v16208_v0  ;;  %v7653_v30 = vld [vmem:[#allocation7 + $0x18] sm:$0xff] }
 0x6be   : > { %15669 = vmatprep.subr.bf16.mxu1 %v16208_v0 }
 0x6c0   : > { %15575 = vmatpush3.bf16.msra.mxu0 %v19036_v51  ;;  %v7749_v51 = vld [vmem:[#allocation8 + $0x28] sm:$0xff] }
 0x6c1   : > { %15671 = vmatpush3.bf16.msra.mxu1 %v16517_v36  ;;  %15576 = vmatprep.subr.bf16.mxu0 %v16208_v0  ;;  %v15682_v36 = vpack.c.bf16 %v7653_v30, %v7652_v24  ;;  %v15709_v60 = vpack.c.bf16 %v7749_v51, %v7748_v37  ;;  %v7758_v30 = vld [vmem:[#allocation8 + $0x70] sm:$0xff] }
 0x6c2   : > { %15672 = vmatprep.subr.bf16.mxu1 %v16208_v0 }
 0x6c4   : > { %15578 = vmatpush3.bf16.msra.mxu0 %v19038_v9  ;;  %v7750_v9 = vld [vmem:[#allocation8 + $0x30] sm:$0xff] }
 0x6c5   : > { %15674 = vmatpush3.bf16.msra.mxu1 %v16525_v42  ;;  %15579 = vmatprep.subr.bf16.mxu0 %v16208_v0  ;;  %v7654_v42 = vld [vmem:[#allocation7 + $0x20] sm:$0xff] }
 0x6c6   : > { %15675 = vmatprep.subr.bf16.mxu1 %v16208_v0 }
 0x6c8   : > { %15581 = vmatpush3.bf16.msra.mxu0 %v19040_v13  ;;  %v15712_v13 = vpack.c.bf16 %v7751_v8, %v7750_v9 }
 0x6c9   : > { %15677 = vmatpush3.bf16.msra.mxu1 %v16533_v48  ;;  %15678 = vmatprep.subr.bf16.mxu0 %v16208_v0  ;;  %v15685_v48 = vpack.c.bf16 %v7655_v17, %v7654_v42 }
 0x6ca   : > { %15702 = vmatprep.subr.bf16.mxu1 %v16208_v0 }
 0x6cb   : > { %13066 = vmatmul.mubr.f32.vlgmr.msra.gmra.mrb[14].mxu0 %v18237_v59 }
 0x6cc   : > { %13206 = vmatmul.mubr.f32.vlgmr.msra.gmra.mrb[14].mxu1 %v18237_v59  ;;  %15680 = vmatpush3.bf16.msra.mxu0 %v15679_v18  ;;  %v7660_v59 = vld [vmem:[#allocation7 + $0x50] sm:$0xff] }
 0x6cd   : > { %15681 = vmatprep.subr.bf16.mxu0 %v16208_v0  ;;  %13240 = vmatprep.mubr.msk.f32.mxu0 %vm16209_vm0, %v18904_v20  ;;  %v15694_v40 = vpack.c.bf16 %v7661_v35, %v7660_v59 }
 0x6ce   : > { %13275 = vmatprep.mubr.msk.f32.mxu1 %vm16209_vm0, %v18904_v20  ;;  %15704 = vmatpush3.bf16.msra.mxu1 %v15703_v61 }
 0x6cf   : > { %15705 = vmatprep.subr.bf16.mxu1 %v16208_v0 }
 0x6d0   : > { %15683 = vmatpush3.bf16.msra.mxu0 %v15682_v36  ;;  %v7759_v36 = vld [vmem:[#allocation8 + $0x78] sm:$0xff] }
 0x6d1   : > { %15684 = vmatprep.subr.bf16.mxu0 %v16208_v0  ;;  %v15724_v42 = vpack.c.bf16 %v7759_v36, %v7758_v30 }
 0x6d2   : > { %15707 = vmatpush3.bf16.msra.mxu1 %v15706_v1 }
 0x6d3   : > { %15708 = vmatprep.subr.bf16.mxu1 %v16208_v0 }
 0x6d4   : > { %15686 = vmatpush3.bf16.msra.mxu0 %v15685_v48 }
 0x6d5   : > { %15687 = vmatprep.subr.bf16.mxu0 %v16208_v0 }
 0x6d6   : > { %15710 = vmatpush3.bf16.msra.mxu1 %v15709_v60 }
 0x6d7   : > { %15711 = vmatprep.subr.bf16.mxu1 %v16208_v0 }
 0x6d8   : > { %15689 = vmatpush3.bf16.msra.mxu0 %v15688_v10 }
 0x6d9   : > { %15690 = vmatprep.subr.bf16.mxu0 %v16208_v0 }
 0x6da   : > { %15713 = vmatpush3.bf16.msra.mxu1 %v15712_v13 }
 0x6db   : > { %15714 = vmatprep.subr.bf16.mxu1 %v16208_v0 }
 0x6dc   : > { %15692 = vmatpush3.bf16.msra.mxu0 %v15691_v56 }
 0x6dd   : > { %15693 = vmatprep.subr.bf16.mxu0 %v16208_v0 }
 0x6de   : > { %v6500_v20 = vpop.f32.mrb[12].mxu0  ;;  %15716 = vmatpush3.bf16.msra.mxu1 %v15715_v16 }
 0x6df   : > { %v15738_v62 = vadd.f32 %v18506_v4, %v6500_v20  ;;  %v12647_v3 = vpop.f32.mrb[13].mxu0  ;;  %15717 = vmatprep.subr.bf16.mxu1 %v16208_v0 }
 0x6e0   : > { %15695 = vmatpush3.bf16.msra.mxu0 %v15694_v40 }
 0x6e1   : > { %v6505_v19 = vmax.f32 %v15738_v62, 0.0  ;;  %15696 = vmatprep.subr.bf16.mxu0 %v16208_v0 }
 0x6e2   : > { %15719 = vmatpush3.bf16.msra.mxu1 %v15718_v23 }
 0x6e3   : > { %v6506_v2 = vadd.f32 %v6505_v19, %v18516_v32  ;;  %15720 = vmatprep.subr.bf16.mxu1 %v16208_v0 }
 0x6e4   : > { %15698 = vmatpush3.bf16.msra.mxu0 %v15697_v15 }
 0x6e5   : > { %15699 = vmatprep.subr.bf16.mxu0 %v16208_v0 }
 0x6e6   : > { %15722 = vmatpush3.bf16.msra.mxu1 %v15721_v49 }
 0x6e7   : > { %15723 = vmatprep.subr.bf16.mxu1 %v16208_v0  ;;  %v7967_v0 = vld [vmem:[%s18720_s4] ss:$0 sm:$0xff] }
 0x6e8   : > { %15701 = vmatpush3.bf16.msra.mxu0 %v15700_v38 }
 0x6ea   : > { %15725 = vmatpush3.bf16.msra.mxu1 %v15724_v42 }
 0x71f   : > { %v6928_v31 = vpop.f32.mrb[12].mxu1 }
 0x720   : > { %v15739_v45 = vadd.f32 %v18506_v4, %v6928_v31  ;;  %v12857_v50 = vpop.f32.mrb[13].mxu1 }
 0x722   : > { %v6933_v29 = vmax.f32 %v15739_v45, 0.0 }
 0x724   : > { %v6934_v44 = vadd.f32 %v6933_v29, %v6506_v2 }
 0x79e   : > { %v7356_v25 = vpop.f32.mrb[14].mxu0 }
 0x79f   : > { %v15740_v58 = vadd.f32 %v18506_v4, %v7356_v25  ;;  %v7642_v22 = vpop.f32.mrb[14].mxu1  ;;  %v13067_v27 = vpop.f32.mrb[15].mxu0 }
 0x7a0   : > { %v15741_v32 = vadd.f32 %v18506_v4, %v7642_v22  ;;  %v13207_v33 = vpop.f32.mrb[15].mxu1 }
 0x7a1   : > { %v7361_v53 = vmax.f32 %v15740_v58, 0.0 }
 0x7a2   : > { %v7647_v12 = vmax.f32 %v15741_v32, 0.0 }
 0x7a3   : > { %v7362_v5 = vadd.f32 %v7361_v53, %v6934_v44 }
 0x7a5   : > { %v7648_v18 = vadd.f32 %v7647_v12, %v7362_v5 }
 0x7a7   : > { %v7649_v24 = vmul.f32 0.0625, %v7648_v18 }
 0x7a9   : > { %13241 = vmatmul.mubr.f32.vlgmr.msra.gmra.mrb[16].mxu0 %v7649_v24 }
 0x87c   : > { %v7739_v17 = vpop.f32.mrb[16].mxu0 }
 0x87d   : > { %v7740_v4 = vadd.f32 %v7967_v0, %v7739_v17  ;;  %v13242_v48 = vpop.f32.mrb[17].mxu0 }
 0x87f   : > { %v7743_v46 = vmax.f32 %v7740_v4, 0.0 }
 0x881   : > { %13276 = vmatmul.mubr.f32.vlgmr.msra.gmra.mrb[16].mxu1 %v7743_v46 }
 0x954   : > { %v7833_v10 = vpop.f32.mrb[16].mxu1 }
 0x955   : > { %v7834_v26 = vadd.f32 %v7968_v21, %v7833_v10  ;;  %v13277_v11 = vpop.f32.mrb[17].mxu1 }
 0x957   : > { %7837 = vst [vmem:[%s340_s11] sm:$0xff] %v7834_v26 }
 0x958   : > { %16139 = shalt.err (!%p16136_p4)
}
 0x959   : > { %s16140_s17 = scalar_lea.hbm %s18673_s13, 128  ;;  %s16144_s16 = scalar_lea.hbm %s18723_s7, 896 }
 0x95a   : > { %p16141_p9 = scmp.ne.s32.totalorder %s18673_s13, %s16140_s17  ;;  %p16145_p8 = scmp.lt.u32.totalorder %s18673_s13, %s18723_s7 }
 0x95b   : > { %p16146_p12 = scmp.lt.u32.totalorder %s16144_s16, %s16140_s17  ;;  %p16148_p0 = scmp.lt.u32.totalorder %s16140_s17, %s18673_s13 }
 0x95c   : > { %p16142_p13 = pnand %p16141_p9, %p16405_p5 }
 0x95d   : > { %p16147_p6 = por %p16146_p12, %p16145_p8 }
 0x95e   : > { %p16143_p10 = pneg %p16142_p13 }
 0x95f   : > { %p16149_p3 = por %p16148_p0, %p16147_p6 }
 0x961   : > { %p16150_p7 = pnand %p16149_p3, %p16143_p10 }
 0x963   : > { %16153 = shalt.err (!%p16150_p7)
}
 0x964   : > { %15924 = dma.vmem_to_hbm [thread:$0]  (%p16405_p5), %s18675_s20, 128, %s18673_s13, %s7839_s15  }
 0x965 PF: > { %s19042_s11 = sld [smem:[#allocation15_spill]]  ;;  %p15951_p11 = scmp.ge.s32.totalorder %s16200_s27, 2 }
 0x966   : > { %s7864_s30 = sand.u32 1, %s16188_s24  }
 0x967   : > { %s7865_s9 = scalar_lea.sflag [#allocation4], %s7864_s30 }
 0x96b   : > { %p19043_p1 = scmp.ne.s32.totalorder %s19042_s11, 0 }
 0x96d   : > { %p15941_p2 = pnand %p15951_p11, %p19043_p1 }
 0x96f   : > { %16183 = dma.done.wait (!%p15941_p2), %s7865_s9, 128  }
 0x970   : > { %16185 = vsyncadd (!%p15941_p2), %s7865_s9, 4294967168  ;;  %p22_p4 = scmp.ge.s32.totalorder %s16391_s22, 9   ;;  %s19044_s24 = smov %s16192_s25 }
 0x971   : > { %s19045_s25 = smov %s16196_s26  ;;  %s19046_s26 = smov %s16401_s18 }
 0x972   : > { %s19047_s27 = smov %s16391_s22  ;;  %24 = sbr.rel (!%p22_p4) target bundleno = 7 (0x7), region = 113 }
 0x979   :  { %7870 = vsyncpa [#allocation3], 1 }
 0x97a   :  { %7872 = vsyncpa [#allocation3 + $0x1], 1 }
 0x97b   :  { %7873 = vsyncpa [#allocation6], 1 }
 0x97c   :  { %7874 = vsyncpa [#allocation9], 1 }
 0x97d   :  { %7875 = vsyncpa [#allocation4], 1 }
 0x97e   :  { %7877 = vsyncpa [#allocation4 + $0x1], 1 }

</bundles_post_ra>
